<compile_context>
chip_gen: v5e
topology: v5e:2x2
jax: 0.10.0
libtpu: 0.0.40
codegen_flags: <defaults>
</compile_context>

<pallas_src>
import functools

import jax
import jax.numpy as jnp
from jax import lax
from jax.experimental import pallas as pl
from jax.experimental.pallas import tpu as pltpu


def _cat_conv1x1_kernel(x1_ref, x2_ref, w_ref, b_ref, o_ref, acc_ref, *, ks):
    # x1_ref, x2_ref: (tc, HW)      channel chunk k of each input half
    # w_ref:          (2*ks, CO, tc) all weight chunks, VMEM resident
    # b_ref:          (CO, 1)
    # o_ref:          (CO, HW)      stays resident across the K axis
    # acc_ref:        (CO, HW) f32  VMEM scratch accumulator
    k = pl.program_id(1)

    @pl.when(k == 0)
    def _init():
        acc_ref[...] = jnp.zeros_like(acc_ref)

    w1k = w_ref[k]          # (CO, tc) weight chunk for the x36 half
    w2k = w_ref[ks + k]     # (CO, tc) weight chunk for the x38 half
    acc_ref[...] += (
        jnp.dot(w1k, x1_ref[...],
                preferred_element_type=jnp.float32,
                precision=lax.Precision.HIGHEST)
        + jnp.dot(w2k, x2_ref[...],
                  preferred_element_type=jnp.float32,
                  precision=lax.Precision.HIGHEST)
    )

    @pl.when(k == pl.num_programs(1) - 1)
    def _store():
        o_ref[...] = (acc_ref[...] + b_ref[...]).astype(o_ref.dtype)


@jax.jit
def cat_conv1x1(x36, x38, weight, bias):
    """Fused torch.cat([x36, x38], dim=1) + Conv2d(384, 48, 1x1) forward.

    x36, x38: [N, 192, 27, 27] (NCHW, float32)
    weight:   [48, 384, 1, 1]
    bias:     [48]
    returns:  [N, 48, 27, 27]
    """
    n, c1, h, w = x36.shape
    c2 = x38.shape[1]
    co = weight.shape[0]
    hw = h * w
    assert c1 == c2, "both concatenated halves must have the same channel count"

    # Channel chunk size for the contraction grid axis (multiple of 8).
    tc = 64 if c1 % 64 == 0 else c1
    ks = c1 // tc

    # Pure reshapes: NCHW -> (N, C, HW).
    x1 = x36.reshape(n, c1, hw)                          # [N, 192, 729]
    x2 = x38.reshape(n, c2, hw)                          # [N, 192, 729]

    # Chunk the 1x1-conv weight once (tiny, trace-time XLA ops):
    # (CO, C1+C2) -> (2*Ks, CO, tc); chunks [0, ks) belong to x36, [ks, 2ks) to x38.
    w2d = weight.reshape(co, c1 + c2)
    w1 = w2d[:, :c1].reshape(co, ks, tc).transpose(1, 0, 2)   # (ks, CO, tc)
    w2 = w2d[:, c1:].reshape(co, ks, tc).transpose(1, 0, 2)   # (ks, CO, tc)
    w_chunks = jnp.concatenate([w1, w2], axis=0)              # (2*ks, CO, tc)
    b = bias.reshape(co, 1)                                   # broadcast over HW lanes

    kernel = functools.partial(_cat_conv1x1_kernel, ks=ks)

    # NOTE: for N > 1 the batch axis is "parallel" (megacore-shardable); per-step
    # footprint is ~1.5 MB so larger batch blocks would also fit if ever needed.
    out = pl.pallas_call(
        kernel,
        out_shape=jax.ShapeDtypeStruct((n, co, hw), jnp.float32),
        grid_spec=pltpu.PrefetchScalarGridSpec(
            num_scalar_prefetch=0,
            grid=(n, ks),                                # batch x channel-chunks
            in_specs=[
                pl.BlockSpec((None, tc, hw), lambda i, k: (i, k, 0)),
                pl.BlockSpec((None, tc, hw), lambda i, k: (i, k, 0)),
                pl.BlockSpec((2 * ks, co, tc), lambda i, k: (0, 0, 0)),
                pl.BlockSpec((co, 1), lambda i, k: (0, 0)),
            ],
            out_specs=pl.BlockSpec((None, co, hw), lambda i, k: (i, 0, 0)),
            scratch_shapes=[pltpu.VMEM((co, hw), jnp.float32)],
        ),
        compiler_params=pltpu.CompilerParams(
            dimension_semantics=("parallel", "arbitrary")),
    )(x1, x2, w_chunks, b)

    return out.reshape(n, co, h, w)                       # pure reshape back to NCHW


if __name__ == "__main__":
    key = jax.random.PRNGKey(0)
    k_x36, k_x38, k_w, k_b = jax.random.split(key, 4)

    N, C, H, W = 1, 192, 27, 27
    CO, CI = 48, 384

    x36 = jax.random.normal(k_x36, (N, C, H, W), dtype=jnp.float32)
    x38 = jax.random.normal(k_x38, (N, C, H, W), dtype=jnp.float32)

    # Deterministic Conv2d(384, 48, 1x1)-shaped parameters.
    bound = 1.0 / (CI ** 0.5)
    weight = jax.random.uniform(k_w, (CO, CI, 1, 1), dtype=jnp.float32,
                                minval=-bound, maxval=bound)
    bias = jax.random.uniform(k_b, (CO,), dtype=jnp.float32,
                              minval=-bound, maxval=bound)

    out = cat_conv1x1(x36, x38, weight, bias)
    out = jax.block_until_ready(out)

    # Pure-JAX reference: cat + 1x1 conv as einsum (true-f32 precision).
    x_cat = jnp.concatenate([x36, x38], axis=1)                 # [N, 384, H, W]
    ref = jnp.einsum("nchw,oc->nohw", x_cat, weight.reshape(CO, CI),
                     precision=lax.Precision.HIGHEST) \
        + bias.reshape(1, CO, 1, 1)

    assert out.shape == (N, CO, H, W), out.shape
    assert jnp.allclose(out, ref, atol=1e-4, rtol=1e-4), \
        float(jnp.max(jnp.abs(out - ref)))

    print("KERNEL_OK")
</pallas_src>

<mosaic_0001>
module attributes {stable_mosaic.version = 11 : i64} {
  func.func @_cat_conv1x1_kernel(%arg0: i32, %arg1: i32, %arg2: memref<1x64x729xf32, #tpu.memory_space<vmem>>, %arg3: memref<1x64x729xf32, #tpu.memory_space<vmem>>, %arg4: memref<6x48x64xf32, #tpu.memory_space<vmem>>, %arg5: memref<48x1xf32, #tpu.memory_space<vmem>>, %arg6: memref<1x48x729xf32, #tpu.memory_space<vmem>>, %arg7: memref<48x729xf32, #tpu.memory_space<vmem>>) attributes {dimension_semantics = [#tpu.dimension_semantics<parallel>, #tpu.dimension_semantics<arbitrary>], iteration_bounds = array<i64: 1, 3>, scalar_prefetch = 0 : i64, scratch_operands = 1 : i64, tpu.core_type = #tpu.core_type<tc>, window_params = [{transform_indices = @transform_0, window_bounds = array<i64: 1, 64, 729>}, {transform_indices = @transform_1, window_bounds = array<i64: 1, 64, 729>}, {pipeline_mode = #tpu.pipeline_mode<synchronous>, transform_indices = @transform_2, window_bounds = array<i64: 6, 48, 64>}, {pipeline_mode = #tpu.pipeline_mode<synchronous>, transform_indices = @transform_3, window_bounds = array<i64: 48, 1>}, {transform_indices = @transform_4, window_bounds = array<i64: 1, 48, 729>}]} {
    %c0_i32 = arith.constant 0 : i32
    %0 = arith.cmpi eq, %arg1, %c0_i32 : i32
    %1 = arith.extui %0 : i1 to i32
    %c0_i32_0 = arith.constant 0 : i32
    %2 = arith.cmpi ne, %1, %c0_i32_0 : i32
    scf.if %2 {
      %cst_16 = arith.constant 0.000000e+00 : f32
      %23 = vector.broadcast %cst_16 : f32 to vector<48x729xf32>
      %c0_17 = arith.constant 0 : index
      %c0_18 = arith.constant 0 : index
      %24 = vector.load %arg7[%c0_17, %c0_18] : memref<48x729xf32, #tpu.memory_space<vmem>>, vector<48x729xf32>
      tpu.vector_store %arg7[%c0_17, %c0_18], %23 {strides = array<i32>} : memref<48x729xf32, #tpu.memory_space<vmem>>, vector<48x729xf32>,
    } else {
    }
    %3 = arith.index_cast %arg1 : i32 to index
    %c0 = arith.constant 0 : index
    %c0_1 = arith.constant 0 : index
    %4 = vector.load %arg4[%3, %c0, %c0_1] : memref<6x48x64xf32, #tpu.memory_space<vmem>>, vector<1x48x64xf32>
    %5 = vector.shape_cast %4 : vector<1x48x64xf32> to vector<48x64xf32>
    %c3_i32 = arith.constant 3 : i32
    %6 = arith.addi %c3_i32, %arg1 : i32
    %7 = arith.index_cast %6 : i32 to index
    %c0_2 = arith.constant 0 : index
    %c0_3 = arith.constant 0 : index
    %8 = vector.load %arg4[%7, %c0_2, %c0_3] : memref<6x48x64xf32, #tpu.memory_space<vmem>>, vector<1x48x64xf32>
    %9 = vector.shape_cast %8 : vector<1x48x64xf32> to vector<48x64xf32>
    %c0_4 = arith.constant 0 : index
    %c0_5 = arith.constant 0 : index
    %10 = vector.load %arg7[%c0_4, %c0_5] : memref<48x729xf32, #tpu.memory_space<vmem>>, vector<48x729xf32>
    %c0_6 = arith.constant 0 : index
    %c0_7 = arith.constant 0 : index
    %c0_8 = arith.constant 0 : index
    %11 = vector.load %arg2[%c0_6, %c0_7, %c0_8] : memref<1x64x729xf32, #tpu.memory_space<vmem>>, vector<1x64x729xf32>
    %12 = vector.shape_cast %11 : vector<1x64x729xf32> to vector<64x729xf32>
    %cst = arith.constant dense<0.000000e+00> : vector<48x729xf32>
    %13 = tpu.matmul %5, %12, %cst {dimension_numbers = #tpu.dot_dimension_numbers<[1], [0], [0], [1], [0, 0, 1, 1], [], []>, precision = #tpu.contract_precision<fp32>} : vector<48x64xf32>, vector<64x729xf32>, vector<48x729xf32> -> vector<48x729xf32>
    %c0_9 = arith.constant 0 : index
    %c0_10 = arith.constant 0 : index
    %c0_11 = arith.constant 0 : index
    %14 = vector.load %arg3[%c0_9, %c0_10, %c0_11] : memref<1x64x729xf32, #tpu.memory_space<vmem>>, vector<1x64x729xf32>
    %15 = vector.shape_cast %14 : vector<1x64x729xf32> to vector<64x729xf32>
    %cst_12 = arith.constant dense<0.000000e+00> : vector<48x729xf32>
    %16 = tpu.matmul %9, %15, %cst_12 {dimension_numbers = #tpu.dot_dimension_numbers<[1], [0], [0], [1], [0, 0, 1, 1], [], []>, precision = #tpu.contract_precision<fp32>} : vector<48x64xf32>, vector<64x729xf32>, vector<48x729xf32> -> vector<48x729xf32>
    %17 = arith.addf %13, %16 : vector<48x729xf32>
    %18 = arith.addf %10, %17 : vector<48x729xf32>
    %c0_13 = arith.constant 0 : index
    %c0_14 = arith.constant 0 : index
    %19 = vector.load %arg7[%c0_13, %c0_14] : memref<48x729xf32, #tpu.memory_space<vmem>>, vector<48x729xf32>
    tpu.vector_store %arg7[%c0_13, %c0_14], %18 {strides = array<i32>} : memref<48x729xf32, #tpu.memory_space<vmem>>, vector<48x729xf32>,
    %c2_i32 = arith.constant 2 : i32
    %20 = arith.cmpi eq, %arg1, %c2_i32 : i32
    %21 = arith.extui %20 : i1 to i32
    %c0_i32_15 = arith.constant 0 : i32
    %22 = arith.cmpi ne, %21, %c0_i32_15 : i32
    scf.if %22 {
      %c0_16 = arith.constant 0 : index
      %c0_17 = arith.constant 0 : index
      %23 = vector.load %arg7[%c0_16, %c0_17] : memref<48x729xf32, #tpu.memory_space<vmem>>, vector<48x729xf32>
      %c0_18 = arith.constant 0 : index
      %c0_19 = arith.constant 0 : index
      %24 = vector.load %arg5[%c0_18, %c0_19] : memref<48x1xf32, #tpu.memory_space<vmem>>, vector<48x1xf32>
      %25 = vector.broadcast %24 : vector<48x1xf32> to vector<48x729xf32>
      %26 = arith.addf %23, %25 : vector<48x729xf32>
      %c0_20 = arith.constant 0 : index
      %c0_21 = arith.constant 0 : index
      %c0_22 = arith.constant 0 : index
      %27 = vector.load %arg6[%c0_20, %c0_21, %c0_22] : memref<1x48x729xf32, #tpu.memory_space<vmem>>, vector<1x48x729xf32>
      %28 = vector.shape_cast %27 : vector<1x48x729xf32> to vector<48x729xf32>
      %29 = vector.shape_cast %26 : vector<48x729xf32> to vector<1x48x729xf32>
      tpu.vector_store %arg6[%c0_20, %c0_21, %c0_22], %29 {strides = array<i32>} : memref<1x48x729xf32, #tpu.memory_space<vmem>>, vector<1x48x729xf32>,
    } else {
    }
    return
  }
  func.func @transform_0(%arg0: i32, %arg1: i32) -> (i32, i32, i32) {
    %c0_i32 = arith.constant 0 : i32
    %c0_i32_0 = arith.constant 0 : i32
    return %arg0, %arg1, %c0_i32 : i32, i32, i32
  }
  func.func @transform_1(%arg0: i32, %arg1: i32) -> (i32, i32, i32) {
    %c0_i32 = arith.constant 0 : i32
    %c0_i32_0 = arith.constant 0 : i32
    return %arg0, %arg1, %c0_i32 : i32, i32, i32
  }
  func.func @transform_2(%arg0: i32, %arg1: i32) -> (i32, i32, i32) {
    %c0_i32 = arith.constant 0 : i32
    %c0_i32_0 = arith.constant 0 : i32
    %c0_i32_1 = arith.constant 0 : i32
    %c0_i32_2 = arith.constant 0 : i32
    return %c0_i32, %c0_i32_0, %c0_i32_1 : i32, i32, i32
  }
  func.func @transform_3(%arg0: i32, %arg1: i32) -> (i32, i32) {
    %c0_i32 = arith.constant 0 : i32
    %c0_i32_0 = arith.constant 0 : i32
    %c0_i32_1 = arith.constant 0 : i32
    return %c0_i32, %c0_i32_0 : i32, i32
  }
  func.func @transform_4(%arg0: i32, %arg1: i32) -> (i32, i32, i32) {
    %c0_i32 = arith.constant 0 : i32
    %c0_i32_0 = arith.constant 0 : i32
    %c0_i32_1 = arith.constant 0 : i32
    return %arg0, %c0_i32, %c0_i32_0 : i32, i32, i32
  }
}

</mosaic_0001>

<bundles_post_ra>
// kernel: cat_conv1x1.1
= control target key start
LH: loop header
LB: loop body
LE: loop exit
PB: predicated region body
PF: predicated region fallthrough
CT: control target
= control target key end

     0   :  { %s5616_s15 = smov 0   ;;  %s5618_s16 = smov 0   ;;  %s8306_s0 = inlined_call_operand.vmem [shape: f32[1,192,729], index: 0, kind: input, shape index: {}]   ;;  %s8307_s1 = inlined_call_operand.vmem [shape: f32[1,192,729], index: 1, kind: input, shape index: {}]   ;;  %s8308_s2 = inlined_call_operand.vmem [shape: f32[6,48,64], index: 2, kind: input, shape index: {}]   ;;  %s8309_s3 = inlined_call_operand.vmem [shape: f32[48,1], index: 3, kind: input, shape index: {}]   ;;  %s8310_s4 = inlined_call_operand.vmem [shape: f32[1,48,729], index: 4, kind: output, shape index: {}]  }
   0x1   :  { %s5620_s17 = smov 0  }
   0x2 LB: > { %s23_s18 = sadd.s32 1, %s5583_s16  ;;  %p5519_p0 = scmp.ge.s32.totalorder %s5587_s17, 1  ;;  %s5587_s17 = sphi %s5620_s17, %s14_s17   ;;  %s5583_s16 = sphi %s5618_s16, %s8559_s16   ;;  %s5579_s15 = sphi %s5616_s15, %s8558_s15  }
   0x3   : > { %p24_p1 = scmp.ge.s32.totalorder %s23_s18, 3  ;;  %p200_p2 = scmp.lt.s32.totalorder %s5587_s17, 4 }
   0x5   : > { %s8561_s18 = smov (%p24_p1, %s23_s18), 0  ;;  %p201_p3 = pnand %p5519_p0, %p200_p2 }
   0x7   : > { %204 = sbr.rel (%p201_p3) target bundleno = 1217 (0x4c1), region = 36 }
   0xc   : > { %s5520_s19 = sshll.u32 %s5579_s15, 3  ;;  %p5524_p5 = scmp.ne.s32.totalorder %s5579_s15, 0 }
   0xd   : > { %p244_p4 = scmp.lt.s32.totalorder %s5520_s19, 23 }
   0xe   : > { %271 = sbr.rel (%p5524_p5) target bundleno = 56 (0x38), region = 40 }
   0xf   : > { %s8563_s19 = smov (!%p244_p4, %s5520_s19), 23 }
  0x10   : > { %s5535_s20 = smul.u32 48, %s8563_s19 }
  0x12   : > { %s5640_s23 = scalar_lea.vmem %s8306_s0, %s5535_s20  ;;  %s5645_s26 = scalar_lea.vmem %s8307_s1, %s5535_s20 }
  0x13   : > { %v5589_v0 = vmov 0.0   ;;  %vm277_vm0 = vcmask 728064  }
  0x14   : > { %272 = vst [vmem:[#allocation2] sm:$0xff] %v5589_v0 }
  0x15   : > { %273 = vst [vmem:[#allocation2 + $0x8] sm:$0xff] %v5589_v0 }
  0x16   : > { %274 = vst [vmem:[#allocation2 + $0x10] sm:$0xff] %v5589_v0 }
  0x17   : > { %275 = vst [vmem:[#allocation2 + $0x18] sm:$0xff] %v5589_v0 }
  0x18   : > { %276 = vst [vmem:[#allocation2 + $0x20] sm:$0xff] %v5589_v0 }
  0x19   : > { %279 = vst [vmem:[#allocation2 + $0x30] sm:$0xff] %v5589_v0 }
  0x1a   : > { %280 = vst [vmem:[#allocation2 + $0x38] sm:$0xff] %v5589_v0 }
  0x1b   : > { %281 = vst [vmem:[#allocation2 + $0x40] sm:$0xff] %v5589_v0 }
  0x1c   : > { %282 = vst [vmem:[#allocation2 + $0x48] sm:$0xff] %v5589_v0 }
  0x1d   : > { %283 = vst [vmem:[#allocation2 + $0x50] sm:$0xff] %v5589_v0 }
  0x1e   : > { %285 = vst [vmem:[#allocation2 + $0x60] sm:$0xff] %v5589_v0 }
  0x1f   : > { %286 = vst [vmem:[#allocation2 + $0x68] sm:$0xff] %v5589_v0 }
  0x20   : > { %287 = vst [vmem:[#allocation2 + $0x70] sm:$0xff] %v5589_v0 }
  0x21   : > { %288 = vst [vmem:[#allocation2 + $0x78] sm:$0xff] %v5589_v0 }
  0x22   : > { %289 = vst [vmem:[#allocation2 + $0x80] sm:$0xff] %v5589_v0 }
  0x23   : > { %291 = vst [vmem:[#allocation2 + $0x90] sm:$0xff] %v5589_v0 }
  0x24   : > { %292 = vst [vmem:[#allocation2 + $0x98] sm:$0xff] %v5589_v0 }
  0x25   : > { %293 = vst [vmem:[#allocation2 + $0xa0] sm:$0xff] %v5589_v0 }
  0x26   : > { %294 = vst [vmem:[#allocation2 + $0xa8] sm:$0xff] %v5589_v0 }
  0x27   : > { %295 = vst [vmem:[#allocation2 + $0xb0] sm:$0xff] %v5589_v0 }
  0x28   : > { %297 = vst [vmem:[#allocation2 + $0xc0] sm:$0xff] %v5589_v0 }
  0x29   : > { %298 = vst [vmem:[#allocation2 + $0xc8] sm:$0xff] %v5589_v0 }
  0x2a   : > { %299 = vst [vmem:[#allocation2 + $0xd0] sm:$0xff] %v5589_v0 }
  0x2b   : > { %300 = vst [vmem:[#allocation2 + $0xd8] sm:$0xff] %v5589_v0 }
  0x2c   : > { %301 = vst [vmem:[#allocation2 + $0xe0] sm:$0xff] %v5589_v0 }
  0x2d   : > { %303 = vst [vmem:[#allocation2 + $0xf0] sm:$0xff] %v5589_v0 }
  0x2e   : > { %304 = vst [vmem:[#allocation2 + $0xf8] sm:$0xff] %v5589_v0 }
  0x2f   : > { %305 = vst [vmem:[#allocation2 + $0x100] sm:$0xff] %v5589_v0 }
  0x30   : > { %306 = vst [vmem:[#allocation2 + $0x108] sm:$0xff] %v5589_v0 }
  0x31   : > { %307 = vst [vmem:[#allocation2 + $0x110] sm:$0xff] %v5589_v0 }
  0x32   : > { %278 = vst.msk [vmem:[#allocation2 + $0x28] sm:$0xff] %vm277_vm0, %v5589_v0 }
  0x33   : > { %284 = vst.msk [vmem:[#allocation2 + $0x58] sm:$0xff] %vm277_vm0, %v5589_v0 }
  0x34   : > { %290 = vst.msk [vmem:[#allocation2 + $0x88] sm:$0xff] %vm277_vm0, %v5589_v0 }
  0x35   : > { %296 = vst.msk [vmem:[#allocation2 + $0xb8] sm:$0xff] %vm277_vm0, %v5589_v0 }
  0x36   : > { %302 = vst.msk [vmem:[#allocation2 + $0xe8] sm:$0xff] %vm277_vm0, %v5589_v0 }
  0x37   : > { %308 = vst.msk [vmem:[#allocation2 + $0x118] sm:$0xff] %vm277_vm0, %v5589_v0 }
  0x38 PF: > { %v452_v1 = vld [vmem:[%s5645_s26 + $0x150] sm:$0xff]  ;;  %v446_v2 = vld [vmem:[%s5645_s26 + $0x120] sm:$0xff]  ;;  %s309_s27 = smul.u32 48, %s5579_s15  ;;  %vm458_vm1 = vcmask 523264   ;;  %v453_v27 = vld [vmem:[%s5645_s26 + $0x158] sm:$0xff]  ;;  %vm5240_vm2 = vcmask 728064  }
  0x39   : > { %v440_v3 = vld [vmem:[%s5645_s26 + $0xf0] sm:$0xff]  ;;  %v5652_v4 = vand.u32 4294901760, %v452_v1  ;;  %v5654_v5 = vand.u32 4294901760, %v446_v2  ;;  %v434_v7 = vld [vmem:[%s5645_s26 + $0xc0] sm:$0xff]  ;;  %v5730_v38 = vand.u32 4294901760, %v453_v27  ;;  %v447_v44 = vld [vmem:[%s5645_s26 + $0x128] sm:$0xff] }
  0x3a   : > { %v5656_v6 = vand.u32 4294901760, %v440_v3  ;;  %v428_v8 = vld [vmem:[%s5645_s26 + $0x90] sm:$0xff]  ;;  %v422_v9 = vld [vmem:[%s5645_s26 + $0x60] sm:$0xff]  ;;  %v5661_v10 = vand.u32 4294901760, %v434_v7  ;;  %s5672_s30 = scalar_lea.vmem %s8308_s2, %s309_s27  ;;  %v5763_v55 = vand.u32 4294901760, %v447_v44  ;;  %v441_v56 = vld [vmem:[%s5645_s26 + $0xf8] sm:$0xff] }
  0x3b   : > { %v5663_v11 = vand.u32 4294901760, %v428_v8  ;;  %v5665_v12 = vand.u32 4294901760, %v422_v9  ;;  %v416_v13 = vld [vmem:[%s5645_s26 + $0x30] sm:$0xff]  ;;  %v410_v14 = vld [vmem:[%s5645_s26] sm:$0xff]  ;;  %486 = vmatpush.msra.mxu0 %v5652_v4  ;;  %v5676_v15 = vsub.f32 %v452_v1, %v5652_v4  ;;  %v5679_v16 = vsub.f32 %v446_v2, %v5654_v5  ;;  %703 = vmatpush.msra.mxu3 %v5652_v4  ;;  %v5526_v39 = vld [vmem:[%s5672_s30 + $0x98] sm:$0xff]  ;;  %p5531_p6 = scmp.ne.s32.totalorder %s5579_s15, 2 }
  0x3c   : > { %v5683_v17 = vsub.f32 %v440_v3, %v5656_v6  ;;  %v5685_v18 = vand.u32 4294901760, %v416_v13  ;;  %v5525_v19 = vld [vmem:[%s5672_s30 + $0x90] sm:$0xff]  ;;  %v5689_v20 = vsub.f32 %v434_v7, %v5661_v10  ;;  %v5702_v26 = vand.u32 4294901760, %v410_v14  ;;  %v5527_v47 = vld [vmem:[%s5672_s30 + $0xa0] sm:$0xff]  ;;  %v435_v61 = vld [vmem:[%s5645_s26 + $0xc8] sm:$0xff] }
  0x3d   : > { %v5692_v21 = vsub.f32 %v428_v8, %v5663_v11  ;;  %v5695_v22 = vsub.f32 %v422_v9, %v5665_v12  ;;  %488 = vmatpush.msra.mxu0 %v5654_v5  ;;  %641 = vmatpush.msra.mxu2 %v5676_v15  ;;  %v560_v23 = vand.u32 4294901760, %v5676_v15  ;;  %v566_v24 = vand.u32 4294901760, %v5679_v16  ;;  %v429_v2 = vld [vmem:[%s5645_s26 + $0x98] sm:$0xff] }
  0x3e   : > { %v572_v25 = vand.u32 4294901760, %v5683_v17  ;;  %705 = vmatpush.msra.mxu3 %v5654_v5  ;;  %v578_v28 = vand.u32 4294901760, %v5689_v20  ;;  %v5708_v29 = vsub.f32 %v416_v13, %v5685_v18  ;;  %v460_v30 = vsel %vm458_vm1, %v5525_v19, 0 }
  0x3f   : > { %v584_v31 = vand.u32 4294901760, %v5692_v21  ;;  %490 = vmatpush.msra.mxu0 %v5656_v6  ;;  %644 = vmatpush.msra.mxu2 %v5679_v16  ;;  %v561_v32 = vsub.f32 %v5676_v15, %v560_v23  ;;  %v567_v33 = vsub.f32 %v5679_v16, %v566_v24  ;;  %v5723_v35 = vand.u32 4294901760, %v460_v30 }
  0x40   : > { %v573_v34 = vsub.f32 %v5683_v17, %v572_v25  ;;  %707 = vmatpush.msra.mxu3 %v5656_v6  ;;  %v579_v36 = vsub.f32 %v5689_v20, %v578_v28  ;;  %v590_v37 = vand.u32 4294901760, %v5695_v22  ;;  %v5739_v43 = vsub.f32 %v410_v14, %v5702_v26 }
  0x41   : > { %492 = vmatpush.msra.mxu0 %v5661_v10  ;;  %647 = vmatpush.msra.mxu2 %v5683_v17  ;;  %v562_v40 = vand.u32 4294901760, %v561_v32  ;;  %v568_v41 = vand.u32 4294901760, %v567_v33  ;;  %v5736_v42 = vsub.f32 %v460_v30, %v5723_v35  ;;  %v585_v45 = vsub.f32 %v5692_v21, %v584_v31  ;;  %v5528_v30 = vld [vmem:[%s5672_s30 + $0xa8] sm:$0xff] }
  0x42   : > { %709 = vmatpush.msra.mxu3 %v5661_v10  ;;  %v596_v46 = vand.u32 4294901760, %v5708_v29  ;;  %v574_v48 = vand.u32 4294901760, %v573_v34  ;;  %v5753_v50 = vsub.f32 %v453_v27, %v5730_v38  ;;  %v463_v51 = vsel %vm458_vm1, %v5526_v39, 0 }
  0x43   : > { %494 = vmatpush.msra.mxu0 %v5663_v11  ;;  %563 = vmatpush.msra.mxu1 %v562_v40  ;;  %v5750_v49 = vand.u32 4294901760, %v5736_v42  ;;  %v580_v52 = vand.u32 4294901760, %v579_v36  ;;  %v591_v53 = vsub.f32 %v5695_v22, %v590_v37  ;;  %v5761_v54 = vand.u32 4294901760, %v463_v51 }
  0x44   : > { %650 = vmatpush.msra.mxu2 %v5689_v20  ;;  %711 = vmatpush.msra.mxu3 %v5663_v11  ;;  %v952_v58 = vand.u32 4294901760, %v5753_v50  ;;  %v602_v59 = vand.u32 4294901760, %v5739_v43  ;;  %v466_v60 = vsel %vm458_vm1, %v5527_v47, 0  ;;  %v597_v62 = vsub.f32 %v5708_v29, %v596_v46 }
  0x45   : > { %496 = vmatpush.msra.mxu0 %v5665_v12  ;;  %569 = vmatpush.msra.mxu1 %v568_v41  ;;  %v504_v57 = vsub.f32 %v5736_v42, %v5750_v49  ;;  %v5779_v63 = vsub.f32 %v463_v51, %v5761_v54  ;;  %v5782_v0 = vsub.f32 %v447_v44, %v5763_v55  ;;  %v5784_v1 = vand.u32 4294901760, %v466_v60 }
  0x46   : > { %653 = vmatpush.msra.mxu2 %v5692_v21  ;;  %713 = vmatpush.msra.mxu3 %v5665_v12  ;;  %v586_v7 = vand.u32 4294901760, %v585_v45  ;;  %v953_v8 = vsub.f32 %v5753_v50, %v952_v58  ;;  %v5793_v9 = vand.u32 4294901760, %v441_v56  ;;  %v592_v13 = vand.u32 4294901760, %v591_v53 }
  0x47   : > { %498 = vmatpush.msra.mxu0 %v5685_v18  ;;  %575 = vmatpush.msra.mxu1 %v574_v48  ;;  %v5788_v3 = vand.u32 4294901760, %v504_v57  ;;  %v5798_v14 = vand.u32 4294901760, %v5779_v63  ;;  %v958_v19 = vand.u32 4294901760, %v5782_v0  ;;  %v5801_v27 = vand.u32 4294901760, %v435_v61 }
  0x48   : > { %656 = vmatpush.msra.mxu2 %v5695_v22  ;;  %715 = vmatpush.msra.mxu3 %v5685_v18  ;;  %v603_v32 = vsub.f32 %v5739_v43, %v602_v59  ;;  %v5809_v33 = vsub.f32 %v466_v60, %v5784_v1  ;;  %v5812_v34 = vsub.f32 %v441_v56, %v5793_v9  ;;  %v5814_v36 = vand.u32 4294901760, %v429_v2  ;;  %v423_v60 = vld [vmem:[%s5645_s26 + $0x68] sm:$0xff] }
  0x49   : > { %500 = vmatpush.msra.mxu0 %v5702_v26  ;;  %581 = vmatpush.msra.mxu1 %v580_v52  ;;  %v598_v39 = vand.u32 4294901760, %v597_v62  ;;  %v954_v40 = vand.u32 4294901760, %v953_v8  ;;  %v512_v41 = vsub.f32 %v5779_v63, %v5798_v14  ;;  %v959_v44 = vsub.f32 %v5782_v0, %v958_v19 }
  0x4a   : > { %659 = vmatpush.msra.mxu2 %v5708_v29  ;;  %506 = vmatmul.f32.vlgmr.msra.gmra.mxu0 %v5788_v3  ;;  %v964_v45 = vand.u32 4294901760, %v5812_v34  ;;  %v469_v47 = vsel %vm458_vm1, %v5528_v30, 0  ;;  %v5827_v48 = vsub.f32 %v435_v61, %v5801_v27  ;;  %v5830_v51 = vsub.f32 %v429_v2, %v5814_v36 }
  0x4b   : > { %587 = vmatpush.msra.mxu1 %v586_v7  ;;  %717 = vmatpush.msra.mxu3 %v5702_v26  ;;  %v604_v52 = vand.u32 4294901760, %v603_v32  ;;  %v960_v53 = vand.u32 4294901760, %v959_v44  ;;  %v5836_v56 = vand.u32 4294901760, %v5809_v33  ;;  %v5843_v61 = vand.u32 4294901760, %v512_v41  ;;  %v5529_v7 = vld [vmem:[%s5672_s30 + $0xb0] sm:$0xff] }
  0x4c   : > { %662 = vmatpush.msra.mxu2 %v5739_v43  ;;  %721 = vmatmul.f32.vlgmr.msra.gmra.mxu3 %v5750_v49  ;;  %v970_v57 = vand.u32 4294901760, %v5827_v48  ;;  %v965_v62 = vsub.f32 %v5812_v34, %v964_v45  ;;  %v5848_v2 = vand.u32 4294901760, %v469_v47  ;;  %v5851_v8 = vand.u32 4294901760, %v423_v60 }
  0x4d   : > { %665 = vmatmul.f32.vlgmr.msra.gmra.mxu2 %v5736_v42  ;;  %593 = vmatpush.msra.mxu1 %v592_v13  ;;  %v976_v13 = vand.u32 4294901760, %v5830_v51  ;;  %v520_v30 = vsub.f32 %v5809_v33, %v5836_v56  ;;  %v472_v32 = vsel %vm458_vm1, %v5529_v7, 0 }
  0x4e   : > { %878 = vmatpush.msrb.mxu2 %v5730_v38  ;;  %766 = vmatpush.msrb.mxu0 %v560_v23  ;;  %v971_v15 = vsub.f32 %v5827_v48, %v970_v57  ;;  %v5861_v23 = vsub.f32 %v423_v60, %v5851_v8  ;;  %v966_v16 = vand.u32 4294901760, %v965_v62  ;;  %v5893_v62 = vand.u32 4294901760, %v472_v32 }
  0x4f   : > { %599 = vmatpush.msra.mxu1 %v598_v39  ;;  %955 = vmatpush.msrb.mxu3 %v954_v40  ;;  %v417_v39 = vld [vmem:[%s5645_s26 + $0x38] sm:$0xff]  ;;  %v977_v44 = vsub.f32 %v5830_v51, %v976_v13 }
  0x50   : > { %880 = vmatpush.msrb.mxu2 %v5763_v55  ;;  %770 = vmatpush.msrb.mxu0 %v566_v24  ;;  %v5870_v24 = vsub.f32 %v469_v47, %v5848_v2  ;;  %v982_v40 = vand.u32 4294901760, %v5861_v23  ;;  %v5873_v41 = vand.u32 4294901760, %v417_v39  ;;  %v972_v47 = vand.u32 4294901760, %v971_v15 }
  0x51   : > { %605 = vmatpush.msra.mxu1 %v604_v52  ;;  %961 = vmatpush.msrb.mxu3 %v960_v53  ;;  %v411_v52 = vld [vmem:[%s5645_s26 + $0x8] sm:$0xff]  ;;  %v5923_v20 = vsub.f32 %v472_v32, %v5893_v62 }
  0x52   : > { %514 = vmatmul.f32.gmra.mxu0 %v5843_v61  ;;  %607 = vmatmul.f32.vlgmr.msra.gmra.mxu1 %v5723_v35  ;;  %v5885_v53 = vsub.f32 %v417_v39, %v5873_v41  ;;  %v5887_v60 = vand.u32 4294901760, %v411_v52  ;;  %v5897_v17 = vand.u32 4294901760, %v5870_v24 }
  0x53   : > { %829 = vmatpush.msrb.mxu1 %v5652_v4  ;;  %882 = vmatpush.msrb.mxu2 %v5793_v9  ;;  %v5891_v4 = vand.u32 4294901760, %v520_v30  ;;  %v5530_v30 = vld [vmem:[%s5672_s30 + $0xb8] sm:$0xff] }
  0x54   : > { %727 = vmatmul.f32.gmra.mxu3 %v5798_v14  ;;  %774 = vmatpush.msrb.mxu0 %v572_v25  ;;  %v983_v25 = vsub.f32 %v5861_v23, %v982_v40  ;;  %v988_v7 = vand.u32 4294901760, %v5885_v53  ;;  %v5904_v15 = vsub.f32 %v411_v52, %v5887_v60 }
  0x55   : > { %670 = vmatmul.f32.gmra.mxu2 %v5779_v63  ;;  %831 = vmatpush.msrb.mxu1 %v5654_v5  ;;  %v978_v5 = vand.u32 4294901760, %v977_v44  ;;  %v475_v44 = vsel %vm458_vm1, %v5530_v30, 0  ;;  %v424_v30 = vld [vmem:[%s5645_s26 + $0x70] sm:$0xff] }
  0x56   : > { %967 = vmatpush.msrb.mxu3 %v966_v16  ;;  %884 = vmatpush.msrb.mxu2 %v5801_v27  ;;  %v989_v39 = vsub.f32 %v5885_v53, %v988_v7  ;;  %v994_v16 = vand.u32 4294901760, %v5904_v15  ;;  %v5941_v32 = vand.u32 4294901760, %v475_v44 }
  0x57   : > { %833 = vmatpush.msrb.mxu1 %v5656_v6  ;;  %778 = vmatpush.msrb.mxu0 %v578_v28  ;;  %v528_v6 = vsub.f32 %v5870_v24, %v5897_v17  ;;  %v984_v28 = vand.u32 4294901760, %v983_v25 }
  0x58   : > { %973 = vmatpush.msrb.mxu3 %v972_v47  ;;  %886 = vmatpush.msrb.mxu2 %v5814_v36  ;;  %v990_v21 = vand.u32 4294901760, %v989_v39  ;;  %v5955_v22 = vsub.f32 %v475_v44, %v5941_v32  ;;  %v430_v47 = vld [vmem:[%s5645_s26 + $0xa0] sm:$0xff] }
  0x59   : > { %835 = vmatpush.msrb.mxu1 %v5661_v10  ;;  %782 = vmatpush.msrb.mxu0 %v584_v31  ;;  %v995_v10 = vsub.f32 %v5904_v15, %v994_v16  ;;  %v5935_v31 = vand.u32 4294901760, %v528_v6 }
  0x5a   : > { %522 = vmatmul.f32.gmra.mxu0 %v5891_v4  ;;  %611 = vmatmul.f32.gmra.mxu1 %v5761_v54  ;;  %v5966_v29 = vand.u32 4294901760, %v5955_v22 }
  0x5b   : > { %979 = vmatpush.msrb.mxu3 %v978_v5  ;;  %837 = vmatpush.msrb.mxu1 %v5663_v11  ;;  %v5938_v11 = vand.u32 4294901760, %v5923_v20  ;;  %v996_v52 = vand.u32 4294901760, %v995_v10  ;;  %v418_v10 = vld [vmem:[%s5645_s26 + $0x40] sm:$0xff] }
  0x5c   : > { %733 = vmatmul.f32.gmra.mxu3 %v5836_v56  ;;  %888 = vmatpush.msrb.mxu2 %v5851_v8 }
  0x5d   : > { %675 = vmatmul.f32.gmra.mxu2 %v5809_v33  ;;  %786 = vmatpush.msrb.mxu0 %v590_v37 }
  0x5e   : > { %985 = vmatpush.msrb.mxu3 %v984_v28  ;;  %839 = vmatpush.msrb.mxu1 %v5665_v12  ;;  %v536_v12 = vsub.f32 %v5923_v20, %v5938_v11 }
  0x5f   : > { %890 = vmatpush.msrb.mxu2 %v5873_v41  ;;  %790 = vmatpush.msrb.mxu0 %v596_v46 }
  0x60   : > { %991 = vmatpush.msrb.mxu3 %v990_v21  ;;  %841 = vmatpush.msrb.mxu1 %v5685_v18  ;;  %v5963_v18 = vand.u32 4294901760, %v536_v12  ;;  %v6119_v21 = vand.u32 4294901760, %v418_v10 }
  0x61   : > { %892 = vmatpush.msrb.mxu2 %v5887_v60  ;;  %794 = vmatpush.msrb.mxu0 %v602_v59 }
  0x62   : > { %530 = vmatmul.f32.gmra.mxu0 %v5935_v31  ;;  %615 = vmatmul.f32.gmra.mxu1 %v5784_v1  ;;  %v1379_v12 = vsub.f32 %v418_v10, %v6119_v21 }
  0x63   : > { %997 = vmatpush.msrb.mxu3 %v996_v52  ;;  %843 = vmatpush.msrb.mxu1 %v5702_v26  ;;  %v544_v26 = vsub.f32 %v5955_v22, %v5966_v29 }
  0x64   : > { %739 = vmatmul.f32.gmra.mxu3 %v5897_v17  ;;  %1158 = vmatpush.msra.mxu2 %v952_v58  ;;  %v448_v58 = vld [vmem:[%s5645_s26 + $0x130] sm:$0xff] }
  0x65   : > { %680 = vmatmul.f32.gmra.mxu2 %v5870_v24  ;;  %1033 = vmatpush.msra.mxu0 %v5753_v50  ;;  %v5989_v37 = vand.u32 4294901760, %v544_v26  ;;  %v412_v26 = vld [vmem:[%s5645_s26 + $0x10] sm:$0xff] }
  0x66   : > { %1221 = vmatpush.msra.mxu3 %v5730_v38  ;;  %1095 = vmatpush.msra.mxu1 %v5730_v38  ;;  %v454_v38 = vld [vmem:[%s5645_s26 + $0x160] sm:$0xff] }
  0x67   : > { %1162 = vmatpush.msra.mxu2 %v958_v19  ;;  %1036 = vmatpush.msra.mxu0 %v5782_v0  ;;  %v6030_v43 = vand.u32 4294901760, %v454_v38  ;;  %v6047_v0 = vand.u32 4294901760, %v448_v58 }
  0x68   : > { %1223 = vmatpush.msra.mxu3 %v5763_v55  ;;  %1097 = vmatpush.msra.mxu1 %v5763_v55 }
  0x69   : > { %1166 = vmatpush.msra.mxu2 %v964_v45  ;;  %1039 = vmatpush.msra.mxu0 %v5812_v34  ;;  %v6033_v46 = vsub.f32 %v454_v38, %v6030_v43  ;;  %v6125_v38 = vand.u32 4294901760, %v412_v26 }
  0x6a   : > { %538 = vmatmul.f32.gmra.mxu0 %v5963_v18  ;;  %619 = vmatmul.f32.gmra.mxu1 %v5848_v2 }
  0x6b   : > { %1225 = vmatpush.msra.mxu3 %v5793_v9  ;;  %1099 = vmatpush.msra.mxu1 %v5793_v9  ;;  %v1344_v50 = vand.u32 4294901760, %v6033_v46  ;;  %v6050_v9 = vsub.f32 %v448_v58, %v6047_v0  ;;  %v1385_v58 = vsub.f32 %v412_v26, %v6125_v38 }
  0x6c   : > { %745 = vmatmul.f32.gmra.mxu3 %v5938_v11  ;;  %1170 = vmatpush.msra.mxu2 %v970_v57 }
  0x6d   : > { %685 = vmatmul.f32.gmra.mxu2 %v5923_v20  ;;  %1042 = vmatpush.msra.mxu0 %v5827_v48  ;;  %v1345_v55 = vsub.f32 %v6033_v46, %v1344_v50  ;;  %v1350_v19 = vand.u32 4294901760, %v6050_v9  ;;  %v436_v48 = vld [vmem:[%s5645_s26 + $0xd0] sm:$0xff] }
  0x6e   : > { %1227 = vmatpush.msra.mxu3 %v5801_v27  ;;  %1101 = vmatpush.msra.mxu1 %v5801_v27  ;;  %v442_v27 = vld [vmem:[%s5645_s26 + $0x100] sm:$0xff]  ;;  %v6072_v57 = vand.u32 4294901760, %v436_v48 }
  0x6f   : > { %1174 = vmatpush.msra.mxu2 %v976_v13  ;;  %1045 = vmatpush.msra.mxu0 %v5830_v51  ;;  %v1346_v59 = vand.u32 4294901760, %v1345_v55  ;;  %v6059_v34 = vand.u32 4294901760, %v442_v27  ;;  %v1380_v55 = vand.u32 4294901760, %v1379_v12 }
  0x70   : > { %1229 = vmatpush.msra.mxu3 %v5814_v36  ;;  %1103 = vmatpush.msra.mxu1 %v5814_v36  ;;  %v1351_v36 = vsub.f32 %v6050_v9, %v1350_v19  ;;  %v6077_v13 = vsub.f32 %v436_v48, %v6072_v57  ;;  %v455_v48 = vld [vmem:[%s5645_s26 + $0x168] sm:$0xff] }
  0x71   : > { %1178 = vmatpush.msra.mxu2 %v982_v40  ;;  %1048 = vmatpush.msra.mxu0 %v5861_v23  ;;  %v6067_v45 = vsub.f32 %v442_v27, %v6059_v34  ;;  %v1386_v27 = vand.u32 4294901760, %v1385_v58 }
  0x72   : > { %546 = vmatmul.f32.gmra.mxu0 %v5989_v37  ;;  %623 = vmatmul.f32.gmra.mxu1 %v5893_v62  ;;  %v1352_v51 = vand.u32 4294901760, %v1351_v36 }
  0x73   : > { %1231 = vmatpush.msra.mxu3 %v5851_v8  ;;  %1105 = vmatpush.msra.mxu1 %v5851_v8  ;;  %v1356_v8 = vand.u32 4294901760, %v6067_v45 }
  0x74   : > { %751 = vmatmul.f32.gmra.mxu3 %v5966_v29  ;;  %1182 = vmatpush.msra.mxu2 %v988_v7 }
  0x75   : > { %690 = vmatmul.f32.gmra.mxu2 %v5955_v22  ;;  %1051 = vmatpush.msra.mxu0 %v5885_v53  ;;  %v1357_v23 = vsub.f32 %v6067_v45, %v1356_v8  ;;  %v6091_v53 = vand.u32 4294901760, %v430_v47 }
  0x76   : > { %1233 = vmatpush.msra.mxu3 %v5873_v41  ;;  %1107 = vmatpush.msra.mxu1 %v5873_v41  ;;  %v1362_v41 = vand.u32 4294901760, %v6077_v13 }
  0x77   : > { %1186 = vmatpush.msra.mxu2 %v994_v16  ;;  %1054 = vmatpush.msra.mxu0 %v5904_v15  ;;  %v1358_v40 = vand.u32 4294901760, %v1357_v23  ;;  %v6097_v25 = vsub.f32 %v430_v47, %v6091_v53  ;;  %v6109_v16 = vand.u32 4294901760, %v424_v30  ;;  %v6137_v23 = vand.u32 4294901760, %v455_v48 }
  0x78   : > { %1235 = vmatpush.msra.mxu3 %v5887_v60  ;;  %1109 = vmatpush.msra.mxu1 %v5887_v60  ;;  %v1363_v60 = vsub.f32 %v6077_v13, %v1362_v41 }
  0x79   : > { %v1368_v15 = vand.u32 4294901760, %v6097_v25  ;;  %v1373_v6 = vsub.f32 %v424_v30, %v6109_v16  ;;  %v6143_v47 = vsub.f32 %v455_v48, %v6137_v23 }
  0x7a   : > { %627 = vmatmul.f32.gmra.mxu1 %v5941_v32  ;;  %796 = vmatmul.f32.vlgmr.msrb.gmra.mxu0 %v5723_v35  ;;  %v1364_v7 = vand.u32 4294901760, %v1363_v60 }
  0x7b   : > { %1270 = vmatpush.msrb.mxu0 %v6030_v43  ;;  %v1369_v5 = vsub.f32 %v6097_v25, %v1368_v15  ;;  %v1374_v28 = vand.u32 4294901760, %v1373_v6 }
  0x7c   : > { %999 = vmatmul.f32.vlgmr.msrb.gmra.mxu3 %v5723_v35 }
  0x7d   : > { %898 = vmatmul.f32.vlgmr.msrb.gmra.mxu2 %v5788_v3  ;;  %1487 = vmatpush.msrb.mxu3 %v6030_v43  ;;  %v1370_v39 = vand.u32 4294901760, %v1369_v5  ;;  %v1375_v44 = vsub.f32 %v1373_v6, %v1374_v28 }
  0x7e   : > { %1425 = vmatpush.msrb.mxu2 %v6033_v46  ;;  %1272 = vmatpush.msrb.mxu0 %v6047_v0  ;;  %v1736_v46 = vand.u32 4294901760, %v6143_v47 }
  0x7f   : > { %1489 = vmatpush.msrb.mxu3 %v6047_v0  ;;  %v1376_v52 = vand.u32 4294901760, %v1375_v44 }
  0x80   : > { %1428 = vmatpush.msrb.mxu2 %v6050_v9  ;;  %1274 = vmatpush.msrb.mxu0 %v6059_v34  ;;  %v449_v9 = vld [vmem:[%s5645_s26 + $0x138] sm:$0xff] }
  0x81   : > { %1491 = vmatpush.msrb.mxu3 %v6059_v34 }
  0x82   : > { %800 = vmatmul.f32.gmra.mxu0 %v5761_v54  ;;  %845 = vmatmul.f32.vlgmr.msrb.gmra.mxu1 %v5723_v35 }
  0x83   : > { %1347 = vmatpush.msrb.mxu1 %v1346_v59  ;;  %1431 = vmatpush.msrb.mxu2 %v6067_v45  ;;  %v1381_v59 = vsub.f32 %v1379_v12, %v1380_v55  ;;  %v6159_v45 = vand.u32 4294901760, %v449_v9 }
  0x84   : > { %1003 = vmatmul.f32.gmra.mxu3 %v5761_v54  ;;  %1276 = vmatpush.msrb.mxu0 %v6072_v57 }
  0x85   : > { %906 = vmatmul.f32.gmra.mxu2 %v5843_v61  ;;  %1353 = vmatpush.msrb.mxu1 %v1352_v51  ;;  %v1382_v36 = vand.u32 4294901760, %v1381_v59  ;;  %v1387_v51 = vsub.f32 %v1385_v58, %v1386_v27 }
  0x86   : > { %1493 = vmatpush.msrb.mxu3 %v6072_v57  ;;  %1434 = vmatpush.msrb.mxu2 %v6077_v13  ;;  %v6164_v13 = vsub.f32 %v449_v9, %v6159_v45 }
  0x87   : > { %1359 = vmatpush.msrb.mxu1 %v1358_v40  ;;  %1278 = vmatpush.msrb.mxu0 %v6091_v53  ;;  %v1388_v40 = vand.u32 4294901760, %v1387_v51 }
  0x88   : > { %1495 = vmatpush.msrb.mxu3 %v6091_v53  ;;  %1437 = vmatpush.msrb.mxu2 %v6097_v25 }
  0x89   : > { %1365 = vmatpush.msrb.mxu1 %v1364_v7  ;;  %1280 = vmatpush.msrb.mxu0 %v6109_v16 }
  0x8a   : > { %804 = vmatmul.f32.gmra.mxu0 %v5784_v1  ;;  %849 = vmatmul.f32.gmra.mxu1 %v5761_v54 }
  0x8b   : > { %1371 = vmatpush.msrb.mxu1 %v1370_v39  ;;  %1497 = vmatpush.msrb.mxu3 %v6109_v16 }
  0x8c   : > { %1007 = vmatmul.f32.gmra.mxu3 %v5784_v1  ;;  %1440 = vmatpush.msrb.mxu2 %v1373_v6  ;;  %v437_v6 = vld [vmem:[%s5645_s26 + $0xd8] sm:$0xff] }
  0x8d   : > { %914 = vmatmul.f32.gmra.mxu2 %v5891_v4  ;;  %1282 = vmatpush.msrb.mxu0 %v6119_v21 }
  0x8e   : > { %1499 = vmatpush.msrb.mxu3 %v6119_v21  ;;  %1377 = vmatpush.msrb.mxu1 %v1376_v52  ;;  %v431_v52 = vld [vmem:[%s5645_s26 + $0xa8] sm:$0xff] }
  0x8f   : > { %1443 = vmatpush.msrb.mxu2 %v1379_v12  ;;  %1284 = vmatpush.msrb.mxu0 %v6125_v38  ;;  %v6205_v12 = vand.u32 4294901760, %v431_v52 }
  0x90   : > { %1501 = vmatpush.msrb.mxu3 %v6125_v38  ;;  %1383 = vmatpush.msrb.mxu1 %v1382_v36 }
  0x91   : > { %1446 = vmatpush.msrb.mxu2 %v1385_v58  ;;  %v6215_v51 = vsub.f32 %v431_v52, %v6205_v12  ;;  %v413_v52 = vld [vmem:[%s5645_s26 + $0x18] sm:$0xff] }
  0x92   : > { %808 = vmatmul.f32.gmra.mxu0 %v5848_v2  ;;  %853 = vmatmul.f32.gmra.mxu1 %v5784_v1 }
  0x93   : > { %1389 = vmatpush.msrb.mxu1 %v1388_v40  ;;  %v1760_v9 = vand.u32 4294901760, %v6215_v51 }
  0x94   : > { %1011 = vmatmul.f32.gmra.mxu3 %v5848_v2 }
  0x95   : > { %922 = vmatmul.f32.gmra.mxu2 %v5935_v31 }
  0x9a   : > { %812 = vmatmul.f32.gmra.mxu0 %v5893_v62  ;;  %857 = vmatmul.f32.gmra.mxu1 %v5848_v2 }
  0x9c   : > { %1015 = vmatmul.f32.gmra.mxu3 %v5893_v62 }
  0x9d   : > { %930 = vmatmul.f32.gmra.mxu2 %v5963_v18 }
  0xa2   : > { %816 = vmatmul.f32.gmra.mxu0 %v5941_v32  ;;  %861 = vmatmul.f32.gmra.mxu1 %v5893_v62 }
  0xa4   : > { %1019 = vmatmul.f32.gmra.mxu3 %v5941_v32 }
  0xa5   : > { %938 = vmatmul.f32.gmra.mxu2 %v5989_v37 }
  0xaa   : > { %865 = vmatmul.f32.gmra.mxu1 %v5941_v32  ;;  %1057 = vmatmul.f32.vlgmr.msra.gmra.mxu0 %v5736_v42 }
  0xab   : > { %1550 = vmatpush.msra.mxu0 %v1344_v50  ;;  %v1737_v50 = vsub.f32 %v6143_v47, %v1736_v46 }
  0xac   : > { %1237 = vmatmul.f32.vlgmr.msra.gmra.mxu3 %v5723_v35 }
  0xad   : > { %1188 = vmatmul.f32.vlgmr.msra.gmra.mxu2 %v5723_v35  ;;  %1554 = vmatpush.msra.mxu0 %v1350_v19  ;;  %v1738_v19 = vand.u32 4294901760, %v1737_v50 }
  0xae   : > { %1662 = vmatpush.msra.mxu2 %v6137_v23 }
  0xaf   : > { %1558 = vmatpush.msra.mxu0 %v1356_v8  ;;  %1739 = vmatpush.msra.mxu3 %v1738_v19  ;;  %v425_v19 = vld [vmem:[%s5645_s26 + $0x78] sm:$0xff] }
  0xb0   : > { %1664 = vmatpush.msra.mxu2 %v6159_v45 }
  0xb1   : > { %1562 = vmatpush.msra.mxu0 %v1362_v41  ;;  %v443_v41 = vld [vmem:[%s5645_s26 + $0x108] sm:$0xff] }
  0xb2   : > { %1062 = vmatmul.f32.gmra.mxu0 %v5779_v63  ;;  %1113 = vmatmul.f32.vlgmr.msra.gmra.mxu1 %v5750_v49 }
  0xb3   : > { %1613 = vmatpush.msra.mxu1 %v6030_v43  ;;  %1566 = vmatpush.msra.mxu0 %v1368_v15  ;;  %v1742_v43 = vand.u32 4294901760, %v6164_v13 }
  0xb4   : > { %1241 = vmatmul.f32.gmra.mxu3 %v5761_v54 }
  0xb5   : > { %1192 = vmatmul.f32.gmra.mxu2 %v5761_v54  ;;  %1615 = vmatpush.msra.mxu1 %v6047_v0  ;;  %v1743_v0 = vsub.f32 %v6164_v13, %v1742_v43 }
  0xb6   : > { %1570 = vmatpush.msra.mxu0 %v1374_v28 }
  0xb7   : > { %1617 = vmatpush.msra.mxu1 %v6059_v34  ;;  %v6177_v34 = vand.u32 4294901760, %v443_v41  ;;  %v1744_v60 = vand.u32 4294901760, %v1743_v0  ;;  %v6227_v0 = vand.u32 4294901760, %v425_v19 }
  0xb8   : > { %1574 = vmatpush.msra.mxu0 %v1380_v55 }
  0xb9   : > { %1619 = vmatpush.msra.mxu1 %v6072_v57  ;;  %1666 = vmatpush.msra.mxu2 %v6177_v34  ;;  %v6182_v57 = vsub.f32 %v443_v41, %v6177_v34 }
  0xba   : > { %1067 = vmatmul.f32.gmra.mxu0 %v5809_v33  ;;  %1119 = vmatmul.f32.gmra.mxu1 %v5798_v14 }
  0xbb   : > { %1578 = vmatpush.msra.mxu0 %v1386_v27  ;;  %1621 = vmatpush.msra.mxu1 %v6091_v53  ;;  %v1748_v39 = vand.u32 4294901760, %v6182_v57 }
  0xbc   : > { %1245 = vmatmul.f32.gmra.mxu3 %v5784_v1 }
  0xbd   : > { %1196 = vmatmul.f32.gmra.mxu2 %v5784_v1  ;;  %1623 = vmatpush.msra.mxu1 %v6109_v16  ;;  %v1749_v28 = vsub.f32 %v6182_v57, %v1748_v39  ;;  %v6193_v16 = vand.u32 4294901760, %v437_v6 }
  0xbe   : > { %1745 = vmatpush.msra.mxu3 %v1744_v60 }
  0xbf   : > { %1625 = vmatpush.msra.mxu1 %v6119_v21  ;;  %v1750_v10 = vand.u32 4294901760, %v1749_v28  ;;  %v6201_v21 = vsub.f32 %v437_v6, %v6193_v16  ;;  %1668 = vmatpush.msra.mxu2 %v6193_v16 }
  0xc1   : > { %1627 = vmatpush.msra.mxu1 %v6125_v38  ;;  %1751 = vmatpush.msra.mxu3 %v1750_v10  ;;  %v1754_v38 = vand.u32 4294901760, %v6201_v21 }
  0xc2   : > { %1072 = vmatmul.f32.gmra.mxu0 %v5870_v24  ;;  %1125 = vmatmul.f32.gmra.mxu1 %v5836_v56 }
  0xc3   : > { %1670 = vmatpush.msra.mxu2 %v6205_v12  ;;  %v1755_v36 = vsub.f32 %v6201_v21, %v1754_v38 }
  0xc4   : > { %1249 = vmatmul.f32.gmra.mxu3 %v5848_v2 }
  0xc5   : > { %1200 = vmatmul.f32.gmra.mxu2 %v5848_v2  ;;  %v1756_v40 = vand.u32 4294901760, %v1755_v36 }
  0xc6   : > { %1672 = vmatpush.msra.mxu2 %v6227_v0 }
  0xc7   : > { %v507_v8 = vpop.f32.mrf.mxu0  ;;  %1757 = vmatpush.msra.mxu3 %v1756_v40 }
  0xca   : > { %1077 = vmatmul.f32.gmra.mxu0 %v5923_v20  ;;  %1131 = vmatmul.f32.gmra.mxu1 %v5897_v17 }
  0xcc   : > { %1253 = vmatmul.f32.gmra.mxu3 %v5893_v62 }
  0xcd   : > { %1204 = vmatmul.f32.gmra.mxu2 %v5893_v62 }
  0xcf   : > { %v515_v25 = vpop.f32.mrf.mxu0  ;;  %v608_v7 = vpop.f32.mrf.mxu1 }
  0xd0   : > { %v609_v15 = vadd.f32 %v608_v7, %v507_v8  ;;  %v666_v5 = vpop.f32.mrf.mxu2  ;;  %v722_v30 = vpop.f32.mrf.mxu3  ;;  %v1761_v8 = vsub.f32 %v6215_v51, %v1760_v9 }
  0xd2   : > { %v667_v53 = vadd.f32 %v666_v5, %v609_v15  ;;  %1082 = vmatmul.f32.gmra.mxu0 %v5955_v22  ;;  %1137 = vmatmul.f32.gmra.mxu1 %v5938_v11  ;;  %v1762_v5 = vand.u32 4294901760, %v1761_v8 }
  0xd4   : > { %v6196_v44 = vadd.f32 %v722_v30, %v667_v53  ;;  %1257 = vmatmul.f32.gmra.mxu3 %v5941_v32  ;;  %v6232_v30 = vsub.f32 %v425_v19, %v6227_v0  ;;  %v419_v53 = vld [vmem:[%s5645_s26 + $0x48] sm:$0xff] }
  0xd5   : > { %1208 = vmatmul.f32.gmra.mxu2 %v5941_v32  ;;  %v6239_v10 = vand.u32 4294901760, %v419_v53  ;;  %1763 = vmatpush.msra.mxu3 %v1762_v5 }
  0xd6   : > { %v1766_v28 = vand.u32 4294901760, %v6232_v30 }
  0xd7   : > { %v523_v26 = vpop.f32.mrf.mxu0  ;;  %v612_v55 = vpop.f32.mrf.mxu1  ;;  %1674 = vmatpush.msra.mxu2 %v6239_v10 }
  0xd8   : > { %v613_v58 = vadd.f32 %v612_v55, %v515_v25  ;;  %v671_v59 = vpop.f32.mrf.mxu2  ;;  %v728_v27 = vpop.f32.mrf.mxu3  ;;  %v1767_v55 = vsub.f32 %v6232_v30, %v1766_v28 }
  0xda   : > { %v672_v48 = vadd.f32 %v671_v59, %v613_v58  ;;  %1143 = vmatmul.f32.gmra.mxu1 %v5966_v29  ;;  %1290 = vmatmul.f32.vlgmr.msrb.gmra.mxu0 %v5788_v3  ;;  %v1771_v58 = vsub.f32 %v419_v53, %v6239_v10  ;;  %v6249_v59 = vand.u32 4294901760, %v413_v52 }
  0xdb   : > { %1817 = vmatpush.msrb.mxu0 %v6143_v47 }
  0xdc   : > { %v6218_v50 = vadd.f32 %v728_v27, %v672_v48  ;;  %1505 = vmatmul.f32.vlgmr.msrb.gmra.mxu3 %v5750_v49  ;;  %v1768_v27 = vand.u32 4294901760, %v1767_v55  ;;  %v1772_v36 = vand.u32 4294901760, %v1771_v58  ;;  %1676 = vmatpush.msra.mxu2 %v6249_v59  ;;  %v1777_v48 = vsub.f32 %v413_v52, %v6249_v59 }
  0xdd   : > { %1449 = vmatmul.f32.vlgmr.msrb.gmra.mxu2 %v5736_v42  ;;  %1820 = vmatpush.msrb.mxu0 %v6164_v13 }
  0xde   : > { %1942 = vmatpush.msrb.mxu2 %v1736_v46  ;;  %1769 = vmatpush.msra.mxu3 %v1768_v27 }
  0xdf   : > { %v531_v41 = vpop.f32.mrf.mxu0  ;;  %v616_v60 = vpop.f32.mrf.mxu1  ;;  %1823 = vmatpush.msrb.mxu0 %v6182_v57 }
  0xe0   : > { %v617_v25 = vadd.f32 %v616_v60, %v523_v26  ;;  %v676_v7 = vpop.f32.mrf.mxu2  ;;  %v734_v15 = vpop.f32.mrf.mxu3  ;;  %1946 = vmatpush.msrb.mxu2 %v1742_v43 }
  0xe1   : > { %1826 = vmatpush.msrb.mxu0 %v6201_v21 }
  0xe2   : > { %v677_v6 = vadd.f32 %v676_v7, %v617_v25  ;;  %1298 = vmatmul.f32.gmra.mxu0 %v5843_v61  ;;  %1391 = vmatmul.f32.vlgmr.msrb.gmra.mxu1 %v5723_v35  ;;  %v1773_v7 = vsub.f32 %v1771_v58, %v1772_v36 }
  0xe3   : > { %1879 = vmatpush.msrb.mxu1 %v6137_v23  ;;  %1829 = vmatpush.msrb.mxu0 %v6215_v51 }
  0xe4   : > { %v6243_v26 = vadd.f32 %v734_v15, %v677_v6  ;;  %1511 = vmatmul.f32.gmra.mxu3 %v5798_v14  ;;  %v1778_v15 = vand.u32 4294901760, %v1777_v48  ;;  %v1774_v47 = vand.u32 4294901760, %v1773_v7  ;;  %1950 = vmatpush.msrb.mxu2 %v1748_v39 }
  0xe5   : > { %1454 = vmatmul.f32.gmra.mxu2 %v5779_v63  ;;  %1881 = vmatpush.msrb.mxu1 %v6159_v45 }
  0xe6   : > { %v1779_v46 = vsub.f32 %v1777_v48, %v1778_v15  ;;  %1832 = vmatpush.msrb.mxu0 %v6232_v30  ;;  %1775 = vmatpush.msra.mxu3 %v1774_v47 }
  0xe7   : > { %v539_v40 = vpop.f32.mrf.mxu0  ;;  %v620_v19 = vpop.f32.mrf.mxu1  ;;  %1883 = vmatpush.msrb.mxu1 %v6177_v34  ;;  %1954 = vmatpush.msrb.mxu2 %v1754_v38 }
  0xe8   : > { %v621_v8 = vadd.f32 %v620_v19, %v531_v41  ;;  %v681_v60 = vpop.f32.mrf.mxu2  ;;  %v740_v25 = vpop.f32.mrf.mxu3  ;;  %v1780_v13 = vand.u32 4294901760, %v1779_v46  ;;  %1835 = vmatpush.msrb.mxu0 %v1771_v58  ;;  %v456_v46 = vld [vmem:[%s5645_s26 + $0x170] sm:$0xff] }
  0xe9   : > { %1885 = vmatpush.msrb.mxu1 %v6193_v16  ;;  %1958 = vmatpush.msrb.mxu2 %v1760_v9 }
  0xea   : > { %v682_v5 = vadd.f32 %v681_v60, %v621_v8  ;;  %1306 = vmatmul.f32.gmra.mxu0 %v5891_v4  ;;  %1395 = vmatmul.f32.gmra.mxu1 %v5761_v54 }
  0xeb   : > { %1887 = vmatpush.msrb.mxu1 %v6205_v12  ;;  %1781 = vmatpush.msra.mxu3 %v1780_v13  ;;  %v6343_v13 = vand.u32 4294901760, %v456_v46 }
  0xec   : > { %v6268_v41 = vadd.f32 %v740_v25, %v682_v5  ;;  %1517 = vmatmul.f32.gmra.mxu3 %v5836_v56  ;;  %1838 = vmatpush.msrb.mxu0 %v1777_v48 }
  0xed   : > { %1459 = vmatmul.f32.gmra.mxu2 %v5809_v33  ;;  %1889 = vmatpush.msrb.mxu1 %v6227_v0 }
  0xee   : > { %8367 = vst [vmem:[#allocation3_spill] sm:$0xff] %v6268_v41  ;;  %2005 = vmatpush.msrb.mxu3 %v6137_v23  ;;  %1962 = vmatpush.msrb.mxu2 %v1766_v28 }
  0xef   : > { %v547_v43 = vpop.f32.mrf.mxu0  ;;  %v624_v57 = vpop.f32.mrf.mxu1  ;;  %1891 = vmatpush.msrb.mxu1 %v6239_v10 }
  0xf0   : > { %v625_v39 = vadd.f32 %v624_v57, %v539_v40  ;;  %v686_v53 = vpop.f32.mrf.mxu2  ;;  %v746_v6 = vpop.f32.mrf.mxu3  ;;  %2007 = vmatpush.msrb.mxu3 %v6159_v45  ;;  %1966 = vmatpush.msrb.mxu2 %v1772_v36 }
  0xf1   : > { %1893 = vmatpush.msrb.mxu1 %v6249_v59 }
  0xf2   : > { %v687_v30 = vadd.f32 %v686_v53, %v625_v39  ;;  %1314 = vmatmul.f32.gmra.mxu0 %v5935_v31  ;;  %1399 = vmatmul.f32.gmra.mxu1 %v5784_v1 }
  0xf3   : > { %2009 = vmatpush.msrb.mxu3 %v6177_v34  ;;  %1970 = vmatpush.msrb.mxu2 %v1778_v15 }
  0xf4   : > { %v6283_v21 = vadd.f32 %v746_v6, %v687_v30  ;;  %1523 = vmatmul.f32.gmra.mxu3 %v5897_v17  ;;  %v6350_v6 = vsub.f32 %v456_v46, %v6343_v13  ;;  %v444_v46 = vld [vmem:[%s5645_s26 + $0x110] sm:$0xff] }
  0xf5   : > { %1464 = vmatmul.f32.gmra.mxu2 %v5870_v24  ;;  %2011 = vmatpush.msrb.mxu3 %v6193_v16 }
  0xf6   : > { %8368 = vst [vmem:[#allocation4_spill] sm:$0xff] %v6283_v21 }
  0xf7   : > { %v628_v23 = vpop.f32.mrf.mxu1  ;;  %v6289_v38 = vpop.f32.mrf.mxu0  ;;  %2013 = vmatpush.msrb.mxu3 %v6205_v12 }
  0xf8   : > { %v629_v51 = vadd.f32 %v628_v23, %v547_v43  ;;  %v691_v9 = vpop.f32.mrf.mxu2  ;;  %v752_v45 = vpop.f32.mrf.mxu3  ;;  %v8312_v23 = vand.u32 4294901760, %v6350_v6 }
  0xf9   : > { %2015 = vmatpush.msrb.mxu3 %v6227_v0 }
  0xfa   : > { %v692_v28 = vadd.f32 %v691_v9, %v629_v51  ;;  %1322 = vmatmul.f32.gmra.mxu0 %v5963_v18  ;;  %1403 = vmatmul.f32.gmra.mxu1 %v5848_v2  ;;  %v450_v51 = vld [vmem:[%s5645_s26 + $0x140] sm:$0xff]  ;;  %v2129_v9 = vsub.f32 %v6350_v6, %v8312_v23 }
  0xfb   : > { %2017 = vmatpush.msrb.mxu3 %v6239_v10 }
  0xfc   : > { %v6296_v34 = vadd.f32 %v752_v45, %v692_v28  ;;  %1529 = vmatmul.f32.gmra.mxu3 %v5938_v11  ;;  %v6366_v45 = vand.u32 4294901760, %v450_v51 }
  0xfd   : > { %1469 = vmatmul.f32.gmra.mxu2 %v5923_v20  ;;  %2019 = vmatpush.msrb.mxu3 %v6249_v59 }
  0xfe   : > { %8369 = vst [vmem:[#allocation5_spill] sm:$0xff] %v6296_v34 }
  0xff   : > { %v6301_v16 = vpop.f32.mrf.mxu0  ;;  %v6303_v52 = vpop.f32.mrf.mxu1 }
 0x100   : > { %v899_v12 = vpop.f32.mrf.mxu2  ;;  %v1000_v55 = vpop.f32.mrf.mxu3 }
 0x101   : > { %v6306_v58 = vadd.f32 %v1000_v55, %v899_v12 }
 0x102   : > { %1330 = vmatmul.f32.gmra.mxu0 %v5989_v37  ;;  %1407 = vmatmul.f32.gmra.mxu1 %v5893_v62 }
 0x104   : > { %1535 = vmatmul.f32.gmra.mxu3 %v5966_v29 }
 0x105   : > { %1474 = vmatmul.f32.gmra.mxu2 %v5955_v22 }
 0x107   : > { %v6312_v0 = vpop.f32.mrf.mxu0  ;;  %v6314_v10 = vpop.f32.mrf.mxu1 }
 0x108   : > { %8370 = vst [vmem:[#allocation6_spill] sm:$0xff] %v6312_v0  ;;  %v907_v27 = vpop.f32.mrf.mxu2  ;;  %v1004_v36 = vpop.f32.mrf.mxu3 }
 0x109   : > { %v6316_v48 = vadd.f32 %v1004_v36, %v907_v27  ;;  %v2130_v36 = vand.u32 4294901760, %v2129_v9 }
 0x10a   : > { %1411 = vmatmul.f32.gmra.mxu1 %v5941_v32  ;;  %1580 = vmatmul.f32.vlgmr.msra.gmra.mxu0 %v5723_v35 }
 0x10b   : > { %2054 = vmatpush.msra.mxu0 %v6343_v13 }
 0x10c   : > { %1783 = vmatmul.f32.vlgmr.msra.gmra.mxu3 %v5723_v35 }
 0x10d   : > { %1682 = vmatmul.f32.vlgmr.msra.gmra.mxu2 %v5788_v3  ;;  %2271 = vmatpush.msra.mxu3 %v6343_v13 }
 0x10e   : > { %2209 = vmatpush.msra.mxu2 %v6350_v6  ;;  %2056 = vmatpush.msra.mxu0 %v6366_v45 }
 0x10f   : > { %v6322_v59 = vpop.f32.mrf.mxu0  ;;  %v6324_v40 = vpop.f32.mrf.mxu1  ;;  %2273 = vmatpush.msra.mxu3 %v6366_v45 }
 0x110   : > { %8371 = vst [vmem:[#allocation7_spill] sm:$0xff] %v6322_v59  ;;  %v915_v19 = vpop.f32.mrf.mxu2  ;;  %v1008_v8 = vpop.f32.mrf.mxu3 }
 0x111   : > { %8372 = vst [vmem:[#allocation8_spill] sm:$0xff] %v6324_v40  ;;  %v6326_v60 = vadd.f32 %v1008_v8, %v915_v19  ;;  %v6371_v19 = vsub.f32 %v450_v51, %v6366_v45 }
 0x112   : > { %1584 = vmatmul.f32.gmra.mxu0 %v5761_v54  ;;  %1629 = vmatmul.f32.vlgmr.msra.gmra.mxu1 %v5723_v35 }
 0x113   : > { %2131 = vmatpush.msra.mxu1 %v2130_v36  ;;  %2212 = vmatpush.msra.mxu2 %v6371_v19 }
 0x114   : > { %1787 = vmatmul.f32.gmra.mxu3 %v5761_v54 }
 0x115   : > { %1690 = vmatmul.f32.gmra.mxu2 %v5843_v61 }
 0x117   : > { %v6332_v25 = vpop.f32.mrf.mxu0  ;;  %v6334_v7 = vpop.f32.mrf.mxu1 }
 0x118   : > { %8373 = vst [vmem:[#allocation9_spill] sm:$0xff] %v6332_v25  ;;  %v923_v15 = vpop.f32.mrf.mxu2  ;;  %v1012_v5 = vpop.f32.mrf.mxu3 }
 0x119   : > { %8374 = vst [vmem:[#allocation10_spill] sm:$0xff] %v6334_v7  ;;  %v6336_v47 = vadd.f32 %v1012_v5, %v923_v15  ;;  %v8311_v15 = vand.u32 4294901760, %v6371_v19 }
 0x11a   : > { %1588 = vmatmul.f32.gmra.mxu0 %v5784_v1  ;;  %1633 = vmatmul.f32.gmra.mxu1 %v5761_v54 }
 0x11b   : > { %v2135_v5 = vsub.f32 %v6371_v19, %v8311_v15 }
 0x11c   : > { %1791 = vmatmul.f32.gmra.mxu3 %v5784_v1 }
 0x11d   : > { %1698 = vmatmul.f32.gmra.mxu2 %v5891_v4  ;;  %v2136_v51 = vand.u32 4294901760, %v2135_v5  ;;  %v438_v5 = vld [vmem:[%s5645_s26 + $0xe0] sm:$0xff] }
 0x11f   : > { %v6345_v43 = vpop.f32.mrf.mxu0  ;;  %v6347_v57 = vpop.f32.mrf.mxu1  ;;  %2137 = vmatpush.msra.mxu1 %v2136_v51 }
 0x120   : > { %8375 = vst [vmem:[#allocation11_spill] sm:$0xff] %v6345_v43  ;;  %v931_v39 = vpop.f32.mrf.mxu2  ;;  %v1016_v53 = vpop.f32.mrf.mxu3 }
 0x121   : > { %8376 = vst [vmem:[#allocation12_spill] sm:$0xff] %v6347_v57  ;;  %v6354_v30 = vadd.f32 %v1016_v53, %v931_v39  ;;  %v6387_v39 = vand.u32 4294901760, %v444_v46 }
 0x122   : > { %1592 = vmatmul.f32.gmra.mxu0 %v5848_v2  ;;  %1637 = vmatmul.f32.gmra.mxu1 %v5784_v1 }
 0x123   : > { %2058 = vmatpush.msra.mxu0 %v6387_v39  ;;  %2275 = vmatpush.msra.mxu3 %v6387_v39 }
 0x124   : > { %1795 = vmatmul.f32.gmra.mxu3 %v5848_v2 }
 0x125   : > { %1706 = vmatmul.f32.gmra.mxu2 %v5935_v31 }
 0x127   : > { %v6368_v28 = vpop.f32.mrf.mxu1  ;;  %v1058_v12 = vpop.f32.mrf.mxu0 }
 0x128   : > { %8377 = vst [vmem:[#allocation13_spill] sm:$0xff] %v6368_v28  ;;  %v939_v55 = vpop.f32.mrf.mxu2  ;;  %v1020_v27 = vpop.f32.mrf.mxu3  ;;  %v1059_v53 = vadd.f32 %v1058_v12, %v6306_v58  ;;  %v6403_v28 = vand.u32 4294901760, %v438_v5 }
 0x129   : > { %v6375_v8 = vadd.f32 %v1020_v27, %v939_v55  ;;  %v6391_v27 = vsub.f32 %v444_v46, %v6387_v39 }
 0x12a   : > { %1596 = vmatmul.f32.gmra.mxu0 %v5893_v62  ;;  %1641 = vmatmul.f32.gmra.mxu1 %v5848_v2 }
 0x12b   : > { %2215 = vmatpush.msra.mxu2 %v6391_v27  ;;  %v8313_v58 = vand.u32 4294901760, %v6391_v27  ;;  %2060 = vmatpush.msra.mxu0 %v6403_v28 }
 0x12c   : > { %1799 = vmatmul.f32.gmra.mxu3 %v5893_v62 }
 0x12d   : > { %1714 = vmatmul.f32.gmra.mxu2 %v5963_v18  ;;  %v2141_v46 = vsub.f32 %v6391_v27, %v8313_v58  ;;  %2277 = vmatpush.msra.mxu3 %v6403_v28 }
 0x12f   : > { %v1063_v9 = vpop.f32.mrf.mxu0  ;;  %v1114_v55 = vpop.f32.mrf.mxu1  ;;  %v2142_v51 = vand.u32 4294901760, %v2141_v46 }
 0x130   : > { %v1115_v36 = vadd.f32 %v1114_v55, %v1059_v53  ;;  %v1189_v15 = vpop.f32.mrf.mxu2  ;;  %v1238_v23 = vpop.f32.mrf.mxu3  ;;  %v432_v55 = vld [vmem:[%s5645_s26 + $0xb0] sm:$0xff] }
 0x131   : > { %v6416_v58 = vand.u32 4294901760, %v432_v55  ;;  %2143 = vmatpush.msra.mxu1 %v2142_v51 }
 0x132   : > { %v1190_v12 = vadd.f32 %v1189_v15, %v1115_v36  ;;  %1600 = vmatmul.f32.gmra.mxu0 %v5941_v32  ;;  %1645 = vmatmul.f32.gmra.mxu1 %v5893_v62  ;;  %v6410_v15 = vsub.f32 %v438_v5, %v6403_v28  ;;  %v1064_v36 = vadd.f32 %v1063_v9, %v6316_v48 }
 0x133   : > { %v6421_v34 = vsub.f32 %v432_v55, %v6416_v58  ;;  %2062 = vmatpush.msra.mxu0 %v6416_v58  ;;  %2279 = vmatpush.msra.mxu3 %v6416_v58 }
 0x134   : > { %v6405_v53 = vadd.f32 %v1238_v23, %v1190_v12  ;;  %1803 = vmatmul.f32.gmra.mxu3 %v5941_v32  ;;  %2218 = vmatpush.msra.mxu2 %v6410_v15  ;;  %v8314_v12 = vand.u32 4294901760, %v6410_v15 }
 0x135   : > { %1722 = vmatmul.f32.gmra.mxu2 %v5989_v37  ;;  %v8315_v55 = vand.u32 4294901760, %v6421_v34 }
 0x136   : > { %8378 = vst [vmem:[#allocation14_spill] sm:$0xff] %v6405_v53  ;;  %v2147_v48 = vsub.f32 %v6410_v15, %v8314_v12  ;;  %2221 = vmatpush.msra.mxu2 %v6421_v34 }
 0x137   : > { %v1068_v43 = vpop.f32.mrf.mxu0  ;;  %v1120_v23 = vpop.f32.mrf.mxu1 }
 0x138   : > { %v1121_v46 = vadd.f32 %v1120_v23, %v1064_v36  ;;  %v1193_v53 = vpop.f32.mrf.mxu2  ;;  %v1242_v5 = vpop.f32.mrf.mxu3  ;;  %v2148_v51 = vand.u32 4294901760, %v2147_v48  ;;  %v426_v23 = vld [vmem:[%s5645_s26 + $0x80] sm:$0xff]  ;;  %v1069_v12 = vadd.f32 %v1068_v43, %v6326_v60 }
 0x13a   : > { %v1194_v9 = vadd.f32 %v1193_v53, %v1121_v46  ;;  %1649 = vmatmul.f32.gmra.mxu1 %v5941_v32  ;;  %1841 = vmatmul.f32.vlgmr.msrb.gmra.mxu0 %v5736_v42  ;;  %v2153_v53 = vsub.f32 %v6421_v34, %v8315_v55  ;;  %v6441_v46 = vand.u32 4294901760, %v426_v23 }
 0x13b   : > { %2149 = vmatpush.msra.mxu1 %v2148_v51  ;;  %v420_v51 = vld [vmem:[%s5645_s26 + $0x50] sm:$0xff] }
 0x13c   : > { %v6431_v36 = vadd.f32 %v1242_v5, %v1194_v9  ;;  %2021 = vmatmul.f32.vlgmr.msrb.gmra.mxu3 %v5723_v35  ;;  %v2154_v25 = vand.u32 4294901760, %v2153_v53  ;;  %v6444_v21 = vsub.f32 %v426_v23, %v6441_v46  ;;  %2064 = vmatpush.msra.mxu0 %v6441_v46  ;;  %v6460_v23 = vand.u32 4294901760, %v420_v51 }
 0x13d   : > { %1972 = vmatmul.f32.vlgmr.msrb.gmra.mxu2 %v5723_v35  ;;  %2281 = vmatpush.msra.mxu3 %v6441_v46 }
 0x13e   : > { %8379 = vst [vmem:[#allocation15_spill] sm:$0xff] %v6431_v36  ;;  %v8316_v43 = vand.u32 4294901760, %v6444_v21  ;;  %2155 = vmatpush.msra.mxu1 %v2154_v25  ;;  %2224 = vmatpush.msra.mxu2 %v6444_v21  ;;  %v6464_v55 = vsub.f32 %v420_v51, %v6460_v23 }
 0x13f   : > { %v1073_v48 = vpop.f32.mrf.mxu0  ;;  %v1126_v57 = vpop.f32.mrf.mxu1  ;;  %2066 = vmatpush.msra.mxu0 %v6460_v23  ;;  %2283 = vmatpush.msra.mxu3 %v6460_v23 }
 0x140   : > { %v1127_v5 = vadd.f32 %v1126_v57, %v1069_v12  ;;  %v1197_v9 = vpop.f32.mrf.mxu2  ;;  %v1246_v36 = vpop.f32.mrf.mxu3  ;;  %v2159_v12 = vsub.f32 %v6444_v21, %v8316_v43  ;;  %v1074_v53 = vadd.f32 %v1073_v48, %v6336_v47  ;;  %2227 = vmatpush.msra.mxu2 %v6464_v55  ;;  %v2164_v47 = vand.u32 4294901760, %v6464_v55 }
 0x142   : > { %v1198_v60 = vadd.f32 %v1197_v9, %v1127_v5  ;;  %1846 = vmatmul.f32.gmra.mxu0 %v5779_v63  ;;  %1897 = vmatmul.f32.vlgmr.msrb.gmra.mxu1 %v5750_v49  ;;  %v2160_v5 = vand.u32 4294901760, %v2159_v12  ;;  %v2165_v51 = vsub.f32 %v6464_v55, %v2164_v47 }
 0x144   : > { %v6452_v57 = vadd.f32 %v1246_v36, %v1198_v60  ;;  %2025 = vmatmul.f32.gmra.mxu3 %v5761_v54  ;;  %v414_v36 = vld [vmem:[%s5645_s26 + $0x20] sm:$0xff]  ;;  %2161 = vmatpush.msra.mxu1 %v2160_v5 }
 0x145   : > { %1976 = vmatmul.f32.gmra.mxu2 %v5761_v54  ;;  %v6469_v7 = vand.u32 4294901760, %v414_v36 }
 0x146   : > { %8380 = vst [vmem:[#allocation16_spill] sm:$0xff] %v6452_v57 }
 0x147   : > { %v1078_v9 = vpop.f32.mrf.mxu0  ;;  %v1132_v25 = vpop.f32.mrf.mxu1  ;;  %v2169_v12 = vsub.f32 %v414_v36, %v6469_v7  ;;  %2068 = vmatpush.msra.mxu0 %v6469_v7  ;;  %2285 = vmatpush.msra.mxu3 %v6469_v7 }
 0x148   : > { %v1133_v60 = vadd.f32 %v1132_v25, %v1074_v53  ;;  %v1201_v43 = vpop.f32.mrf.mxu2  ;;  %v1250_v57 = vpop.f32.mrf.mxu3  ;;  %v457_v25 = vld [vmem:[%s5645_s26 + $0x178] sm:$0xff]  ;;  %v1079_v36 = vadd.f32 %v1078_v9, %v6354_v30  ;;  %v8384_v30 = vand.u32 4294901760, %v6391_v27 }
 0x149   : > { %2230 = vmatpush.msra.mxu2 %v2169_v12  ;;  %v2170_v5 = vand.u32 4294901760, %v2169_v12  ;;  %v6487_v59 = vand.u32 4294901760, %v457_v25 }
 0x14a   : > { %v1202_v48 = vadd.f32 %v1201_v43, %v1133_v60  ;;  %1851 = vmatmul.f32.gmra.mxu0 %v5809_v33  ;;  %1903 = vmatmul.f32.gmra.mxu1 %v5798_v14  ;;  %v2166_v43 = vand.u32 4294901760, %v2165_v51  ;;  %v8382_v60 = vand.u32 4294901760, %v6350_v6 }
 0x14b   : > { %v2171_v55 = vsub.f32 %v2169_v12, %v2170_v5  ;;  %2446 = vmatpush.msrb.mxu2 %v6487_v59  ;;  %v6493_v6 = vsub.f32 %v457_v25, %v6487_v59 }
 0x14c   : > { %v6479_v53 = vadd.f32 %v1250_v57, %v1202_v48  ;;  %2029 = vmatmul.f32.gmra.mxu3 %v5784_v1  ;;  %2334 = vmatpush.msrb.mxu0 %v8382_v60  ;;  %v8383_v57 = vand.u32 4294901760, %v6371_v19 }
 0x14d   : > { %1980 = vmatmul.f32.gmra.mxu2 %v5784_v1  ;;  %2167 = vmatpush.msra.mxu1 %v2166_v43  ;;  %v2172_v51 = vand.u32 4294901760, %v2171_v55  ;;  %v2520_v19 = vand.u32 4294901760, %v6493_v6  ;;  %v8387_v43 = vand.u32 4294901760, %v6421_v34  ;;  %v8388_v55 = vand.u32 4294901760, %v6444_v21 }
 0x14e   : > { %8381 = vst [vmem:[#allocation17_spill] sm:$0xff] %v6479_v53  ;;  %2338 = vmatpush.msrb.mxu0 %v8383_v57 }
 0x14f   : > { %v1083_v41 = vpop.f32.mrf.mxu0  ;;  %v1138_v40 = vpop.f32.mrf.mxu1  ;;  %2173 = vmatpush.msra.mxu1 %v2172_v51  ;;  %v2521_v27 = vsub.f32 %v6493_v6, %v2520_v19 }
 0x150   : > { %v1139_v48 = vadd.f32 %v1138_v40, %v1079_v36  ;;  %v1205_v53 = vpop.f32.mrf.mxu2  ;;  %v1254_v0 = vpop.f32.mrf.mxu3  ;;  %2342 = vmatpush.msrb.mxu0 %v8384_v30  ;;  %v8385_v40 = vand.u32 4294901760, %v6410_v15  ;;  %v1084_v25 = vadd.f32 %v1083_v41, %v6375_v8 }
 0x151   : > { %2397 = vmatpush.msrb.mxu1 %v6343_v13  ;;  %v2522_v15 = vand.u32 4294901760, %v2521_v27 }
 0x152   : > { %v1206_v9 = vadd.f32 %v1205_v53, %v1139_v48  ;;  %1856 = vmatmul.f32.gmra.mxu0 %v5870_v24  ;;  %1909 = vmatmul.f32.gmra.mxu1 %v5836_v56  ;;  %v451_v53 = vld [vmem:[%s5645_s26 + $0x148] sm:$0xff] }
 0x153   : > { %2346 = vmatpush.msrb.mxu0 %v8385_v40  ;;  %v6514_v60 = vand.u32 4294901760, %v451_v53  ;;  %2399 = vmatpush.msrb.mxu1 %v6366_v45 }
 0x154   : > { %v6502_v12 = vadd.f32 %v1254_v0, %v1206_v9  ;;  %2033 = vmatmul.f32.gmra.mxu3 %v5848_v2 }
 0x155   : > { %1984 = vmatmul.f32.gmra.mxu2 %v5848_v2  ;;  %2350 = vmatpush.msrb.mxu0 %v8387_v43  ;;  %v6521_v34 = vsub.f32 %v451_v53, %v6514_v60  ;;  %v439_v43 = vld [vmem:[%s5645_s26 + $0xe8] sm:$0xff] }
 0x156   : > { %8386 = vst [vmem:[#allocation18_spill] sm:$0xff] %v6502_v12  ;;  %2523 = vmatpush.msrb.mxu3 %v2522_v15  ;;  %2448 = vmatpush.msrb.mxu2 %v6514_v60 }
 0x157   : > { %v1144_v0 = vpop.f32.mrf.mxu1  ;;  %v1291_v36 = vpop.f32.mrf.mxu0  ;;  %2354 = vmatpush.msrb.mxu0 %v8388_v55  ;;  %2401 = vmatpush.msrb.mxu1 %v6387_v39  ;;  %v8320_v21 = vand.u32 4294901760, %v6521_v34  ;;  %v445_v39 = vld [vmem:[%s5645_s26 + $0x118] sm:$0xff] }
 0x158   : > { %v1145_v57 = vadd.f32 %v1144_v0, %v1084_v25  ;;  %v1209_v13 = vpop.f32.mrf.mxu2  ;;  %v1258_v48 = vpop.f32.mrf.mxu3 }
 0x159   : > { %2358 = vmatpush.msrb.mxu0 %v2164_v47  ;;  %2403 = vmatpush.msrb.mxu1 %v6403_v28  ;;  %v2527_v8 = vsub.f32 %v6521_v34, %v8320_v21  ;;  %v6536_v47 = vand.u32 4294901760, %v445_v39 }
 0x15a   : > { %v1210_v41 = vadd.f32 %v1209_v13, %v1145_v57  ;;  %1861 = vmatmul.f32.gmra.mxu0 %v5923_v20  ;;  %1915 = vmatmul.f32.gmra.mxu1 %v5897_v17 }
 0x15b   : > { %2362 = vmatpush.msrb.mxu0 %v2170_v5  ;;  %2405 = vmatpush.msrb.mxu1 %v6416_v58  ;;  %v2528_v51 = vand.u32 4294901760, %v2527_v8  ;;  %v6541_v5 = vsub.f32 %v445_v39, %v6536_v47 }
 0x15c   : > { %v6528_v45 = vadd.f32 %v1258_v48, %v1210_v41  ;;  %2037 = vmatmul.f32.gmra.mxu3 %v5893_v62  ;;  %2450 = vmatpush.msrb.mxu2 %v6536_v47 }
 0x15d   : > { %1988 = vmatmul.f32.gmra.mxu2 %v5893_v62  ;;  %2407 = vmatpush.msrb.mxu1 %v6441_v46  ;;  %v8319_v53 = vand.u32 4294901760, %v6541_v5  ;;  %v6552_v46 = vand.u32 4294901760, %v439_v43 }
 0x15e   : > { %8389 = vst [vmem:[#allocation19_spill] sm:$0xff] %v6528_v45  ;;  %2529 = vmatpush.msrb.mxu3 %v2528_v51 }
 0x15f   : > { %v1299_v30 = vpop.f32.mrf.mxu0  ;;  %v1392_v28 = vpop.f32.mrf.mxu1  ;;  %2409 = vmatpush.msrb.mxu1 %v6460_v23  ;;  %v2533_v25 = vsub.f32 %v6541_v5, %v8319_v53  ;;  %v6560_v0 = vsub.f32 %v439_v43, %v6552_v46  ;;  %2452 = vmatpush.msrb.mxu2 %v6552_v46 }
 0x160   : > { %v1393_v9 = vadd.f32 %v1392_v28, %v1291_v36  ;;  %v1450_v40 = vpop.f32.mrf.mxu2  ;;  %v1506_v27 = vpop.f32.mrf.mxu3  ;;  %v433_v36 = vld [vmem:[%s5645_s26 + $0xb8] sm:$0xff] }
 0x161   : > { %2411 = vmatpush.msrb.mxu1 %v6469_v7  ;;  %v2534_v23 = vand.u32 4294901760, %v2533_v25  ;;  %v6564_v55 = vand.u32 4294901760, %v433_v36  ;;  %v8318_v7 = vand.u32 4294901760, %v6560_v0 }
 0x162   : > { %v1451_v58 = vadd.f32 %v1450_v40, %v1393_v9  ;;  %1866 = vmatmul.f32.gmra.mxu0 %v5955_v22  ;;  %1921 = vmatmul.f32.gmra.mxu1 %v5938_v11 }
 0x163   : > { %2535 = vmatpush.msrb.mxu3 %v2534_v23  ;;  %2454 = vmatpush.msrb.mxu2 %v6564_v55  ;;  %v2539_v39 = vsub.f32 %v6560_v0, %v8318_v7  ;;  %v6574_v28 = vsub.f32 %v433_v36, %v6564_v55 }
 0x164   : > { %v6555_v15 = vadd.f32 %v1506_v27, %v1451_v58  ;;  %2041 = vmatmul.f32.gmra.mxu3 %v5941_v32  ;;  %v427_v27 = vld [vmem:[%s5645_s26 + $0x88] sm:$0xff] }
 0x165   : > { %1992 = vmatmul.f32.gmra.mxu2 %v5941_v32  ;;  %v2540_v9 = vand.u32 4294901760, %v2539_v39  ;;  %v8317_v40 = vand.u32 4294901760, %v6574_v28  ;;  %v6586_v43 = vand.u32 4294901760, %v427_v27  ;;  %v421_v39 = vld [vmem:[%s5645_s26 + $0x58] sm:$0xff] }
 0x166   : > { %8390 = vst [vmem:[#allocation20_spill] sm:$0xff] %v6555_v15 }
 0x167   : > { %v1307_v57 = vpop.f32.mrf.mxu0  ;;  %v1396_v13 = vpop.f32.mrf.mxu1  ;;  %2541 = vmatpush.msrb.mxu3 %v2540_v9  ;;  %v2545_v58 = vsub.f32 %v6574_v28, %v8317_v40  ;;  %2456 = vmatpush.msrb.mxu2 %v6586_v43  ;;  %v6598_v40 = vand.u32 4294901760, %v421_v39 }
 0x168   : > { %v1397_v48 = vadd.f32 %v1396_v13, %v1299_v30  ;;  %v1455_v41 = vpop.f32.mrf.mxu2  ;;  %v1512_v8 = vpop.f32.mrf.mxu3 }
 0x169   : > { %2458 = vmatpush.msrb.mxu2 %v6598_v40 }
 0x16a   : > { %v1456_v51 = vadd.f32 %v1455_v41, %v1397_v48  ;;  %1927 = vmatmul.f32.gmra.mxu1 %v5966_v29  ;;  %2074 = vmatmul.f32.vlgmr.msra.gmra.mxu0 %v5788_v3  ;;  %v2546_v41 = vand.u32 4294901760, %v2545_v58 }
 0x16b   : > { %2601 = vmatpush.msra.mxu0 %v6493_v6 }
 0x16c   : > { %v6577_v30 = vadd.f32 %v1512_v8, %v1456_v51  ;;  %2289 = vmatmul.f32.vlgmr.msra.gmra.mxu3 %v5750_v49  ;;  %v6591_v8 = vsub.f32 %v427_v27, %v6586_v43 }
 0x16d   : > { %2233 = vmatmul.f32.vlgmr.msra.gmra.mxu2 %v5736_v42  ;;  %2604 = vmatpush.msra.mxu0 %v6521_v34 }
 0x16e   : > { %8391 = vst [vmem:[#allocation21_spill] sm:$0xff] %v6577_v30  ;;  %v2550_v9 = vand.u32 4294901760, %v6591_v8  ;;  %2547 = vmatpush.msrb.mxu3 %v2546_v41  ;;  %v8393_v30 = vand.u32 4294901760, %v6521_v34 }
 0x16f   : > { %v1315_v25 = vpop.f32.mrf.mxu0  ;;  %v1400_v23 = vpop.f32.mrf.mxu1  ;;  %2607 = vmatpush.msra.mxu0 %v6541_v5 }
 0x170   : > { %v1401_v36 = vadd.f32 %v1400_v23, %v1307_v57  ;;  %v1460_v13 = vpop.f32.mrf.mxu2  ;;  %v1518_v48 = vpop.f32.mrf.mxu3  ;;  %v415_v57 = vld [vmem:[%s5645_s26 + $0x28] sm:$0xff]  ;;  %v2551_v27 = vsub.f32 %v6591_v8, %v2550_v9  ;;  %v2555_v23 = vsub.f32 %v421_v39, %v6598_v40 }
 0x171   : > { %2610 = vmatpush.msra.mxu0 %v6560_v0 }
 0x172   : > { %v1461_v51 = vadd.f32 %v1460_v13, %v1401_v36  ;;  %2082 = vmatmul.f32.gmra.mxu0 %v5843_v61  ;;  %2175 = vmatmul.f32.vlgmr.msra.gmra.mxu1 %v5723_v35  ;;  %v6608_v36 = vand.u32 4294901760, %v415_v57  ;;  %v2552_v13 = vand.u32 4294901760, %v2551_v27  ;;  %v2556_v41 = vand.u32 4294901760, %v2555_v23 }
 0x173   : > { %2663 = vmatpush.msra.mxu1 %v6487_v59  ;;  %2613 = vmatpush.msra.mxu0 %v6574_v28 }
 0x174   : > { %v6602_v58 = vadd.f32 %v1518_v48, %v1461_v51  ;;  %2295 = vmatmul.f32.gmra.mxu3 %v5798_v14  ;;  %2460 = vmatpush.msrb.mxu2 %v6608_v36  ;;  %v2561_v48 = vsub.f32 %v415_v57, %v6608_v36 }
 0x175   : > { %2238 = vmatmul.f32.gmra.mxu2 %v5779_v63  ;;  %2665 = vmatpush.msra.mxu1 %v6514_v60 }
 0x176   : > { %8392 = vst [vmem:[#allocation22_spill] sm:$0xff] %v6602_v58  ;;  %2726 = vmatpush.msra.mxu2 %v2520_v19  ;;  %2553 = vmatpush.msrb.mxu3 %v2552_v13  ;;  %v2557_v58 = vsub.f32 %v2555_v23, %v2556_v41  ;;  %v2562_v27 = vand.u32 4294901760, %v2561_v48 }
 0x177   : > { %v1323_v51 = vpop.f32.mrf.mxu0  ;;  %v1404_v7 = vpop.f32.mrf.mxu1  ;;  %2667 = vmatpush.msra.mxu1 %v6536_v47  ;;  %2616 = vmatpush.msra.mxu0 %v6591_v8 }
 0x178   : > { %v1405_v39 = vadd.f32 %v1404_v7, %v1315_v25  ;;  %v1465_v53 = vpop.f32.mrf.mxu2  ;;  %v1524_v21 = vpop.f32.mrf.mxu3  ;;  %2730 = vmatpush.msra.mxu2 %v8393_v30  ;;  %v2558_v6 = vand.u32 4294901760, %v2557_v58  ;;  %v2563_v19 = vsub.f32 %v2561_v48, %v2562_v27  ;;  %v8394_v7 = vand.u32 4294901760, %v6541_v5 }
 0x179   : > { %2669 = vmatpush.msra.mxu1 %v6552_v46  ;;  %2619 = vmatpush.msra.mxu0 %v2555_v23 }
 0x17a   : > { %v1466_v57 = vadd.f32 %v1465_v53, %v1405_v39  ;;  %2090 = vmatmul.f32.gmra.mxu0 %v5891_v4  ;;  %2179 = vmatmul.f32.gmra.mxu1 %v5761_v54  ;;  %v2564_v34 = vand.u32 4294901760, %v2563_v19  ;;  %v8396_v53 = vand.u32 4294901760, %v6560_v0  ;;  %v8397_v39 = vand.u32 4294901760, %v6574_v28 }
 0x17b   : > { %2734 = vmatpush.msra.mxu2 %v8394_v7  ;;  %2671 = vmatpush.msra.mxu1 %v6564_v55 }
 0x17c   : > { %v6627_v25 = vadd.f32 %v1524_v21, %v1466_v57  ;;  %2301 = vmatmul.f32.gmra.mxu3 %v5836_v56  ;;  %2622 = vmatpush.msra.mxu0 %v2561_v48 }
 0x17d   : > { %2243 = vmatmul.f32.gmra.mxu2 %v5809_v33  ;;  %2559 = vmatpush.msrb.mxu3 %v2558_v6 }
 0x17e   : > { %8395 = vst [vmem:[#allocation23_spill] sm:$0xff] %v6627_v25  ;;  %2738 = vmatpush.msra.mxu2 %v8396_v53  ;;  %2673 = vmatpush.msra.mxu1 %v6586_v43 }
 0x17f   : > { %v1331_v30 = vpop.f32.mrf.mxu0  ;;  %v1408_v5 = vpop.f32.mrf.mxu1  ;;  %2565 = vmatpush.msrb.mxu3 %v2564_v34 }
 0x180   : > { %v1409_v58 = vadd.f32 %v1408_v5, %v1323_v51  ;;  %v1470_v21 = vpop.f32.mrf.mxu2  ;;  %v1530_v13 = vpop.f32.mrf.mxu3  ;;  %2742 = vmatpush.msra.mxu2 %v8397_v39  ;;  %2675 = vmatpush.msra.mxu1 %v6598_v40  ;;  %v404_v39 = vld [vmem:[%s5640_s23 + $0x150] sm:$0xff] }
 0x181   : > { %2789 = vmatpush.msra.mxu3 %v6487_v59 }
 0x182   : > { %v1471_v8 = vadd.f32 %v1470_v21, %v1409_v58  ;;  %2098 = vmatmul.f32.gmra.mxu0 %v5935_v31  ;;  %2183 = vmatmul.f32.gmra.mxu1 %v5784_v1 }
 0x183   : > { %2791 = vmatpush.msra.mxu3 %v6514_v60  ;;  %2746 = vmatpush.msra.mxu2 %v2550_v9 }
 0x184   : > { %v6642_v0 = vadd.f32 %v1530_v13, %v1471_v8  ;;  %2307 = vmatmul.f32.gmra.mxu3 %v5897_v17  ;;  %2677 = vmatpush.msra.mxu1 %v6608_v36  ;;  %v6702_v8 = vand.u32 4294901760, %v404_v39 }
 0x185   : > { %2248 = vmatmul.f32.gmra.mxu2 %v5870_v24  ;;  %2793 = vmatpush.msra.mxu3 %v6536_v47 }
 0x186   : > { %8398 = vst [vmem:[#allocation24_spill] sm:$0xff] %v6642_v0  ;;  %2750 = vmatpush.msra.mxu2 %v2556_v41 }
 0x187   : > { %v1412_v59 = vpop.f32.mrf.mxu1  ;;  %v6648_v28 = vpop.f32.mrf.mxu0  ;;  %2795 = vmatpush.msra.mxu3 %v6552_v46 }
 0x188   : > { %8399 = vst [vmem:[#allocation25_spill] sm:$0xff] %v6648_v28  ;;  %v1413_v23 = vadd.f32 %v1412_v59, %v1331_v30  ;;  %v1475_v48 = vpop.f32.mrf.mxu2  ;;  %v1536_v60 = vpop.f32.mrf.mxu3  ;;  %2754 = vmatpush.msra.mxu2 %v2562_v27 }
 0x189   : > { %2797 = vmatpush.msra.mxu3 %v6564_v55 }
 0x18a   : > { %v1476_v9 = vadd.f32 %v1475_v48, %v1413_v23  ;;  %2106 = vmatmul.f32.gmra.mxu0 %v5963_v18  ;;  %2187 = vmatmul.f32.gmra.mxu1 %v5848_v2 }
 0x18b   : > { %2799 = vmatpush.msra.mxu3 %v6586_v43 }
 0x18c   : > { %v6655_v47 = vadd.f32 %v1536_v60, %v1476_v9  ;;  %2313 = vmatmul.f32.gmra.mxu3 %v5938_v11  ;;  %v6709_v60 = vsub.f32 %v404_v39, %v6702_v8 }
 0x18d   : > { %2253 = vmatmul.f32.gmra.mxu2 %v5923_v20  ;;  %2801 = vmatpush.msra.mxu3 %v6598_v40 }
 0x18e   : > { %8400 = vst [vmem:[#allocation26_spill] sm:$0xff] %v6655_v47 }
 0x18f   : > { %v6660_v46 = vpop.f32.mrf.mxu0  ;;  %v6662_v41 = vpop.f32.mrf.mxu1  ;;  %2803 = vmatpush.msra.mxu3 %v6608_v36 }
 0x190   : > { %8401 = vst [vmem:[#allocation27_spill] sm:$0xff] %v6660_v46  ;;  %v1683_v55 = vpop.f32.mrf.mxu2  ;;  %v1784_v51 = vpop.f32.mrf.mxu3 }
 0x191   : > { %8402 = vst [vmem:[#allocation28_spill] sm:$0xff] %v6662_v41  ;;  %v6665_v27 = vadd.f32 %v1784_v51, %v1683_v55  ;;  %v398_v55 = vld [vmem:[%s5640_s23 + $0x120] sm:$0xff] }
 0x192   : > { %2114 = vmatmul.f32.gmra.mxu0 %v5989_v37  ;;  %2191 = vmatmul.f32.gmra.mxu1 %v5893_v62 }
 0x194   : > { %2319 = vmatmul.f32.gmra.mxu3 %v5966_v29 }
 0x195   : > { %2258 = vmatmul.f32.gmra.mxu2 %v5955_v22 }
 0x197   : > { %v6671_v43 = vpop.f32.mrf.mxu0  ;;  %v6673_v40 = vpop.f32.mrf.mxu1 }
 0x198   : > { %8403 = vst [vmem:[#allocation29_spill] sm:$0xff] %v6671_v43  ;;  %v1691_v57 = vpop.f32.mrf.mxu2  ;;  %v1788_v6 = vpop.f32.mrf.mxu3 }
 0x199   : > { %8404 = vst [vmem:[#allocation30_spill] sm:$0xff] %v6673_v40  ;;  %v6675_v19 = vadd.f32 %v1788_v6, %v1691_v57  ;;  %v6725_v57 = vand.u32 4294901760, %v398_v55 }
 0x19a   : > { %2195 = vmatmul.f32.gmra.mxu1 %v5941_v32  ;;  %2364 = vmatmul.f32.vlgmr.msrb.gmra.mxu0 %v5723_v35 }
 0x19b   : > { %2856 = vmatpush.msrb.mxu0 %v6702_v8  ;;  %v6730_v39 = vsub.f32 %v398_v55, %v6725_v57  ;;  %v392_v55 = vld [vmem:[%s5640_s23 + $0xf0] sm:$0xff] }
 0x19c   : > { %2567 = vmatmul.f32.vlgmr.msrb.gmra.mxu3 %v5723_v35 }
 0x19d   : > { %2466 = vmatmul.f32.vlgmr.msrb.gmra.mxu2 %v5788_v3  ;;  %3073 = vmatpush.msrb.mxu3 %v6702_v8 }
 0x19e   : > { %3011 = vmatpush.msrb.mxu2 %v6709_v60  ;;  %2858 = vmatpush.msrb.mxu0 %v6725_v57 }
 0x19f   : > { %v6681_v36 = vpop.f32.mrf.mxu0  ;;  %v6683_v7 = vpop.f32.mrf.mxu1  ;;  %3075 = vmatpush.msrb.mxu3 %v6725_v57 }
 0x1a0   : > { %8405 = vst [vmem:[#allocation31_spill] sm:$0xff] %v6681_v36  ;;  %v1699_v34 = vpop.f32.mrf.mxu2  ;;  %v1792_v53 = vpop.f32.mrf.mxu3  ;;  %3014 = vmatpush.msrb.mxu2 %v6730_v39 }
 0x1a1   : > { %8406 = vst [vmem:[#allocation32_spill] sm:$0xff] %v6683_v7  ;;  %v6685_v30 = vadd.f32 %v1792_v53, %v1699_v34 }
 0x1a2   : > { %2368 = vmatmul.f32.gmra.mxu0 %v5761_v54  ;;  %2413 = vmatmul.f32.vlgmr.msrb.gmra.mxu1 %v5723_v35 }
 0x1a4   : > { %2571 = vmatmul.f32.gmra.mxu3 %v5761_v54 }
 0x1a5   : > { %2474 = vmatmul.f32.gmra.mxu2 %v5843_v61 }
 0x1a7   : > { %v6691_v5 = vpop.f32.mrf.mxu0  ;;  %v6693_v3 = vpop.f32.mrf.mxu1 }
 0x1a8   : > { %8407 = vst [vmem:[#allocation33_spill] sm:$0xff] %v6691_v5  ;;  %v1707_v58 = vpop.f32.mrf.mxu2  ;;  %v1796_v21 = vpop.f32.mrf.mxu3 }
 0x1a9   : > { %8408 = vst [vmem:[#allocation34_spill] sm:$0xff] %v6693_v3  ;;  %v6695_v13 = vadd.f32 %v1796_v21, %v1707_v58 }
 0x1aa   : > { %2372 = vmatmul.f32.gmra.mxu0 %v5784_v1  ;;  %2417 = vmatmul.f32.gmra.mxu1 %v5761_v54 }
 0x1ac   : > { %2575 = vmatmul.f32.gmra.mxu3 %v5784_v1 }
 0x1ad   : > { %2482 = vmatmul.f32.gmra.mxu2 %v5891_v4  ;;  %v8321_v4 = vand.u32 4294901760, %v6709_v60 }
 0x1af   : > { %v6704_v61 = vpop.f32.mrf.mxu0  ;;  %v6706_v59 = vpop.f32.mrf.mxu1  ;;  %v2931_v51 = vsub.f32 %v6709_v60, %v8321_v4 }
 0x1b0   : > { %8409 = vst [vmem:[#allocation35_spill] sm:$0xff] %v6704_v61  ;;  %v1715_v23 = vpop.f32.mrf.mxu2  ;;  %v1800_v48 = vpop.f32.mrf.mxu3 }
 0x1b1   : > { %8410 = vst [vmem:[#allocation36_spill] sm:$0xff] %v6706_v59  ;;  %v6713_v9 = vadd.f32 %v1800_v48, %v1715_v23  ;;  %v2932_v21 = vand.u32 4294901760, %v2931_v51  ;;  %v8322_v23 = vand.u32 4294901760, %v6730_v39  ;;  %v6746_v51 = vand.u32 4294901760, %v392_v55 }
 0x1b2   : > { %2376 = vmatmul.f32.gmra.mxu0 %v5848_v2  ;;  %2421 = vmatmul.f32.gmra.mxu1 %v5784_v1 }
 0x1b3   : > { %2933 = vmatpush.msrb.mxu1 %v2932_v21  ;;  %v2937_v48 = vsub.f32 %v6730_v39, %v8322_v23  ;;  %v6750_v21 = vsub.f32 %v392_v55, %v6746_v51  ;;  %2860 = vmatpush.msrb.mxu0 %v6746_v51 }
 0x1b4   : > { %2579 = vmatmul.f32.gmra.mxu3 %v5848_v2 }
 0x1b5   : > { %2490 = vmatmul.f32.gmra.mxu2 %v5935_v31  ;;  %3077 = vmatpush.msrb.mxu3 %v6746_v51 }
 0x1b6   : > { %3017 = vmatpush.msrb.mxu2 %v6750_v21 }
 0x1b7   : > { %v6727_v6 = vpop.f32.mrf.mxu1  ;;  %v1842_v34 = vpop.f32.mrf.mxu0 }
 0x1b8   : > { %8411 = vst [vmem:[#allocation37_spill] sm:$0xff] %v6727_v6  ;;  %v1723_v53 = vpop.f32.mrf.mxu2  ;;  %v1804_v58 = vpop.f32.mrf.mxu3 }
 0x1b9   : > { %v6734_v31 = vadd.f32 %v1804_v58, %v1723_v53  ;;  %v1843_v53 = vadd.f32 %v1842_v34, %v6665_v27  ;;  %v2938_v58 = vand.u32 4294901760, %v2937_v48  ;;  %v386_v34 = vld [vmem:[%s5640_s23 + $0xc0] sm:$0xff] }
 0x1ba   : > { %2380 = vmatmul.f32.gmra.mxu0 %v5893_v62  ;;  %2425 = vmatmul.f32.gmra.mxu1 %v5848_v2  ;;  %v6762_v55 = vand.u32 4294901760, %v386_v34 }
 0x1bb   : > { %2939 = vmatpush.msrb.mxu1 %v2938_v58 }
 0x1bc   : > { %2583 = vmatmul.f32.gmra.mxu3 %v5893_v62  ;;  %2862 = vmatpush.msrb.mxu0 %v6762_v55 }
 0x1bd   : > { %2498 = vmatmul.f32.gmra.mxu2 %v5963_v18  ;;  %v8323_v18 = vand.u32 4294901760, %v6750_v21  ;;  %3079 = vmatpush.msrb.mxu3 %v6762_v55 }
 0x1bf   : > { %v1847_v4 = vpop.f32.mrf.mxu0  ;;  %v1898_v6 = vpop.f32.mrf.mxu1  ;;  %v2943_v48 = vsub.f32 %v6750_v21, %v8323_v18 }
 0x1c0   : > { %v1899_v61 = vadd.f32 %v1898_v6, %v1843_v53  ;;  %v1973_v23 = vpop.f32.mrf.mxu2  ;;  %v2022_v47 = vpop.f32.mrf.mxu3  ;;  %v1848_v58 = vadd.f32 %v1847_v4, %v6675_v19 }
 0x1c1   : > { %v2944_v53 = vand.u32 4294901760, %v2943_v48 }
 0x1c2   : > { %v1974_v27 = vadd.f32 %v1973_v23, %v1899_v61  ;;  %2384 = vmatmul.f32.gmra.mxu0 %v5941_v32  ;;  %2429 = vmatmul.f32.gmra.mxu1 %v5893_v62  ;;  %v6769_v61 = vsub.f32 %v386_v34, %v6762_v55  ;;  %v380_v23 = vld [vmem:[%s5640_s23 + $0x90] sm:$0xff] }
 0x1c3   : > { %v6775_v18 = vand.u32 4294901760, %v380_v23  ;;  %2945 = vmatpush.msrb.mxu1 %v2944_v53 }
 0x1c4   : > { %v6764_v6 = vadd.f32 %v2022_v47, %v1974_v27  ;;  %2587 = vmatmul.f32.gmra.mxu3 %v5941_v32  ;;  %3020 = vmatpush.msrb.mxu2 %v6769_v61 }
 0x1c5   : > { %2506 = vmatmul.f32.gmra.mxu2 %v5989_v37  ;;  %v8324_v37 = vand.u32 4294901760, %v6769_v61  ;;  %2864 = vmatpush.msrb.mxu0 %v6775_v18 }
 0x1c6   : > { %8412 = vst [vmem:[#allocation38_spill] sm:$0xff] %v6764_v6  ;;  %v6780_v6 = vsub.f32 %v380_v23, %v6775_v18  ;;  %3081 = vmatpush.msrb.mxu3 %v6775_v18 }
 0x1c7   : > { %v1852_v59 = vpop.f32.mrf.mxu0  ;;  %v1904_v47 = vpop.f32.mrf.mxu1  ;;  %v2949_v19 = vsub.f32 %v6769_v61, %v8324_v37 }
 0x1c8   : > { %v1905_v27 = vadd.f32 %v1904_v47, %v1848_v58  ;;  %v1977_v48 = vpop.f32.mrf.mxu2  ;;  %v2026_v34 = vpop.f32.mrf.mxu3  ;;  %3023 = vmatpush.msrb.mxu2 %v6780_v6  ;;  %v8326_v23 = vand.u32 4294901760, %v6780_v6  ;;  %v374_v47 = vld [vmem:[%s5640_s23 + $0x60] sm:$0xff]  ;;  %v1853_v37 = vadd.f32 %v1852_v59, %v6685_v30 }
 0x1c9   : > { %v2950_v53 = vand.u32 4294901760, %v2949_v19 }
 0x1ca   : > { %v1978_v4 = vadd.f32 %v1977_v48, %v1905_v27  ;;  %2433 = vmatmul.f32.gmra.mxu1 %v5941_v32  ;;  %2625 = vmatmul.f32.vlgmr.msra.gmra.mxu0 %v5736_v42  ;;  %v2955_v27 = vsub.f32 %v6780_v6, %v8326_v23  ;;  %v6800_v42 = vand.u32 4294901760, %v374_v47 }
 0x1cb   : > { %2951 = vmatpush.msrb.mxu1 %v2950_v53  ;;  %v368_v53 = vld [vmem:[%s5640_s23 + $0x30] sm:$0xff] }
 0x1cc   : > { %v6790_v58 = vadd.f32 %v2026_v34, %v1978_v4  ;;  %2805 = vmatmul.f32.vlgmr.msra.gmra.mxu3 %v5723_v35  ;;  %v2956_v5 = vand.u32 4294901760, %v2955_v27  ;;  %v6803_v0 = vsub.f32 %v374_v47, %v6800_v42  ;;  %2866 = vmatpush.msrb.mxu0 %v6800_v42 }
 0x1cd   : > { %2756 = vmatmul.f32.vlgmr.msra.gmra.mxu2 %v5723_v35  ;;  %3083 = vmatpush.msrb.mxu3 %v6800_v42 }
 0x1ce   : > { %8413 = vst [vmem:[#allocation39_spill] sm:$0xff] %v6790_v58  ;;  %v8325_v30 = vand.u32 4294901760, %v6803_v0  ;;  %2957 = vmatpush.msrb.mxu1 %v2956_v5  ;;  %3026 = vmatpush.msrb.mxu2 %v6803_v0 }
 0x1cf   : > { %v1857_v48 = vpop.f32.mrf.mxu0  ;;  %v1910_v19 = vpop.f32.mrf.mxu1 }
 0x1d0   : > { %v1911_v34 = vadd.f32 %v1910_v19, %v1853_v37  ;;  %v1981_v4 = vpop.f32.mrf.mxu2  ;;  %v2030_v58 = vpop.f32.mrf.mxu3  ;;  %v2961_v37 = vsub.f32 %v6803_v0, %v8325_v30 }
 0x1d2   : > { %v1982_v35 = vadd.f32 %v1981_v4, %v1911_v34  ;;  %2630 = vmatmul.f32.gmra.mxu0 %v5779_v63  ;;  %2681 = vmatmul.f32.vlgmr.msra.gmra.mxu1 %v5750_v49  ;;  %v6819_v63 = vand.u32 4294901760, %v368_v53  ;;  %v1858_v49 = vadd.f32 %v1857_v48, %v6695_v13  ;;  %v2962_v47 = vand.u32 4294901760, %v2961_v37 }
 0x1d4   : > { %v6811_v59 = vadd.f32 %v2030_v58, %v1982_v35  ;;  %2809 = vmatmul.f32.gmra.mxu3 %v5761_v54  ;;  %v6823_v19 = vsub.f32 %v368_v53, %v6819_v63  ;;  %2868 = vmatpush.msrb.mxu0 %v6819_v63  ;;  %v362_v58 = vld [vmem:[%s5640_s23] sm:$0xff] }
 0x1d5   : > { %2760 = vmatmul.f32.gmra.mxu2 %v5761_v54  ;;  %3085 = vmatpush.msrb.mxu3 %v6819_v63  ;;  %v6828_v54 = vand.u32 4294901760, %v362_v58 }
 0x1d6   : > { %8414 = vst [vmem:[#allocation40_spill] sm:$0xff] %v6811_v59  ;;  %2963 = vmatpush.msrb.mxu1 %v2962_v47  ;;  %3029 = vmatpush.msrb.mxu2 %v6823_v19  ;;  %v2966_v13 = vand.u32 4294901760, %v6823_v19  ;;  %v405_v47 = vld [vmem:[%s5640_s23 + $0x158] sm:$0xff] }
 0x1d7   : > { %v1862_v27 = vpop.f32.mrf.mxu0  ;;  %v1916_v5 = vpop.f32.mrf.mxu1  ;;  %v6835_v37 = vsub.f32 %v362_v58, %v6828_v54  ;;  %2870 = vmatpush.msrb.mxu0 %v6828_v54  ;;  %3087 = vmatpush.msrb.mxu3 %v6828_v54 }
 0x1d8   : > { %v1917_v34 = vadd.f32 %v1916_v5, %v1858_v49  ;;  %v1985_v4 = vpop.f32.mrf.mxu2  ;;  %v2034_v35 = vpop.f32.mrf.mxu3  ;;  %v2967_v53 = vsub.f32 %v6823_v19, %v2966_v13  ;;  %v8416_v5 = vand.u32 4294901760, %v6709_v60  ;;  %v1863_v19 = vadd.f32 %v1862_v27, %v6713_v9 }
 0x1d9   : > { %3032 = vmatpush.msrb.mxu2 %v6835_v37  ;;  %v8418_v9 = vand.u32 4294901760, %v6750_v21 }
 0x1da   : > { %v1986_v48 = vadd.f32 %v1985_v4, %v1917_v34  ;;  %2635 = vmatmul.f32.gmra.mxu0 %v5809_v33  ;;  %2687 = vmatmul.f32.gmra.mxu1 %v5798_v14  ;;  %v2972_v33 = vand.u32 4294901760, %v6835_v37  ;;  %v2968_v14 = vand.u32 4294901760, %v2967_v53  ;;  %v6851_v34 = vand.u32 4294901760, %v405_v47  ;;  %v311_v53 = vld [vmem:[%s5672_s30] sm:$0xff] }
 0x1db   : > { %3136 = vmatpush.msra.mxu0 %v8416_v5 }
 0x1dc   : > { %v6840_v49 = vadd.f32 %v2034_v35, %v1986_v48  ;;  %2813 = vmatmul.f32.gmra.mxu3 %v5784_v1  ;;  %v2973_v58 = vsub.f32 %v6835_v37, %v2972_v33  ;;  %2969 = vmatpush.msrb.mxu1 %v2968_v14  ;;  %v8417_v48 = vand.u32 4294901760, %v6730_v39  ;;  %v6858_v60 = vsub.f32 %v405_v47, %v6851_v34 }
 0x1dd   : > { %2764 = vmatmul.f32.gmra.mxu2 %v5784_v1  ;;  %v2830_v37 = vsel %vm458_vm1, %v311_v53, 0  ;;  %v8419_v14 = vand.u32 4294901760, %v6769_v61 }
 0x1de   : > { %8415 = vst [vmem:[#allocation41_spill] sm:$0xff] %v6840_v49  ;;  %3140 = vmatpush.msra.mxu0 %v8417_v48  ;;  %v2974_v49 = vand.u32 4294901760, %v2973_v58  ;;  %3248 = vmatpush.msra.mxu2 %v6851_v34  ;;  %v8331_v39 = vand.u32 4294901760, %v6858_v60 }
 0x1df   : > { %v1867_v4 = vpop.f32.mrf.mxu0  ;;  %v1922_v35 = vpop.f32.mrf.mxu1 }
 0x1e0   : > { %v1923_v30 = vadd.f32 %v1922_v35, %v1863_v19  ;;  %v1989_v23 = vpop.f32.mrf.mxu2  ;;  %v2038_v1 = vpop.f32.mrf.mxu3  ;;  %3144 = vmatpush.msra.mxu0 %v8418_v9  ;;  %2975 = vmatpush.msrb.mxu1 %v2974_v49  ;;  %v3323_v21 = vsub.f32 %v6858_v60, %v8331_v39  ;;  %v1868_v61 = vadd.f32 %v1867_v4, %v6734_v31 }
 0x1e2   : > { %v1990_v27 = vadd.f32 %v1989_v23, %v1923_v30  ;;  %2640 = vmatmul.f32.gmra.mxu0 %v5870_v24  ;;  %2693 = vmatmul.f32.gmra.mxu1 %v5836_v56  ;;  %v399_v56 = vld [vmem:[%s5640_s23 + $0x128] sm:$0xff]  ;;  %v8421_v24 = vand.u32 4294901760, %v6780_v6  ;;  %v6880_v23 = vand.u32 4294901760, %v2830_v37  ;;  %v3324_v30 = vand.u32 4294901760, %v3323_v21 }
 0x1e3   : > { %3148 = vmatpush.msra.mxu0 %v8419_v14  ;;  %3199 = vmatpush.msra.mxu1 %v6702_v8  ;;  %v6882_v49 = vand.u32 4294901760, %v399_v56  ;;  %v8422_v8 = vand.u32 4294901760, %v6803_v0  ;;  %v312_v6 = vld [vmem:[%s5672_s30 + $0x8] sm:$0xff] }
 0x1e4   : > { %v6868_v5 = vadd.f32 %v2038_v1, %v1990_v27  ;;  %2817 = vmatmul.f32.gmra.mxu3 %v5848_v2  ;;  %v6896_v0 = vsub.f32 %v2830_v37, %v6880_v23  ;;  %v2833_v48 = vsel %vm458_vm1, %v312_v6, 0  ;;  %v313_v27 = vld [vmem:[%s5672_s30 + $0x10] sm:$0xff] }
 0x1e5   : > { %2768 = vmatmul.f32.gmra.mxu2 %v5848_v2  ;;  %3152 = vmatpush.msra.mxu0 %v8421_v24  ;;  %v6890_v31 = vsub.f32 %v399_v56, %v6882_v49 }
 0x1e6   : > { %8420 = vst [vmem:[#allocation42_spill] sm:$0xff] %v6868_v5  ;;  %3201 = vmatpush.msra.mxu1 %v6725_v57  ;;  %3325 = vmatpush.msra.mxu3 %v3324_v30  ;;  %v387_v30 = vld [vmem:[%s5640_s23 + $0xc8] sm:$0xff] }
 0x1e7   : > { %v1928_v47 = vpop.f32.mrf.mxu1  ;;  %v2075_v19 = vpop.f32.mrf.mxu0  ;;  %3156 = vmatpush.msra.mxu0 %v8422_v8  ;;  %3250 = vmatpush.msra.mxu2 %v6882_v49  ;;  %8423 = vst [vmem:[#allocation43_spill] sm:$0xff] %v6896_v0  ;;  %v8330_v4 = vand.u32 4294901760, %v6890_v31 }
 0x1e8   : > { %v1929_v58 = vadd.f32 %v1928_v47, %v1868_v61  ;;  %v1993_v2 = vpop.f32.mrf.mxu2  ;;  %v2042_v35 = vpop.f32.mrf.mxu3  ;;  %3203 = vmatpush.msra.mxu1 %v6746_v51 }
 0x1e9   : > { %3160 = vmatpush.msra.mxu0 %v2966_v13  ;;  %v6913_v13 = vand.u32 4294901760, %v6896_v0 }
 0x1ea   : > { %v1994_v57 = vadd.f32 %v1993_v2, %v1929_v58  ;;  %2645 = vmatmul.f32.gmra.mxu0 %v5923_v20  ;;  %2699 = vmatmul.f32.gmra.mxu1 %v5897_v17  ;;  %v3329_v20 = vsub.f32 %v6890_v31, %v8330_v4  ;;  %v393_v17 = vld [vmem:[%s5640_s23 + $0xf8] sm:$0xff]  ;;  %v363_v4 = vld [vmem:[%s5640_s23 + $0x8] sm:$0xff] }
 0x1eb   : > { %3205 = vmatpush.msra.mxu1 %v6762_v55  ;;  %3164 = vmatpush.msra.mxu0 %v2972_v33  ;;  %v6909_v51 = vand.u32 4294901760, %v393_v17  ;;  %8425 = vst [vmem:[#allocation45_spill] sm:$0xff] %v6913_v13  ;;  %v6915_v55 = vand.u32 4294901760, %v2833_v48  ;;  %v2874_v24 = vsub.f32 %v6896_v0, %v6913_v13  ;;  %v381_v58 = vld [vmem:[%s5640_s23 + $0x98] sm:$0xff] }
 0x1ec   : > { %v6901_v1 = vadd.f32 %v2042_v35, %v1994_v57  ;;  %2821 = vmatmul.f32.gmra.mxu3 %v5893_v62  ;;  %v3330_v33 = vand.u32 4294901760, %v3329_v20 }
 0x1ed   : > { %2772 = vmatmul.f32.gmra.mxu2 %v5893_v62  ;;  %3207 = vmatpush.msra.mxu1 %v6775_v18  ;;  %v6920_v37 = vsub.f32 %v393_v17, %v6909_v51  ;;  %v6930_v61 = vsub.f32 %v2833_v48, %v6915_v55  ;;  %v6950_v2 = vand.u32 4294901760, %v2874_v24 }
 0x1ee   : > { %8424 = vst [vmem:[#allocation44_spill] sm:$0xff] %v6901_v1  ;;  %3252 = vmatpush.msra.mxu2 %v6909_v51  ;;  %3331 = vmatpush.msra.mxu3 %v3330_v33 }
 0x1ef   : > { %v2083_v53 = vpop.f32.mrf.mxu0  ;;  %v2176_v9 = vpop.f32.mrf.mxu1  ;;  %3209 = vmatpush.msra.mxu1 %v6800_v42  ;;  %v8329_v21 = vand.u32 4294901760, %v6920_v37  ;;  %8426 = vst [vmem:[#allocation46_spill] sm:$0xff] %v6930_v61  ;;  %v2836_v42 = vsel %vm458_vm1, %v313_v27, 0  ;;  %v6953_v35 = vand.u32 4294901760, %v6930_v61  ;;  %v8436_v36 = vand.u32 4294901760, %v6920_v37 }
 0x1f0   : > { %v2177_v62 = vadd.f32 %v2176_v9, %v2075_v19  ;;  %v2234_v14 = vpop.f32.mrf.mxu2  ;;  %v2290_v18 = vpop.f32.mrf.mxu3  ;;  %8428 = vst [vmem:[#allocation48_spill] sm:$0xff] %v6950_v2 }
 0x1f1   : > { %3211 = vmatpush.msra.mxu1 %v6819_v63  ;;  %v3335_v47 = vsub.f32 %v6920_v37, %v8329_v21  ;;  %v6937_v63 = vand.u32 4294901760, %v387_v30  ;;  %8429 = vst [vmem:[#allocation49_spill] sm:$0xff] %v6953_v35  ;;  %v369_v21 = vld [vmem:[%s5640_s23 + $0x38] sm:$0xff] }
 0x1f2   : > { %v2235_v56 = vadd.f32 %v2234_v14, %v2177_v62  ;;  %2650 = vmatmul.f32.gmra.mxu0 %v5955_v22  ;;  %2705 = vmatmul.f32.gmra.mxu1 %v5938_v11  ;;  %v6944_v11 = vand.u32 4294901760, %v2836_v42 }
 0x1f3   : > { %3213 = vmatpush.msra.mxu1 %v6828_v54  ;;  %v3336_v19 = vand.u32 4294901760, %v3335_v47  ;;  %v6947_v8 = vsub.f32 %v387_v30, %v6937_v63  ;;  %3254 = vmatpush.msra.mxu2 %v6937_v63  ;;  %v6956_v54 = vand.u32 4294901760, %v381_v58  ;;  %v375_v47 = vld [vmem:[%s5640_s23 + $0x68] sm:$0xff] }
 0x1f4   : > { %v6940_v22 = vadd.f32 %v2290_v18, %v2235_v56  ;;  %2825 = vmatmul.f32.gmra.mxu3 %v5941_v32  ;;  %v6962_v9 = vsub.f32 %v2836_v42, %v6944_v11 }
 0x1f5   : > { %2776 = vmatmul.f32.gmra.mxu2 %v5941_v32  ;;  %3337 = vmatpush.msra.mxu3 %v3336_v19  ;;  %v314_v32 = vld [vmem:[%s5672_s30 + $0x18] sm:$0xff]  ;;  %v8328_v48 = vand.u32 4294901760, %v6947_v8  ;;  %v6973_v18 = vsub.f32 %v381_v58, %v6956_v54 }
 0x1f6   : > { %8427 = vst [vmem:[#allocation47_spill] sm:$0xff] %v6940_v22  ;;  %3256 = vmatpush.msra.mxu2 %v6956_v54  ;;  %v2839_v14 = vsel %vm458_vm1, %v314_v32, 0 }
 0x1f7   : > { %v2091_v6 = vpop.f32.mrf.mxu0  ;;  %v2180_v57 = vpop.f32.mrf.mxu1  ;;  %v3341_v27 = vsub.f32 %v6947_v8, %v8328_v48  ;;  %v8327_v42 = vand.u32 4294901760, %v6973_v18  ;;  %v6984_v30 = vand.u32 4294901760, %v2839_v14 }
 0x1f8   : > { %v2181_v20 = vadd.f32 %v2180_v57, %v2083_v53  ;;  %v2239_v17 = vpop.f32.mrf.mxu2  ;;  %v2296_v33 = vpop.f32.mrf.mxu3  ;;  %v2882_v53 = vsub.f32 %v6930_v61, %v6953_v35  ;;  %v6992_v57 = vand.u32 4294901760, %v375_v47 }
 0x1f9   : > { %v3342_v56 = vand.u32 4294901760, %v3341_v27  ;;  %v3347_v58 = vsub.f32 %v6973_v18, %v8327_v42  ;;  %v7004_v48 = vsub.f32 %v2839_v14, %v6984_v30 }
 0x1fa   : > { %v2240_v62 = vadd.f32 %v2239_v17, %v2181_v20  ;;  %2711 = vmatmul.f32.gmra.mxu1 %v5966_v29  ;;  %2876 = vmatmul.f32.vlgmr.msrb.gmra.mxu0 %v6950_v2  ;;  %v6982_v29 = vand.u32 4294901760, %v6962_v9  ;;  %v6987_v19 = vand.u32 4294901760, %v2882_v53  ;;  %v6998_v53 = vsub.f32 %v375_v47, %v6992_v57 }
 0x1fb   : > { %3403 = vmatpush.msrb.mxu0 %v6858_v60  ;;  %3343 = vmatpush.msra.mxu3 %v3342_v56  ;;  %v315_v56 = vld [vmem:[%s5672_s30 + $0x20] sm:$0xff] }
 0x1fc   : > { %v6976_v24 = vadd.f32 %v2296_v33, %v2240_v62  ;;  %3091 = vmatmul.f32.vlgmr.msrb.gmra.mxu3 %v6913_v13  ;;  %8431 = vst [vmem:[#allocation51_spill] sm:$0xff] %v6982_v29  ;;  %v3348_v62 = vand.u32 4294901760, %v3347_v58  ;;  %3258 = vmatpush.msra.mxu2 %v6992_v57  ;;  %v2890_v42 = vsub.f32 %v6962_v9, %v6982_v29  ;;  %v8332_v58 = vand.u32 4294901760, %v6998_v53 }
 0x1fd   : > { %3035 = vmatmul.f32.vlgmr.msrb.gmra.mxu2 %v6896_v0  ;;  %8432 = vst [vmem:[#allocation52_spill] sm:$0xff] %v6987_v19  ;;  %3406 = vmatpush.msrb.mxu0 %v6890_v31  ;;  %v2842_v47 = vsel %vm458_vm1, %v315_v56, 0 }
 0x1fe   : > { %8430 = vst [vmem:[#allocation50_spill] sm:$0xff] %v6976_v24  ;;  %3349 = vmatpush.msra.mxu3 %v3348_v62  ;;  %v3353_v14 = vsub.f32 %v6998_v53, %v8332_v58  ;;  %v7028_v62 = vand.u32 4294901760, %v2890_v42  ;;  %v7034_v56 = vand.u32 4294901760, %v2842_v47  ;;  %v8434_v24 = vand.u32 4294901760, %v6858_v60 }
 0x1ff   : > { %v2099_v32 = vpop.f32.mrf.mxu0  ;;  %v2184_v20 = vpop.f32.mrf.mxu1  ;;  %3409 = vmatpush.msrb.mxu0 %v6920_v37  ;;  %v8435_v60 = vand.u32 4294901760, %v6890_v31 }
 0x200   : > { %v2185_v17 = vadd.f32 %v2184_v20, %v2091_v6  ;;  %v2244_v33 = vpop.f32.mrf.mxu2  ;;  %v2302_v27 = vpop.f32.mrf.mxu3  ;;  %v7010_v20 = vand.u32 4294901760, %v369_v21 }
 0x201   : > { %3412 = vmatpush.msrb.mxu0 %v6947_v8 }
 0x202   : > { %v2245_v6 = vadd.f32 %v2244_v33, %v2185_v17  ;;  %2884 = vmatmul.f32.gmra.mxu0 %v6987_v19  ;;  %2977 = vmatmul.f32.vlgmr.msrb.gmra.mxu1 %v6880_v23  ;;  %v7023_v17 = vsub.f32 %v369_v21, %v7010_v20  ;;  %v7025_v33 = vand.u32 4294901760, %v363_v4 }
 0x203   : > { %3465 = vmatpush.msrb.mxu1 %v6851_v34  ;;  %3260 = vmatpush.msra.mxu2 %v7010_v20 }
 0x204   : > { %v7015_v39 = vadd.f32 %v2302_v27, %v2245_v6  ;;  %3097 = vmatmul.f32.gmra.mxu3 %v6953_v35  ;;  %v7031_v27 = vand.u32 4294901760, %v7004_v48  ;;  %v3354_v6 = vand.u32 4294901760, %v3353_v14  ;;  %v8333_v58 = vand.u32 4294901760, %v7023_v17  ;;  %v316_v14 = vld [vmem:[%s5672_s30 + $0x28] sm:$0xff]  ;;  %3415 = vmatpush.msrb.mxu0 %v6973_v18 }
 0x205   : > { %3040 = vmatmul.f32.gmra.mxu2 %v6930_v61  ;;  %3467 = vmatpush.msrb.mxu1 %v6882_v49  ;;  %v7039_v21 = vsub.f32 %v363_v4, %v7025_v33 }
 0x206   : > { %8433 = vst [vmem:[#allocation53_spill] sm:$0xff] %v7015_v39  ;;  %3262 = vmatpush.msra.mxu2 %v7025_v33  ;;  %3355 = vmatpush.msra.mxu3 %v3354_v6  ;;  %v3359_v59 = vsub.f32 %v7023_v17, %v8333_v58  ;;  %v2898_v3 = vsub.f32 %v7004_v48, %v7031_v27  ;;  %v2845_v58 = vsel %vm458_vm1, %v316_v14, 0 }
 0x207   : > { %v2107_v42 = vpop.f32.mrf.mxu0  ;;  %v2188_v39 = vpop.f32.mrf.mxu1  ;;  %3469 = vmatpush.msrb.mxu1 %v6909_v51  ;;  %v3364_v4 = vand.u32 4294901760, %v7039_v21  ;;  %3418 = vmatpush.msrb.mxu0 %v6998_v53 }
 0x208   : > { %3528 = vmatpush.msrb.mxu2 %v8434_v24  ;;  %v2189_v22 = vadd.f32 %v2188_v39, %v2099_v32  ;;  %v2249_v1 = vpop.f32.mrf.mxu2  ;;  %v2308_v5 = vpop.f32.mrf.mxu3  ;;  %v7059_v24 = vsub.f32 %v2842_v47, %v7034_v56  ;;  %v3360_v32 = vand.u32 4294901760, %v3359_v59  ;;  %v7071_v59 = vand.u32 4294901760, %v2898_v3 }
 0x209   : > { %3471 = vmatpush.msrb.mxu1 %v6937_v63  ;;  %v3365_v6 = vsub.f32 %v7039_v21, %v3364_v4  ;;  %v7076_v47 = vand.u32 4294901760, %v2845_v58  ;;  %3421 = vmatpush.msrb.mxu0 %v7023_v17  ;;  %v8439_v3 = vand.u32 4294901760, %v6973_v18 }
 0x20a   : > { %3532 = vmatpush.msrb.mxu2 %v8435_v60  ;;  %v2250_v39 = vadd.f32 %v2249_v1, %v2189_v22  ;;  %2892 = vmatmul.f32.gmra.mxu0 %v7028_v62  ;;  %v7074_v22 = vand.u32 4294901760, %v7059_v24 }
 0x20b   : > { %2981 = vmatmul.f32.gmra.mxu1 %v6915_v55  ;;  %v3366_v1 = vand.u32 4294901760, %v3365_v6  ;;  %3361 = vmatpush.msra.mxu3 %v3360_v32 }
 0x20c   : > { %3536 = vmatpush.msrb.mxu2 %v8436_v36  ;;  %3473 = vmatpush.msrb.mxu1 %v6956_v54  ;;  %v7066_v31 = vadd.f32 %v2308_v5, %v2250_v39  ;;  %v8438_v36 = vand.u32 4294901760, %v6947_v8  ;;  %v2906_v32 = vsub.f32 %v7059_v24, %v7074_v22 }
 0x20d   : > { %3103 = vmatmul.f32.gmra.mxu3 %v6982_v29  ;;  %3045 = vmatmul.f32.gmra.mxu2 %v6962_v9 }
 0x20e   : > { %8437 = vst [vmem:[#allocation54_spill] sm:$0xff] %v7066_v31  ;;  %3540 = vmatpush.msrb.mxu2 %v8438_v36  ;;  %3475 = vmatpush.msrb.mxu1 %v6992_v57 }
 0x20f   : > { %v2115_v5 = vpop.f32.mrf.mxu0  ;;  %v2192_v37 = vpop.f32.mrf.mxu1  ;;  %3367 = vmatpush.msra.mxu3 %v3366_v1  ;;  %3424 = vmatpush.msrb.mxu0 %v7039_v21  ;;  %v7103_v21 = vand.u32 4294901760, %v2906_v32 }
 0x210   : > { %v2193_v14 = vadd.f32 %v2192_v37, %v2107_v42  ;;  %v2254_v60 = vpop.f32.mrf.mxu2  ;;  %v2314_v39 = vpop.f32.mrf.mxu3  ;;  %3544 = vmatpush.msrb.mxu2 %v8439_v3  ;;  %3477 = vmatpush.msrb.mxu1 %v7010_v20  ;;  %v7092_v42 = vsub.f32 %v2845_v58, %v7076_v47 }
 0x211   : > { %3591 = vmatpush.msrb.mxu3 %v6851_v34  ;;  %v8440_v34 = vand.u32 4294901760, %v6998_v53 }
 0x212   : > { %v2255_v8 = vadd.f32 %v2254_v60, %v2193_v14  ;;  %2900 = vmatmul.f32.gmra.mxu0 %v7071_v59  ;;  %3479 = vmatpush.msrb.mxu1 %v7025_v33  ;;  %v7106_v58 = vand.u32 4294901760, %v7092_v42 }
 0x213   : > { %2985 = vmatmul.f32.gmra.mxu1 %v6944_v11  ;;  %3593 = vmatpush.msrb.mxu3 %v6882_v49  ;;  %v8442_v49 = vand.u32 4294901760, %v7023_v17 }
 0x214   : > { %3548 = vmatpush.msrb.mxu2 %v8440_v34  ;;  %v7097_v18 = vadd.f32 %v2314_v39, %v2255_v8  ;;  %v2914_v17 = vsub.f32 %v7092_v42, %v7106_v58 }
 0x215   : > { %3109 = vmatmul.f32.gmra.mxu3 %v7031_v27  ;;  %3050 = vmatmul.f32.gmra.mxu2 %v7004_v48 }
 0x216   : > { %8441 = vst [vmem:[#allocation55_spill] sm:$0xff] %v7097_v18  ;;  %3595 = vmatpush.msrb.mxu3 %v6909_v51  ;;  %3552 = vmatpush.msrb.mxu2 %v8442_v49 }
 0x217   : > { %v2196_v53 = vpop.f32.mrf.mxu1  ;;  %v7110_v6 = vpop.f32.mrf.mxu0 }
 0x218   : > { %8443 = vst [vmem:[#allocation56_spill] sm:$0xff] %v7110_v6  ;;  %3597 = vmatpush.msrb.mxu3 %v6937_v63  ;;  %v2197_v1 = vadd.f32 %v2196_v53, %v2115_v5  ;;  %v2259_v36 = vpop.f32.mrf.mxu2  ;;  %v2320_v37 = vpop.f32.mrf.mxu3  ;;  %3556 = vmatpush.msrb.mxu2 %v3364_v4  ;;  %v7124_v63 = vand.u32 4294901760, %v2914_v17 }
 0x21a   : > { %3599 = vmatpush.msrb.mxu3 %v6956_v54  ;;  %v2260_v51 = vadd.f32 %v2259_v36, %v2197_v1  ;;  %2908 = vmatmul.f32.gmra.mxu0 %v7103_v21 }
 0x21b   : > { %2989 = vmatmul.f32.gmra.mxu1 %v6984_v30 }
 0x21c   : > { %3601 = vmatpush.msrb.mxu3 %v6992_v57  ;;  %v7119_v14 = vadd.f32 %v2320_v37, %v2260_v51 }
 0x21d   : > { %3115 = vmatmul.f32.gmra.mxu3 %v7074_v22  ;;  %3055 = vmatmul.f32.gmra.mxu2 %v7059_v24 }
 0x21e   : > { %8444 = vst [vmem:[#allocation57_spill] sm:$0xff] %v7119_v14  ;;  %3603 = vmatpush.msrb.mxu3 %v7010_v20 }
 0x21f   : > { %v7126_v54 = vpop.f32.mrf.mxu0  ;;  %v7128_v4 = vpop.f32.mrf.mxu1 }
 0x220   : > { %8445 = vst [vmem:[#allocation58_spill] sm:$0xff] %v7126_v54  ;;  %3605 = vmatpush.msrb.mxu3 %v7025_v33  ;;  %v2467_v5 = vpop.f32.mrf.mxu2  ;;  %v2568_v60 = vpop.f32.mrf.mxu3 }
 0x221   : > { %8446 = vst [vmem:[#allocation59_spill] sm:$0xff] %v7128_v4  ;;  %v7131_v39 = vadd.f32 %v2568_v60, %v2467_v5  ;;  %v406_v60 = vld [vmem:[%s5640_s23 + $0x160] sm:$0xff] }
 0x222   : > { %2916 = vmatmul.f32.gmra.mxu0 %v7124_v63 }
 0x223   : > { %2993 = vmatmul.f32.gmra.mxu1 %v7034_v56 }
 0x225   : > { %3121 = vmatmul.f32.gmra.mxu3 %v7106_v58  ;;  %3060 = vmatmul.f32.gmra.mxu2 %v7092_v42 }
 0x227   : > { %v7137_v57 = vpop.f32.mrf.mxu0  ;;  %v7139_v20 = vpop.f32.mrf.mxu1 }
 0x228   : > { %8447 = vst [vmem:[#allocation60_spill] sm:$0xff] %v7137_v57  ;;  %v2475_v3 = vpop.f32.mrf.mxu2  ;;  %v2572_v8 = vpop.f32.mrf.mxu3 }
 0x229   : > { %8448 = vst [vmem:[#allocation61_spill] sm:$0xff] %v7139_v20  ;;  %v7141_v32 = vadd.f32 %v2572_v8, %v2475_v3  ;;  %v7168_v3 = vand.u32 4294901760, %v406_v60 }
 0x22a   : > { %3166 = vmatmul.f32.vlgmr.msra.gmra.mxu0 %v6880_v23 }
 0x22b   : > { %2997 = vmatmul.f32.gmra.mxu1 %v7076_v47  ;;  %3640 = vmatpush.msra.mxu0 %v7168_v3 }
 0x22d   : > { %3369 = vmatmul.f32.vlgmr.msra.gmra.mxu3 %v6880_v23  ;;  %3268 = vmatmul.f32.vlgmr.msra.gmra.mxu2 %v6950_v2 }
 0x22e   : > { %3857 = vmatpush.msra.mxu3 %v7168_v3 }
 0x22f   : > { %v7147_v33 = vpop.f32.mrf.mxu0  ;;  %v7149_v34 = vpop.f32.mrf.mxu1 }
 0x230   : > { %8449 = vst [vmem:[#allocation62_spill] sm:$0xff] %v7147_v33  ;;  %v2483_v49 = vpop.f32.mrf.mxu2  ;;  %v2576_v53 = vpop.f32.mrf.mxu3 }
 0x231   : > { %8450 = vst [vmem:[#allocation63_spill] sm:$0xff] %v7149_v34  ;;  %v7151_v1 = vadd.f32 %v2576_v53, %v2483_v49 }
 0x232   : > { %3170 = vmatmul.f32.gmra.mxu0 %v6915_v55 }
 0x233   : > { %3215 = vmatmul.f32.vlgmr.msra.gmra.mxu1 %v6880_v23 }
 0x235   : > { %3373 = vmatmul.f32.gmra.mxu3 %v6915_v55  ;;  %3276 = vmatmul.f32.gmra.mxu2 %v6987_v19 }
 0x237   : > { %v7157_v36 = vpop.f32.mrf.mxu0  ;;  %v7159_v37 = vpop.f32.mrf.mxu1 }
 0x238   : > { %8451 = vst [vmem:[#allocation64_spill] sm:$0xff] %v7157_v36  ;;  %v2491_v51 = vpop.f32.mrf.mxu2  ;;  %v2580_v17 = vpop.f32.mrf.mxu3 }
 0x239   : > { %8452 = vst [vmem:[#allocation65_spill] sm:$0xff] %v7159_v37  ;;  %v7161_v5 = vadd.f32 %v2580_v17, %v2491_v51  ;;  %v7175_v51 = vsub.f32 %v406_v60, %v7168_v3  ;;  %v400_v60 = vld [vmem:[%s5640_s23 + $0x130] sm:$0xff] }
 0x23a   : > { %3174 = vmatmul.f32.gmra.mxu0 %v6944_v11  ;;  %v7191_v36 = vand.u32 4294901760, %v400_v60 }
 0x23b   : > { %3219 = vmatmul.f32.gmra.mxu1 %v6915_v55  ;;  %3795 = vmatpush.msra.mxu2 %v7175_v51 }
 0x23c   : > { %v7196_v31 = vsub.f32 %v400_v60, %v7191_v36  ;;  %3642 = vmatpush.msra.mxu0 %v7191_v36  ;;  %3859 = vmatpush.msra.mxu3 %v7191_v36  ;;  %v394_v60 = vld [vmem:[%s5640_s23 + $0x100] sm:$0xff] }
 0x23d   : > { %3377 = vmatmul.f32.gmra.mxu3 %v6944_v11  ;;  %3284 = vmatmul.f32.gmra.mxu2 %v7028_v62 }
 0x23e   : > { %3798 = vmatpush.msra.mxu2 %v7196_v31 }
 0x23f   : > { %v7170_v8 = vpop.f32.mrf.mxu0  ;;  %v7172_v49 = vpop.f32.mrf.mxu1 }
 0x240   : > { %8453 = vst [vmem:[#allocation66_spill] sm:$0xff] %v7170_v8  ;;  %v2499_v53 = vpop.f32.mrf.mxu2  ;;  %v2584_v14 = vpop.f32.mrf.mxu3  ;;  %v8334_v8 = vand.u32 4294901760, %v7175_v51 }
 0x241   : > { %8454 = vst [vmem:[#allocation67_spill] sm:$0xff] %v7172_v49  ;;  %v7179_v17 = vadd.f32 %v2584_v14, %v2499_v53 }
 0x242   : > { %3178 = vmatmul.f32.gmra.mxu0 %v6984_v30  ;;  %v3715_v49 = vsub.f32 %v7175_v51, %v8334_v8  ;;  %v8335_v8 = vand.u32 4294901760, %v7196_v31 }
 0x243   : > { %3223 = vmatmul.f32.gmra.mxu1 %v6944_v11 }
 0x244   : > { %v3716_v33 = vand.u32 4294901760, %v3715_v49  ;;  %v3721_v49 = vsub.f32 %v7196_v31, %v8335_v8 }
 0x245   : > { %3381 = vmatmul.f32.gmra.mxu3 %v6984_v30  ;;  %3292 = vmatmul.f32.gmra.mxu2 %v7071_v59 }
 0x246   : > { %3717 = vmatpush.msra.mxu1 %v3716_v33 }
 0x247   : > { %v7193_v14 = vpop.f32.mrf.mxu1  ;;  %v2626_v53 = vpop.f32.mrf.mxu0 }
 0x248   : > { %8455 = vst [vmem:[#allocation68_spill] sm:$0xff] %v7193_v14  ;;  %v2507_v18 = vpop.f32.mrf.mxu2  ;;  %v2588_v37 = vpop.f32.mrf.mxu3  ;;  %v3722_v14 = vand.u32 4294901760, %v3721_v49  ;;  %v388_v49 = vld [vmem:[%s5640_s23 + $0xd0] sm:$0xff] }
 0x249   : > { %v7200_v34 = vadd.f32 %v2588_v37, %v2507_v18  ;;  %v7212_v18 = vand.u32 4294901760, %v394_v60  ;;  %v2627_v37 = vadd.f32 %v2626_v53, %v7131_v39  ;;  %v7228_v6 = vand.u32 4294901760, %v388_v49 }
 0x24a   : > { %3182 = vmatmul.f32.gmra.mxu0 %v7034_v56  ;;  %3723 = vmatpush.msra.mxu1 %v3722_v14 }
 0x24b   : > { %3227 = vmatmul.f32.gmra.mxu1 %v6984_v30  ;;  %v7216_v33 = vsub.f32 %v394_v60, %v7212_v18  ;;  %3644 = vmatpush.msra.mxu0 %v7212_v18 }
 0x24c   : > { %3861 = vmatpush.msra.mxu3 %v7212_v18 }
 0x24d   : > { %3385 = vmatmul.f32.gmra.mxu3 %v7034_v56  ;;  %3300 = vmatmul.f32.gmra.mxu2 %v7103_v21  ;;  %v8336_v39 = vand.u32 4294901760, %v7216_v33 }
 0x24e   : > { %3801 = vmatpush.msra.mxu2 %v7216_v33  ;;  %3646 = vmatpush.msra.mxu0 %v7228_v6 }
 0x24f   : > { %v2631_v57 = vpop.f32.mrf.mxu0  ;;  %v2682_v20 = vpop.f32.mrf.mxu1  ;;  %v3727_v60 = vsub.f32 %v7216_v33, %v8336_v39  ;;  %3863 = vmatpush.msra.mxu3 %v7228_v6 }
 0x250   : > { %v2683_v54 = vadd.f32 %v2682_v20, %v2627_v37  ;;  %v2757_v8 = vpop.f32.mrf.mxu2  ;;  %v2806_v4 = vpop.f32.mrf.mxu3  ;;  %v2632_v37 = vadd.f32 %v2631_v57, %v7141_v32 }
 0x251   : > { %v3728_v14 = vand.u32 4294901760, %v3727_v60 }
 0x252   : > { %v2758_v53 = vadd.f32 %v2757_v8, %v2683_v54  ;;  %3186 = vmatmul.f32.gmra.mxu0 %v7076_v47  ;;  %v7235_v54 = vsub.f32 %v388_v49, %v7228_v6  ;;  %v382_v8 = vld [vmem:[%s5640_s23 + $0xa0] sm:$0xff] }
 0x253   : > { %3231 = vmatmul.f32.gmra.mxu1 %v7034_v56  ;;  %v7241_v39 = vand.u32 4294901760, %v382_v8 }
 0x254   : > { %v7230_v20 = vadd.f32 %v2806_v4, %v2758_v53  ;;  %3729 = vmatpush.msra.mxu1 %v3728_v14  ;;  %3804 = vmatpush.msra.mxu2 %v7235_v54  ;;  %v8337_v53 = vand.u32 4294901760, %v7235_v54 }
 0x255   : > { %3389 = vmatmul.f32.gmra.mxu3 %v7076_v47  ;;  %3308 = vmatmul.f32.gmra.mxu2 %v7124_v63  ;;  %v7246_v7 = vsub.f32 %v382_v8, %v7241_v39 }
 0x256   : > { %8456 = vst [vmem:[#allocation69_spill] sm:$0xff] %v7230_v20  ;;  %3648 = vmatpush.msra.mxu0 %v7241_v39  ;;  %3865 = vmatpush.msra.mxu3 %v7241_v39  ;;  %v3733_v57 = vsub.f32 %v7235_v54, %v8337_v53 }
 0x257   : > { %v2636_v25 = vpop.f32.mrf.mxu0  ;;  %v2688_v4 = vpop.f32.mrf.mxu1  ;;  %3807 = vmatpush.msra.mxu2 %v7246_v7  ;;  %v8338_v8 = vand.u32 4294901760, %v7246_v7 }
 0x258   : > { %v2689_v60 = vadd.f32 %v2688_v4, %v2632_v37  ;;  %v2761_v20 = vpop.f32.mrf.mxu2  ;;  %v2810_v49 = vpop.f32.mrf.mxu3  ;;  %v3734_v14 = vand.u32 4294901760, %v3733_v57  ;;  %v376_v4 = vld [vmem:[%s5640_s23 + $0x70] sm:$0xff]  ;;  %v2637_v53 = vadd.f32 %v2636_v25, %v7151_v1 }
 0x25a   : > { %v2762_v32 = vadd.f32 %v2761_v20, %v2689_v60  ;;  %3427 = vmatmul.f32.vlgmr.msrb.gmra.mxu0 %v6896_v0  ;;  %3735 = vmatpush.msra.mxu1 %v3734_v14  ;;  %v3739_v20 = vsub.f32 %v7246_v7, %v8338_v8  ;;  %v7266_v60 = vand.u32 4294901760, %v376_v4  ;;  %v370_v14 = vld [vmem:[%s5640_s23 + $0x40] sm:$0xff] }
 0x25b   : > { %3235 = vmatmul.f32.gmra.mxu1 %v7076_v47 }
 0x25c   : > { %v7256_v37 = vadd.f32 %v2810_v49, %v2762_v32  ;;  %v3740_v40 = vand.u32 4294901760, %v3739_v20  ;;  %v7269_v46 = vsub.f32 %v376_v4, %v7266_v60  ;;  %3650 = vmatpush.msra.mxu0 %v7266_v60  ;;  %3867 = vmatpush.msra.mxu3 %v7266_v60  ;;  %v7285_v4 = vand.u32 4294901760, %v370_v14 }
 0x25d   : > { %3607 = vmatmul.f32.vlgmr.msrb.gmra.mxu3 %v6880_v23  ;;  %3558 = vmatmul.f32.vlgmr.msrb.gmra.mxu2 %v6880_v23 }
 0x25e   : > { %8457 = vst [vmem:[#allocation70_spill] sm:$0xff] %v7256_v37  ;;  %v8339_v1 = vand.u32 4294901760, %v7269_v46  ;;  %3741 = vmatpush.msra.mxu1 %v3740_v40  ;;  %3810 = vmatpush.msra.mxu2 %v7269_v46  ;;  %v7289_v8 = vsub.f32 %v370_v14, %v7285_v4 }
 0x25f   : > { %v2641_v57 = vpop.f32.mrf.mxu0  ;;  %v2694_v43 = vpop.f32.mrf.mxu1  ;;  %3652 = vmatpush.msra.mxu0 %v7285_v4  ;;  %3869 = vmatpush.msra.mxu3 %v7285_v4 }
 0x260   : > { %v2695_v49 = vadd.f32 %v2694_v43, %v2637_v53  ;;  %v2765_v32 = vpop.f32.mrf.mxu2  ;;  %v2814_v37 = vpop.f32.mrf.mxu3  ;;  %v3745_v53 = vsub.f32 %v7269_v46, %v8339_v1  ;;  %v2642_v20 = vadd.f32 %v2641_v57, %v7161_v5  ;;  %3813 = vmatpush.msra.mxu2 %v7289_v8  ;;  %v3750_v5 = vand.u32 4294901760, %v7289_v8 }
 0x262   : > { %v2766_v25 = vadd.f32 %v2765_v32, %v2695_v49  ;;  %3432 = vmatmul.f32.gmra.mxu0 %v6930_v61  ;;  %v3746_v49 = vand.u32 4294901760, %v3745_v53  ;;  %v3751_v14 = vsub.f32 %v7289_v8, %v3750_v5 }
 0x263   : > { %3483 = vmatmul.f32.vlgmr.msrb.gmra.mxu1 %v6913_v13 }
 0x264   : > { %v7277_v43 = vadd.f32 %v2814_v37, %v2766_v25  ;;  %v364_v37 = vld [vmem:[%s5640_s23 + $0x10] sm:$0xff]  ;;  %3747 = vmatpush.msra.mxu1 %v3746_v49 }
 0x265   : > { %3611 = vmatmul.f32.gmra.mxu3 %v6915_v55  ;;  %3562 = vmatmul.f32.gmra.mxu2 %v6915_v55  ;;  %v7294_v41 = vand.u32 4294901760, %v364_v37 }
 0x266   : > { %8458 = vst [vmem:[#allocation71_spill] sm:$0xff] %v7277_v43 }
 0x267   : > { %v2646_v32 = vpop.f32.mrf.mxu0  ;;  %v2700_v40 = vpop.f32.mrf.mxu1  ;;  %v3755_v53 = vsub.f32 %v364_v37, %v7294_v41  ;;  %3654 = vmatpush.msra.mxu0 %v7294_v41  ;;  %3871 = vmatpush.msra.mxu3 %v7294_v41 }
 0x268   : > { %v2701_v25 = vadd.f32 %v2700_v40, %v2642_v20  ;;  %v2769_v1 = vpop.f32.mrf.mxu2  ;;  %v2818_v43 = vpop.f32.mrf.mxu3  ;;  %v407_v40 = vld [vmem:[%s5640_s23 + $0x168] sm:$0xff]  ;;  %v2647_v37 = vadd.f32 %v2646_v32, %v7179_v17  ;;  %v8462_v17 = vand.u32 4294901760, %v7216_v33 }
 0x269   : > { %3816 = vmatpush.msra.mxu2 %v3755_v53  ;;  %v3756_v49 = vand.u32 4294901760, %v3755_v53  ;;  %v7312_v28 = vand.u32 4294901760, %v407_v40 }
 0x26a   : > { %v2770_v57 = vadd.f32 %v2769_v1, %v2701_v25  ;;  %3437 = vmatmul.f32.gmra.mxu0 %v6962_v9  ;;  %v3752_v1 = vand.u32 4294901760, %v3751_v14  ;;  %v8460_v25 = vand.u32 4294901760, %v7175_v51 }
 0x26b   : > { %3489 = vmatmul.f32.gmra.mxu1 %v6953_v35  ;;  %v3757_v8 = vsub.f32 %v3755_v53, %v3756_v49  ;;  %4032 = vmatpush.msrb.mxu2 %v7312_v28  ;;  %v7318_v51 = vsub.f32 %v407_v40, %v7312_v28 }
 0x26c   : > { %v7304_v20 = vadd.f32 %v2818_v43, %v2770_v57  ;;  %3920 = vmatpush.msrb.mxu0 %v8460_v25  ;;  %3753 = vmatpush.msra.mxu1 %v3752_v1  ;;  %v8461_v43 = vand.u32 4294901760, %v7196_v31  ;;  %v8465_v1 = vand.u32 4294901760, %v7246_v7 }
 0x26d   : > { %3615 = vmatmul.f32.gmra.mxu3 %v6944_v11  ;;  %3566 = vmatmul.f32.gmra.mxu2 %v6944_v11  ;;  %v3758_v14 = vand.u32 4294901760, %v3757_v8  ;;  %v8344_v31 = vand.u32 4294901760, %v7318_v51  ;;  %v8466_v8 = vand.u32 4294901760, %v7269_v46 }
 0x26e   : > { %8459 = vst [vmem:[#allocation72_spill] sm:$0xff] %v7304_v20  ;;  %3924 = vmatpush.msrb.mxu0 %v8461_v43 }
 0x26f   : > { %v2651_v15 = vpop.f32.mrf.mxu0  ;;  %v2706_v45 = vpop.f32.mrf.mxu1  ;;  %3759 = vmatpush.msra.mxu1 %v3758_v14  ;;  %v4107_v33 = vsub.f32 %v7318_v51, %v8344_v31 }
 0x270   : > { %v2707_v57 = vadd.f32 %v2706_v45, %v2647_v37  ;;  %v2773_v20 = vpop.f32.mrf.mxu2  ;;  %v2822_v12 = vpop.f32.mrf.mxu3  ;;  %3928 = vmatpush.msrb.mxu0 %v8462_v17  ;;  %v8463_v45 = vand.u32 4294901760, %v7235_v54  ;;  %v2652_v40 = vadd.f32 %v2651_v15, %v7200_v34 }
 0x271   : > { %3983 = vmatpush.msrb.mxu1 %v7168_v3  ;;  %v4108_v54 = vand.u32 4294901760, %v4107_v33  ;;  %v389_v33 = vld [vmem:[%s5640_s23 + $0xd8] sm:$0xff] }
 0x272   : > { %v2774_v32 = vadd.f32 %v2773_v20, %v2707_v57  ;;  %3442 = vmatmul.f32.gmra.mxu0 %v7004_v48  ;;  %v401_v20 = vld [vmem:[%s5640_s23 + $0x138] sm:$0xff] }
 0x273   : > { %3495 = vmatmul.f32.gmra.mxu1 %v6982_v29  ;;  %3932 = vmatpush.msrb.mxu0 %v8463_v45  ;;  %v7339_v25 = vand.u32 4294901760, %v401_v20 }
 0x274   : > { %v7327_v53 = vadd.f32 %v2822_v12, %v2774_v32  ;;  %3985 = vmatpush.msrb.mxu1 %v7191_v36  ;;  %4109 = vmatpush.msrb.mxu3 %v4108_v54 }
 0x275   : > { %3619 = vmatmul.f32.gmra.mxu3 %v6984_v30  ;;  %3570 = vmatmul.f32.gmra.mxu2 %v6984_v30  ;;  %v7348_v15 = vsub.f32 %v401_v20, %v7339_v25 }
 0x276   : > { %8464 = vst [vmem:[#allocation73_spill] sm:$0xff] %v7327_v53  ;;  %3936 = vmatpush.msrb.mxu0 %v8465_v1  ;;  %4034 = vmatpush.msrb.mxu2 %v7339_v25 }
 0x277   : > { %v2712_v12 = vpop.f32.mrf.mxu1  ;;  %v7342_v37 = vpop.f32.mrf.mxu0  ;;  %3987 = vmatpush.msrb.mxu1 %v7212_v18  ;;  %v8343_v46 = vand.u32 4294901760, %v7348_v15  ;;  %v395_v18 = vld [vmem:[%s5640_s23 + $0x108] sm:$0xff] }
 0x278   : > { %3940 = vmatpush.msrb.mxu0 %v8466_v8  ;;  %v2713_v3 = vadd.f32 %v2712_v12, %v2652_v40  ;;  %v2777_v43 = vpop.f32.mrf.mxu2  ;;  %v2826_v57 = vpop.f32.mrf.mxu3  ;;  %v383_v40 = vld [vmem:[%s5640_s23 + $0xa8] sm:$0xff] }
 0x279   : > { %3989 = vmatpush.msrb.mxu1 %v7228_v6  ;;  %v4113_v36 = vsub.f32 %v7348_v15, %v8343_v46  ;;  %v7397_v54 = vand.u32 4294901760, %v383_v40 }
 0x27a   : > { %3944 = vmatpush.msrb.mxu0 %v3750_v5  ;;  %v2778_v7 = vadd.f32 %v2777_v43, %v2713_v3  ;;  %v7363_v5 = vand.u32 4294901760, %v395_v18 }
 0x27b   : > { %3447 = vmatmul.f32.gmra.mxu0 %v7059_v24  ;;  %3501 = vmatmul.f32.gmra.mxu1 %v7031_v27  ;;  %v4114_v14 = vand.u32 4294901760, %v4113_v36 }
 0x27c   : > { %3948 = vmatpush.msrb.mxu0 %v3756_v49  ;;  %v7355_v34 = vadd.f32 %v2826_v57, %v2778_v7  ;;  %3991 = vmatpush.msrb.mxu1 %v7241_v39  ;;  %v7372_v49 = vsub.f32 %v395_v18, %v7363_v5  ;;  %v7415_v7 = vsub.f32 %v383_v40, %v7397_v54 }
 0x27d   : > { %3623 = vmatmul.f32.gmra.mxu3 %v7034_v56  ;;  %3574 = vmatmul.f32.gmra.mxu2 %v7034_v56 }
 0x27e   : > { %8467 = vst [vmem:[#allocation74_spill] sm:$0xff] %v7355_v34  ;;  %4036 = vmatpush.msrb.mxu2 %v7363_v5  ;;  %3993 = vmatpush.msrb.mxu1 %v7266_v60  ;;  %v8341_v39 = vand.u32 4294901760, %v7372_v49  ;;  %v7387_v60 = vand.u32 4294901760, %v389_v33  ;;  %v8342_v18 = vand.u32 4294901760, %v7415_v7  ;;  %v365_v34 = vld [vmem:[%s5640_s23 + $0x18] sm:$0xff] }
 0x27f   : > { %v7366_v17 = vpop.f32.mrf.mxu0  ;;  %v7368_v6 = vpop.f32.mrf.mxu1  ;;  %4115 = vmatpush.msrb.mxu3 %v4114_v14  ;;  %v377_v14 = vld [vmem:[%s5640_s23 + $0x78] sm:$0xff]  ;;  %v7453_v53 = vand.u32 4294901760, %v365_v34 }
 0x280   : > { %v7375_v32 = vpop.f32.mrf.mxu2  ;;  %v7377_v45 = vpop.f32.mrf.mxu3  ;;  %3995 = vmatpush.msrb.mxu1 %v7285_v4  ;;  %v4119_v20 = vsub.f32 %v7372_v49, %v8341_v39  ;;  %v7393_v4 = vsub.f32 %v389_v33, %v7387_v60  ;;  %4038 = vmatpush.msrb.mxu2 %v7387_v60  ;;  %v4131_v33 = vsub.f32 %v7415_v7, %v8342_v18  ;;  %v371_v18 = vld [vmem:[%s5640_s23 + $0x48] sm:$0xff] }
 0x281   : > { %v7445_v31 = vand.u32 4294901760, %v371_v18 }
 0x282   : > { %3997 = vmatpush.msrb.mxu1 %v7294_v41  ;;  %v4120_v1 = vand.u32 4294901760, %v4119_v20  ;;  %v8340_v41 = vand.u32 4294901760, %v7393_v4  ;;  %4040 = vmatpush.msrb.mxu2 %v7397_v54  ;;  %v7425_v20 = vand.u32 4294901760, %v377_v14  ;;  %v4132_v39 = vand.u32 4294901760, %v4131_v33 }
 0x283   : > { %3452 = vmatmul.f32.gmra.mxu0 %v7092_v42  ;;  %3507 = vmatmul.f32.gmra.mxu1 %v7074_v22  ;;  %v4141_v33 = vsub.f32 %v371_v18, %v7445_v31  ;;  %v8470_v18 = vand.u32 4294901760, %v7318_v51 }
 0x284   : > { %4121 = vmatpush.msrb.mxu3 %v4120_v1  ;;  %v4125_v57 = vsub.f32 %v7393_v4, %v8340_v41  ;;  %4042 = vmatpush.msrb.mxu2 %v7425_v20 }
 0x285   : > { %3627 = vmatmul.f32.gmra.mxu3 %v7076_v47  ;;  %3578 = vmatmul.f32.gmra.mxu2 %v7076_v47 }
 0x286   : > { %v4126_v36 = vand.u32 4294901760, %v4125_v57  ;;  %4044 = vmatpush.msrb.mxu2 %v7445_v31 }
 0x287   : > { %v7399_v12 = vpop.f32.mrf.mxu0 }
 0x288   : > { %v7401_v8 = vpop.f32.mrf.mxu1  ;;  %v7404_v3 = vpop.f32.mrf.mxu2  ;;  %4127 = vmatpush.msrb.mxu3 %v4126_v36  ;;  %v7438_v36 = vsub.f32 %v377_v14, %v7425_v20  ;;  %4046 = vmatpush.msrb.mxu2 %v7453_v53 }
 0x289   : > { %v7406_v43 = vpop.f32.mrf.mxu3 }
 0x28a   : > { %v4136_v46 = vand.u32 4294901760, %v7438_v36  ;;  %4133 = vmatpush.msrb.mxu3 %v4132_v39  ;;  %v4147_v39 = vsub.f32 %v365_v34, %v7453_v53  ;;  %v8471_v34 = vand.u32 4294901760, %v7348_v15 }
 0x28b   : > { %3513 = vmatmul.f32.gmra.mxu1 %v7106_v58  ;;  %3660 = vmatmul.f32.vlgmr.msra.gmra.mxu0 %v6950_v2 }
 0x28c   : > { %4187 = vmatpush.msra.mxu0 %v7318_v51  ;;  %v4137_v14 = vsub.f32 %v7438_v36, %v4136_v46 }
 0x28d   : > { %3875 = vmatmul.f32.vlgmr.msra.gmra.mxu3 %v6913_v13  ;;  %3819 = vmatmul.f32.vlgmr.msra.gmra.mxu2 %v6896_v0  ;;  %v4142_v0 = vand.u32 4294901760, %v4141_v33 }
 0x28e   : > { %4190 = vmatpush.msra.mxu0 %v7348_v15  ;;  %v4138_v13 = vand.u32 4294901760, %v4137_v14  ;;  %4312 = vmatpush.msra.mxu2 %v8470_v18  ;;  %v798_v15 = vadd.f32 %v6289_v38, %v6196_v44  ;;  %v8474_v44 = vand.u32 4294901760, %v7415_v7 }
 0x28f   : > { %v7428_v1 = vpop.f32.mrf.mxu0  ;;  %v4143_v14 = vsub.f32 %v4141_v33, %v4142_v0 }
 0x290   : > { %v7430_v40 = vpop.f32.mrf.mxu1  ;;  %v7432_v57 = vpop.f32.mrf.mxu2  ;;  %4193 = vmatpush.msra.mxu0 %v7372_v49  ;;  %4139 = vmatpush.msrb.mxu3 %v4138_v13 }
 0x291   : > { %v7434_v41 = vpop.f32.mrf.mxu3  ;;  %4316 = vmatpush.msra.mxu2 %v8471_v34  ;;  %v4144_v51 = vand.u32 4294901760, %v4143_v14  ;;  %v8473_v34 = vand.u32 4294901760, %v7393_v4  ;;  %v847_v14 = vadd.f32 %v6303_v52, %v798_v15 }
 0x292   : > { %8468 = vst [vmem:[#allocation75_spill] sm:$0xff] %v7434_v41  ;;  %4196 = vmatpush.msra.mxu0 %v7393_v4  ;;  %v4148_v41 = vand.u32 4294901760, %v4147_v39 }
 0x293   : > { %3668 = vmatmul.f32.gmra.mxu0 %v6987_v19  ;;  %3761 = vmatmul.f32.vlgmr.msra.gmra.mxu1 %v6880_v23  ;;  %v2878_v38 = vadd.f32 %v7342_v37, %v847_v14 }
 0x294   : > { %4249 = vmatpush.msra.mxu1 %v7312_v28  ;;  %4199 = vmatpush.msra.mxu0 %v7415_v7  ;;  %v4149_v18 = vsub.f32 %v4147_v39, %v4148_v41 }
 0x295   : > { %3881 = vmatmul.f32.gmra.mxu3 %v6953_v35  ;;  %3824 = vmatmul.f32.gmra.mxu2 %v6930_v61  ;;  %v2979_v52 = vadd.f32 %v7368_v6, %v2878_v38  ;;  %v8479_v38 = vld [vmem:[#allocation10_spill] sm:$0xff] }
 0x296   : > { %4251 = vmatpush.msra.mxu1 %v7339_v25  ;;  %v4150_v13 = vand.u32 4294901760, %v4149_v18  ;;  %4202 = vmatpush.msra.mxu0 %v7438_v36 }
 0x297   : > { %v7460_v35 = vpop.f32.mrf.mxu0  ;;  %4145 = vmatpush.msrb.mxu3 %v4144_v51 }
 0x298   : > { %8469 = vst [vmem:[#allocation76_spill] sm:$0xff] %v7460_v35  ;;  %v7462_v19 = vpop.f32.mrf.mxu1  ;;  %4253 = vmatpush.msra.mxu1 %v7363_v5  ;;  %v7467_v61 = vpop.f32.mrf.mxu2  ;;  %v8472_v35 = vand.u32 4294901760, %v7372_v49  ;;  %4205 = vmatpush.msra.mxu0 %v4141_v33 }
 0x299   : > { %v7469_v2 = vpop.f32.mrf.mxu3  ;;  %4151 = vmatpush.msrb.mxu3 %v4150_v13  ;;  %v8478_v13 = vld [vmem:[#allocation7_spill] sm:$0xff] }
 0x29a   : > { %4255 = vmatpush.msra.mxu1 %v7387_v60  ;;  %4320 = vmatpush.msra.mxu2 %v8472_v35 }
 0x29b   : > { %3676 = vmatmul.f32.gmra.mxu0 %v7028_v62  ;;  %3765 = vmatmul.f32.gmra.mxu1 %v6915_v55 }
 0x29c   : > { %4257 = vmatpush.msra.mxu1 %v7397_v54  ;;  %4324 = vmatpush.msra.mxu2 %v8473_v34 }
 0x29d   : > { %3887 = vmatmul.f32.gmra.mxu3 %v6982_v29  ;;  %3829 = vmatmul.f32.gmra.mxu2 %v6962_v9 }
 0x29e   : > { %4259 = vmatpush.msra.mxu1 %v7425_v20  ;;  %4375 = vmatpush.msra.mxu3 %v7312_v28  ;;  %v802_v28 = vadd.f32 %v6301_v16, %v6218_v50 }
 0x29f   : > { %v7488_v49 = vpop.f32.mrf.mxu0  ;;  %4328 = vmatpush.msra.mxu2 %v8474_v44  ;;  %4208 = vmatpush.msra.mxu0 %v4147_v39 }
 0x2a0   : > { %v7490_v35 = vpop.f32.mrf.mxu1  ;;  %v7493_v36 = vpop.f32.mrf.mxu2  ;;  %4261 = vmatpush.msra.mxu1 %v7445_v31  ;;  %4377 = vmatpush.msra.mxu3 %v7339_v25  ;;  %v851_v25 = vadd.f32 %v6314_v10, %v802_v28  ;;  %v8475_v10 = vld [vmem:[#allocation6_spill] sm:$0xff] }
 0x2a1   : > { %v7495_v18 = vpop.f32.mrf.mxu3  ;;  %4332 = vmatpush.msra.mxu2 %v4136_v46  ;;  %v3037_v46 = vadd.f32 %v7375_v32, %v2979_v52 }
 0x2a2   : > { %4263 = vmatpush.msra.mxu1 %v7453_v53  ;;  %4379 = vmatpush.msra.mxu3 %v7363_v5  ;;  %v2886_v5 = vadd.f32 %v7366_v17, %v851_v25 }
 0x2a3   : > { %3684 = vmatmul.f32.gmra.mxu0 %v7071_v59  ;;  %3769 = vmatmul.f32.gmra.mxu1 %v6944_v11  ;;  %v3093_v50 = vadd.f32 %v7377_v45, %v3037_v46 }
 0x2a4   : > { %4336 = vmatpush.msra.mxu2 %v4142_v0  ;;  %4381 = vmatpush.msra.mxu3 %v7387_v60  ;;  %v2983_v16 = vadd.f32 %v7401_v8, %v2886_v5  ;;  %v806_v0 = vadd.f32 %v8475_v10, %v6243_v26  ;;  %v326_v60 = vld [vmem:[#allocation2] sm:$0xff]  ;;  %v8482_v10 = vld [vmem:[#allocation4_spill] sm:$0xff] }
 0x2a5   : > { %3893 = vmatmul.f32.gmra.mxu3 %v7031_v27  ;;  %3834 = vmatmul.f32.gmra.mxu2 %v7004_v48  ;;  %v8480_v5 = vld [vmem:[#allocation75_spill] sm:$0xff] }
 0x2a6   : > { %4340 = vmatpush.msra.mxu2 %v4148_v41  ;;  %4383 = vmatpush.msra.mxu3 %v7397_v54  ;;  %v8476_v41 = vld [vmem:[#allocation8_spill] sm:$0xff]  ;;  %v3042_v45 = vadd.f32 %v7404_v3, %v2983_v16  ;;  %v8477_v3 = vld [vmem:[#allocation3_spill] sm:$0xff] }
 0x2a7   : > { %v3167_v4 = vpop.f32.mrf.mxu0  ;;  %v810_v15 = vadd.f32 %v8478_v13, %v8477_v3 }
 0x2a8   : > { %v7512_v37 = vpop.f32.mrf.mxu1  ;;  %v7517_v6 = vpop.f32.mrf.mxu2  ;;  %4385 = vmatpush.msra.mxu3 %v7425_v20  ;;  %v3168_v17 = vadd.f32 %v3167_v4, %v3093_v50  ;;  %v855_v20 = vadd.f32 %v8476_v41, %v806_v0  ;;  %v3099_v26 = vadd.f32 %v7406_v43, %v3042_v45  ;;  %v8483_v0 = vld [vmem:[#allocation9_spill] sm:$0xff]  ;;  %v8484_v41 = vld [vmem:[#allocation12_spill] sm:$0xff] }
 0x2a9   : > { %v7519_v7 = vpop.f32.mrf.mxu3  ;;  %v859_v52 = vadd.f32 %v8479_v38, %v810_v15  ;;  %v8487_v15 = vld [vmem:[#allocation5_spill] sm:$0xff] }
 0x2aa   : > { %4387 = vmatpush.msra.mxu3 %v7445_v31  ;;  %v2894_v31 = vadd.f32 %v7399_v12, %v855_v20  ;;  %v332_v12 = vld [vmem:[#allocation2 + $0x30] sm:$0xff] }
 0x2ab   : > { %3692 = vmatmul.f32.gmra.mxu0 %v7103_v21  ;;  %3773 = vmatmul.f32.gmra.mxu1 %v6984_v30  ;;  %v2902_v25 = vadd.f32 %v7428_v1, %v859_v52  ;;  %v338_v1 = vld [vmem:[#allocation2 + $0x60] sm:$0xff]  ;;  %v344_v38 = vld [vmem:[#allocation2 + $0x90] sm:$0xff] }
 0x2ac   : > { %4389 = vmatpush.msra.mxu3 %v7453_v53  ;;  %v2987_v53 = vadd.f32 %v7430_v40, %v2894_v31 }
 0x2ad   : > { %3899 = vmatmul.f32.gmra.mxu3 %v7074_v22  ;;  %3839 = vmatmul.f32.gmra.mxu2 %v7059_v24  ;;  %v2991_v16 = vadd.f32 %v7462_v19, %v2902_v25 }
 0x2ae   : > { %v3047_v28 = vadd.f32 %v7432_v57, %v2987_v53  ;;  %v8481_v57 = vld [vmem:[#allocation48_spill] sm:$0xff] }
 0x2af   : > { %v3171_v32 = vpop.f32.mrf.mxu0  ;;  %v3052_v45 = vadd.f32 %v7467_v61, %v2991_v16  ;;  %v8486_v61 = vld [vmem:[#allocation52_spill] sm:$0xff] }
 0x2b0   : > { %v3216_v54 = vpop.f32.mrf.mxu1  ;;  %v7536_v33 = vpop.f32.mrf.mxu2  ;;  %v3172_v34 = vadd.f32 %v3171_v32, %v3099_v26  ;;  %v3105_v50 = vadd.f32 %v8480_v5, %v3047_v28  ;;  %v8489_v28 = vld [vmem:[#allocation13_spill] sm:$0xff] }
 0x2b1   : > { %v3217_v8 = vadd.f32 %v3216_v54, %v3168_v17  ;;  %v7538_v39 = vpop.f32.mrf.mxu3  ;;  %v814_v17 = vadd.f32 %v8483_v0, %v8482_v10  ;;  %v3111_v3 = vadd.f32 %v7469_v2, %v3052_v45 }
 0x2b3   : > { %v5199_v51 = vadd.f32 %v3217_v8, %v326_v60  ;;  %3700 = vmatmul.f32.gmra.mxu0 %v7124_v63  ;;  %3777 = vmatmul.f32.gmra.mxu1 %v7034_v56  ;;  %v863_v20 = vadd.f32 %v8484_v41, %v814_v17  ;;  %v350_v17 = vld [vmem:[#allocation2 + $0xc0] sm:$0xff]  ;;  %v408_v41 = vld [vmem:[%s5640_s23 + $0x170] sm:$0xff] }
 0x2b5   : > { %5235 = vst [vmem:[#allocation2] sm:$0xff] %v5199_v51  ;;  %3905 = vmatmul.f32.gmra.mxu3 %v7106_v58  ;;  %3844 = vmatmul.f32.gmra.mxu2 %v7092_v42  ;;  %v8485_v51 = vld [vmem:[#allocation76_spill] sm:$0xff] }
 0x2b6   : > { %v2910_v26 = vadd.f32 %v8485_v51, %v863_v20 }
 0x2b7   : > { %v3175_v14 = vpop.f32.mrf.mxu0 }
 0x2b8   : > { %v3220_v44 = vpop.f32.mrf.mxu1  ;;  %v7551_v43 = vpop.f32.mrf.mxu2  ;;  %v3176_v32 = vadd.f32 %v3175_v14, %v3105_v50  ;;  %v2995_v13 = vadd.f32 %v7490_v35, %v2910_v26 }
 0x2b9   : > { %v3221_v4 = vadd.f32 %v3220_v44, %v3172_v34  ;;  %v7553_v40 = vpop.f32.mrf.mxu3  ;;  %v8488_v34 = vld [vmem:[#allocation11_spill] sm:$0xff] }
 0x2ba   : > { %v818_v14 = vadd.f32 %v8488_v34, %v8487_v15  ;;  %v3057_v25 = vadd.f32 %v7493_v36, %v2995_v13 }
 0x2bb   : > { %v5205_v46 = vadd.f32 %v3221_v4, %v332_v12  ;;  %3781 = vmatmul.f32.gmra.mxu1 %v7076_v47  ;;  %3950 = vmatmul.f32.vlgmr.msrb.gmra.mxu0 %v6880_v23 }
 0x2bc   : > { %v867_v4 = vadd.f32 %v8489_v28, %v818_v14  ;;  %v3117_v16 = vadd.f32 %v7495_v18, %v3057_v25  ;;  %v7598_v18 = vand.u32 4294901760, %v408_v41  ;;  %v402_v14 = vld [vmem:[%s5640_s23 + $0x140] sm:$0xff] }
 0x2bd   : > { %5242 = vst [vmem:[#allocation2 + $0x30] sm:$0xff] %v5205_v46  ;;  %4153 = vmatmul.f32.vlgmr.msrb.gmra.mxu3 %v6880_v23  ;;  %4052 = vmatmul.f32.vlgmr.msrb.gmra.mxu2 %v8481_v57 }
 0x2be   : > { %v2918_v5 = vadd.f32 %v7488_v49, %v867_v4  ;;  %v7603_v20 = vsub.f32 %v408_v41, %v7598_v18  ;;  %4424 = vmatpush.msrb.mxu0 %v7598_v18  ;;  %4641 = vmatpush.msrb.mxu3 %v7598_v18  ;;  %v390_v41 = vld [vmem:[%s5640_s23 + $0xe0] sm:$0xff] }
 0x2bf   : > { %v3179_v60 = vpop.f32.mrf.mxu0 }
 0x2c0   : > { %v3224_v54 = vpop.f32.mrf.mxu1  ;;  %v7566_v31 = vpop.f32.mrf.mxu2  ;;  %v3180_v12 = vadd.f32 %v3179_v60, %v3111_v3  ;;  %v2999_v10 = vadd.f32 %v7512_v37, %v2918_v5  ;;  %4579 = vmatpush.msrb.mxu2 %v7603_v20 }
 0x2c1   : > { %v3225_v8 = vadd.f32 %v3224_v54, %v3176_v32  ;;  %v7568_v19 = vpop.f32.mrf.mxu3 }
 0x2c2   : > { %v3062_v49 = vadd.f32 %v7517_v6, %v2999_v10 }
 0x2c3   : > { %v5211_v53 = vadd.f32 %v3225_v8, %v338_v1  ;;  %3954 = vmatmul.f32.gmra.mxu0 %v6915_v55  ;;  %3999 = vmatmul.f32.vlgmr.msrb.gmra.mxu1 %v6880_v23  ;;  %v356_v8 = vld [vmem:[#allocation2 + $0xf0] sm:$0xff] }
 0x2c4   : > { %v3123_v6 = vadd.f32 %v7519_v7, %v3062_v49  ;;  %v4498_v7 = vand.u32 4294901760, %v7603_v20 }
 0x2c5   : > { %5248 = vst [vmem:[#allocation2 + $0x60] sm:$0xff] %v5211_v53  ;;  %4157 = vmatmul.f32.gmra.mxu3 %v6915_v55  ;;  %4060 = vmatmul.f32.gmra.mxu2 %v8486_v61  ;;  %v8490_v53 = vld [vmem:[#allocation14_spill] sm:$0xff] }
 0x2c6   : > { %v3270_v3 = vadd.f32 %v7536_v33, %v8490_v53 }
 0x2c7   : > { %v3183_v44 = vpop.f32.mrf.mxu0 }
 0x2c8   : > { %v3228_v52 = vpop.f32.mrf.mxu1  ;;  %v7581_v2 = vpop.f32.mrf.mxu2  ;;  %v3184_v36 = vadd.f32 %v3183_v44, %v3117_v16 }
 0x2c9   : > { %v3229_v46 = vadd.f32 %v3228_v52, %v3180_v12  ;;  %v7583_v35 = vpop.f32.mrf.mxu3  ;;  %v7619_v12 = vand.u32 4294901760, %v402_v14  ;;  %v3371_v52 = vadd.f32 %v7538_v39, %v3270_v3 }
 0x2cb   : > { %v5217_v50 = vadd.f32 %v3229_v46, %v344_v38  ;;  %3958 = vmatmul.f32.gmra.mxu0 %v6944_v11  ;;  %4003 = vmatmul.f32.gmra.mxu1 %v6915_v55  ;;  %v4499_v38 = vsub.f32 %v7603_v20, %v4498_v7  ;;  %v7627_v33 = vsub.f32 %v402_v14, %v7619_v12 }
 0x2cc   : > { %4426 = vmatpush.msrb.mxu0 %v7619_v12  ;;  %4643 = vmatpush.msrb.mxu3 %v7619_v12 }
 0x2cd   : > { %5254 = vst [vmem:[#allocation2 + $0x90] sm:$0xff] %v5217_v50  ;;  %4161 = vmatmul.f32.gmra.mxu3 %v6944_v11  ;;  %4068 = vmatmul.f32.gmra.mxu2 %v7028_v62  ;;  %v4500_v28 = vand.u32 4294901760, %v4499_v38  ;;  %v4504_v4 = vand.u32 4294901760, %v7627_v33  ;;  %v8491_v50 = vld [vmem:[#allocation15_spill] sm:$0xff] }
 0x2ce   : > { %4582 = vmatpush.msrb.mxu2 %v7627_v33  ;;  %v3278_v16 = vadd.f32 %v7551_v43, %v8491_v50  ;;  %v7651_v43 = vand.u32 4294901760, %v390_v41 }
 0x2cf   : > { %v3187_v0 = vpop.f32.mrf.mxu0  ;;  %4501 = vmatpush.msrb.mxu1 %v4500_v28  ;;  %v4505_v39 = vsub.f32 %v7627_v33, %v4504_v4 }
 0x2d0   : > { %v3232_v32 = vpop.f32.mrf.mxu1  ;;  %v7593_v1 = vpop.f32.mrf.mxu2  ;;  %v3188_v45 = vadd.f32 %v3187_v0, %v3123_v6 }
 0x2d1   : > { %v3233_v60 = vadd.f32 %v3232_v32, %v3184_v36  ;;  %v7595_v54 = vpop.f32.mrf.mxu3  ;;  %v4506_v32 = vand.u32 4294901760, %v4505_v39 }
 0x2d3   : > { %v5223_v37 = vadd.f32 %v3233_v60, %v350_v17  ;;  %3962 = vmatmul.f32.gmra.mxu0 %v6984_v30  ;;  %4007 = vmatmul.f32.gmra.mxu1 %v6944_v11  ;;  %v396_v17 = vld [vmem:[%s5640_s23 + $0x110] sm:$0xff] }
 0x2d4   : > { %v7642_v49 = vand.u32 4294901760, %v396_v17  ;;  %4507 = vmatpush.msrb.mxu1 %v4506_v32 }
 0x2d5   : > { %5260 = vst [vmem:[#allocation2 + $0xc0] sm:$0xff] %v5223_v37  ;;  %4165 = vmatmul.f32.gmra.mxu3 %v6984_v30  ;;  %4076 = vmatmul.f32.gmra.mxu2 %v7071_v59  ;;  %v327_v37 = vld [vmem:[#allocation2 + $0x8] sm:$0xff] }
 0x2d6   : > { %v7648_v6 = vsub.f32 %v396_v17, %v7642_v49  ;;  %4428 = vmatpush.msrb.mxu0 %v7642_v49  ;;  %4645 = vmatpush.msrb.mxu3 %v7642_v49 }
 0x2d7   : > { %v3428_v26 = vpop.f32.mrf.mxu0 }
 0x2d8   : > { %v3236_v51 = vpop.f32.mrf.mxu1  ;;  %v7613_v15 = vpop.f32.mrf.mxu2  ;;  %v3429_v25 = vadd.f32 %v3428_v26, %v3371_v52  ;;  %v7659_v26 = vsub.f32 %v390_v41, %v7651_v43  ;;  %4585 = vmatpush.msrb.mxu2 %v7648_v6  ;;  %4430 = vmatpush.msrb.mxu0 %v7651_v43 }
 0x2d9   : > { %v3237_v13 = vadd.f32 %v3236_v51, %v3188_v45  ;;  %v7615_v34 = vpop.f32.mrf.mxu3  ;;  %v3375_v45 = vadd.f32 %v7553_v40, %v3278_v16  ;;  %v4510_v51 = vand.u32 4294901760, %v7648_v6  ;;  %4647 = vmatpush.msrb.mxu3 %v7651_v43 }
 0x2da   : > { %4588 = vmatpush.msrb.mxu2 %v7659_v26 }
 0x2db   : > { %v5229_v44 = vadd.f32 %v3237_v13, %v356_v8  ;;  %3966 = vmatmul.f32.gmra.mxu0 %v7034_v56  ;;  %4011 = vmatmul.f32.gmra.mxu1 %v6984_v30  ;;  %v4511_v14 = vsub.f32 %v7648_v6, %v4510_v51 }
 0x2dd   : > { %5266 = vst [vmem:[#allocation2 + $0xf0] sm:$0xff] %v5229_v44  ;;  %4169 = vmatmul.f32.gmra.mxu3 %v7034_v56  ;;  %4084 = vmatmul.f32.gmra.mxu2 %v7103_v21  ;;  %v8492_v44 = vld [vmem:[#allocation16_spill] sm:$0xff]  ;;  %v4512_v39 = vand.u32 4294901760, %v4511_v14 }
 0x2de   : > { %v3286_v38 = vadd.f32 %v7566_v31, %v8492_v44 }
 0x2df   : > { %v3433_v46 = vpop.f32.mrf.mxu0  ;;  %4513 = vmatpush.msrb.mxu1 %v4512_v39 }
 0x2e0   : > { %v3484_v5 = vpop.f32.mrf.mxu1  ;;  %v3559_v36 = vpop.f32.mrf.mxu2  ;;  %v3434_v53 = vadd.f32 %v3433_v46, %v3375_v45  ;;  %v4516_v46 = vand.u32 4294901760, %v7659_v26  ;;  %v3379_v17 = vadd.f32 %v7568_v19, %v3286_v38  ;;  %v378_v38 = vld [vmem:[%s5640_s23 + $0x80] sm:$0xff] }
 0x2e1   : > { %v3485_v10 = vadd.f32 %v3484_v5, %v3429_v25  ;;  %v3608_v0 = vpop.f32.mrf.mxu3  ;;  %v384_v5 = vld [vmem:[%s5640_s23 + $0xb0] sm:$0xff] }
 0x2e2   : > { %v7672_v50 = vand.u32 4294901760, %v384_v5  ;;  %v4517_v31 = vsub.f32 %v7659_v26, %v4516_v46 }
 0x2e3   : > { %v3560_v60 = vadd.f32 %v3559_v36, %v3485_v10  ;;  %3970 = vmatmul.f32.gmra.mxu0 %v7076_v47  ;;  %4015 = vmatmul.f32.gmra.mxu1 %v7034_v56  ;;  %v8493_v10 = vld [vmem:[#allocation43_spill] sm:$0xff]  ;;  %v333_v36 = vld [vmem:[#allocation2 + $0x38] sm:$0xff] }
 0x2e4   : > { %4432 = vmatpush.msrb.mxu0 %v7672_v50  ;;  %4649 = vmatpush.msrb.mxu3 %v7672_v50 }
 0x2e5   : > { %v3609_v8 = vadd.f32 %v3608_v0, %v3560_v60  ;;  %4173 = vmatmul.f32.gmra.mxu3 %v7076_v47  ;;  %4092 = vmatmul.f32.gmra.mxu2 %v7124_v63  ;;  %v7680_v0 = vsub.f32 %v384_v5, %v7672_v50  ;;  %v4518_v60 = vand.u32 4294901760, %v4517_v31 }
 0x2e7   : > { %v5200_v3 = vadd.f32 %v3609_v8, %v327_v37  ;;  %v3438_v40 = vpop.f32.mrf.mxu0  ;;  %4519 = vmatpush.msrb.mxu1 %v4518_v60  ;;  %4591 = vmatpush.msrb.mxu2 %v7680_v0  ;;  %v4522_v44 = vand.u32 4294901760, %v7680_v0 }
 0x2e8   : > { %v3490_v13 = vpop.f32.mrf.mxu1  ;;  %v3563_v28 = vpop.f32.mrf.mxu2  ;;  %v3439_v41 = vadd.f32 %v3438_v40, %v3379_v17  ;;  %v372_v17 = vld [vmem:[%s5640_s23 + $0x50] sm:$0xff] }
 0x2e9   : > { %5236 = vst [vmem:[#allocation2 + $0x8] sm:$0xff] %v5200_v3  ;;  %v3491_v52 = vadd.f32 %v3490_v13, %v3434_v53  ;;  %v3612_v25 = vpop.f32.mrf.mxu3  ;;  %v8494_v53 = vld [vmem:[#allocation17_spill] sm:$0xff]  ;;  %v4523_v5 = vsub.f32 %v7680_v0, %v4522_v44  ;;  %v7709_v60 = vand.u32 4294901760, %v372_v17 }
 0x2ea   : > { %v3294_v3 = vadd.f32 %v7581_v2, %v8494_v53  ;;  %v339_v2 = vld [vmem:[#allocation2 + $0x68] sm:$0xff] }
 0x2eb   : > { %v3564_v16 = vadd.f32 %v3563_v28, %v3491_v52  ;;  %4019 = vmatmul.f32.gmra.mxu1 %v7076_v47  ;;  %4211 = vmatmul.f32.vlgmr.msra.gmra.mxu0 %v8493_v10  ;;  %v7692_v52 = vand.u32 4294901760, %v378_v38  ;;  %v8495_v28 = vld [vmem:[#allocation46_spill] sm:$0xff] }
 0x2ed   : > { %v3613_v32 = vadd.f32 %v3612_v25, %v3564_v16  ;;  %4391 = vmatmul.f32.vlgmr.msra.gmra.mxu3 %v6880_v23  ;;  %4342 = vmatmul.f32.vlgmr.msra.gmra.mxu2 %v6880_v23  ;;  %v8496_v25 = vld [vmem:[#allocation45_spill] sm:$0xff]  ;;  %v7700_v39 = vsub.f32 %v378_v38, %v7692_v52  ;;  %v3383_v16 = vadd.f32 %v7583_v35, %v3294_v3 }
 0x2ee   : > { %4434 = vmatpush.msrb.mxu0 %v7692_v52  ;;  %4651 = vmatpush.msrb.mxu3 %v7692_v52  ;;  %v7716_v3 = vsub.f32 %v372_v17, %v7709_v60 }
 0x2ef   : > { %v5206_v37 = vadd.f32 %v3613_v32, %v333_v36  ;;  %v3443_v45 = vpop.f32.mrf.mxu0  ;;  %v4524_v36 = vand.u32 4294901760, %v4523_v5  ;;  %v8358_v32 = vand.u32 4294901760, %v7700_v39  ;;  %4594 = vmatpush.msrb.mxu2 %v7700_v39 }
 0x2f0   : > { %v3496_v8 = vpop.f32.mrf.mxu1  ;;  %v3567_v13 = vpop.f32.mrf.mxu2  ;;  %4436 = vmatpush.msrb.mxu0 %v7709_v60  ;;  %4653 = vmatpush.msrb.mxu3 %v7709_v60 }
 0x2f1   : > { %5243 = vst [vmem:[#allocation2 + $0x38] sm:$0xff] %v5206_v37  ;;  %v3497_v19 = vadd.f32 %v3496_v8, %v3439_v41  ;;  %v3616_v14 = vpop.f32.mrf.mxu3  ;;  %v3444_v41 = vadd.f32 %v3443_v45, %v3383_v16  ;;  %4525 = vmatpush.msrb.mxu1 %v4524_v36  ;;  %v4529_v35 = vsub.f32 %v7700_v39, %v8358_v32  ;;  %v8357_v16 = vand.u32 4294901760, %v7716_v3  ;;  %v8498_v36 = vld [vmem:[#allocation49_spill] sm:$0xff] }
 0x2f2   : > { %4597 = vmatpush.msrb.mxu2 %v7716_v3 }
 0x2f3   : > { %v3568_v40 = vadd.f32 %v3567_v13, %v3497_v19  ;;  %4216 = vmatmul.f32.gmra.mxu0 %v8495_v28  ;;  %4267 = vmatmul.f32.vlgmr.msra.gmra.mxu1 %v8496_v25  ;;  %v366_v19 = vld [vmem:[%s5640_s23 + $0x20] sm:$0xff]  ;;  %v8497_v13 = vld [vmem:[#allocation18_spill] sm:$0xff] }
 0x2f4   : > { %v3302_v45 = vadd.f32 %v7593_v1, %v8497_v13  ;;  %v7723_v5 = vand.u32 4294901760, %v366_v19  ;;  %v345_v1 = vld [vmem:[#allocation2 + $0x98] sm:$0xff] }
 0x2f5   : > { %v3617_v31 = vadd.f32 %v3616_v14, %v3568_v40  ;;  %4395 = vmatmul.f32.gmra.mxu3 %v6915_v55  ;;  %4346 = vmatmul.f32.gmra.mxu2 %v6915_v55  ;;  %v409_v13 = vld [vmem:[%s5640_s23 + $0x178] sm:$0xff] }
 0x2f6   : > { %v7730_v17 = vsub.f32 %v366_v19, %v7723_v5  ;;  %4438 = vmatpush.msrb.mxu0 %v7723_v5  ;;  %4655 = vmatpush.msrb.mxu3 %v7723_v5 }
 0x2f7   : > { %v5212_v37 = vadd.f32 %v3617_v31, %v339_v2  ;;  %v4530_v2 = vand.u32 4294901760, %v4529_v35 }
 0x2f8   : > { %v3448_v8 = vpop.f32.mrf.mxu0  ;;  %v3502_v53 = vpop.f32.mrf.mxu1  ;;  %4600 = vmatpush.msrb.mxu2 %v7730_v17  ;;  %v4540_v35 = vand.u32 4294901760, %v7730_v17  ;;  %4704 = vmatpush.msra.mxu0 %v4498_v7  ;;  %v351_v7 = vld [vmem:[#allocation2 + $0xc8] sm:$0xff] }
 0x2f9   : > { %5249 = vst [vmem:[#allocation2 + $0x68] sm:$0xff] %v5212_v37  ;;  %v3503_v14 = vadd.f32 %v3502_v53, %v3444_v41  ;;  %v3571_v38 = vpop.f32.mrf.mxu2  ;;  %v3620_v40 = vpop.f32.mrf.mxu3  ;;  %4531 = vmatpush.msrb.mxu1 %v4530_v2  ;;  %v4535_v41 = vsub.f32 %v7716_v3, %v8357_v16  ;;  %v3387_v37 = vadd.f32 %v7595_v54, %v3302_v45  ;;  %v7746_v54 = vand.u32 4294901760, %v409_v13 }
 0x2fa   : > { %v4541_v2 = vsub.f32 %v7730_v17, %v4540_v35  ;;  %4708 = vmatpush.msra.mxu0 %v4504_v4  ;;  %v403_v4 = vld [vmem:[%s5640_s23 + $0x148] sm:$0xff] }
 0x2fb   : > { %v3572_v31 = vadd.f32 %v3571_v38, %v3503_v14  ;;  %4221 = vmatmul.f32.gmra.mxu0 %v6962_v9  ;;  %4273 = vmatmul.f32.gmra.mxu1 %v8498_v36  ;;  %v4536_v19 = vand.u32 4294901760, %v4535_v41  ;;  %v3449_v14 = vadd.f32 %v3448_v8, %v3387_v37  ;;  %v7754_v37 = vsub.f32 %v409_v13, %v7746_v54 }
 0x2fc   : > { %4816 = vmatpush.msra.mxu2 %v7746_v54  ;;  %4712 = vmatpush.msra.mxu0 %v4510_v51 }
 0x2fd   : > { %v3621_v53 = vadd.f32 %v3620_v40, %v3572_v31  ;;  %4399 = vmatmul.f32.gmra.mxu3 %v6944_v11  ;;  %4350 = vmatmul.f32.gmra.mxu2 %v6944_v11  ;;  %v8499_v31 = vld [vmem:[#allocation19_spill] sm:$0xff] }
 0x2fe   : > { %4537 = vmatpush.msrb.mxu1 %v4536_v19  ;;  %v3310_v41 = vadd.f32 %v7613_v15, %v8499_v31  ;;  %v4890_v15 = vand.u32 4294901760, %v7754_v37  ;;  %4716 = vmatpush.msra.mxu0 %v4516_v46 }
 0x2ff   : > { %v5218_v38 = vadd.f32 %v3621_v53, %v345_v1  ;;  %v4542_v1 = vand.u32 4294901760, %v4541_v2  ;;  %v8501_v2 = vand.u32 4294901760, %v7716_v3 }
 0x300   : > { %v3453_v45 = vpop.f32.mrf.mxu0  ;;  %v3508_v40 = vpop.f32.mrf.mxu1  ;;  %v3391_v53 = vadd.f32 %v7615_v34, %v3310_v41  ;;  %v4891_v33 = vsub.f32 %v7754_v37, %v4890_v15  ;;  %4720 = vmatpush.msra.mxu0 %v4522_v44  ;;  %v357_v44 = vld [vmem:[#allocation2 + $0xf8] sm:$0xff] }
 0x301   : > { %5255 = vst [vmem:[#allocation2 + $0x98] sm:$0xff] %v5218_v38  ;;  %v3509_v16 = vadd.f32 %v3508_v40, %v3449_v14  ;;  %v3575_v32 = vpop.f32.mrf.mxu2  ;;  %v3624_v8 = vpop.f32.mrf.mxu3  ;;  %4543 = vmatpush.msrb.mxu1 %v4542_v1 }
 0x302   : > { %v4892_v51 = vand.u32 4294901760, %v4891_v33 }
 0x303   : > { %v3576_v20 = vadd.f32 %v3575_v32, %v3509_v16  ;;  %4226 = vmatmul.f32.gmra.mxu0 %v7004_v48  ;;  %4279 = vmatmul.f32.gmra.mxu1 %v6982_v29  ;;  %v3454_v32 = vadd.f32 %v3453_v45, %v3391_v53  ;;  %v7773_v16 = vand.u32 4294901760, %v403_v4  ;;  %v385_v53 = vld [vmem:[%s5640_s23 + $0xb8] sm:$0xff] }
 0x304   : > { %4767 = vmatpush.msra.mxu1 %v7598_v18  ;;  %4893 = vmatpush.msra.mxu3 %v4892_v51 }
 0x305   : > { %v3625_v19 = vadd.f32 %v3624_v8, %v3576_v20  ;;  %4403 = vmatmul.f32.gmra.mxu3 %v6984_v30  ;;  %4354 = vmatmul.f32.gmra.mxu2 %v6984_v30  ;;  %v7782_v26 = vsub.f32 %v403_v4, %v7773_v16 }
 0x306   : > { %4769 = vmatpush.msra.mxu1 %v7619_v12  ;;  %4818 = vmatpush.msra.mxu2 %v7773_v16  ;;  %v8500_v12 = vand.u32 4294901760, %v7700_v39  ;;  %v397_v39 = vld [vmem:[%s5640_s23 + $0x118] sm:$0xff] }
 0x307   : > { %v5224_v6 = vadd.f32 %v3625_v19, %v351_v7  ;;  %v8362_v0 = vand.u32 4294901760, %v7782_v26  ;;  %v7799_v40 = vand.u32 4294901760, %v397_v39  ;;  %v7835_v19 = vand.u32 4294901760, %v385_v53 }
 0x308   : > { %v3514_v34 = vpop.f32.mrf.mxu1  ;;  %v7776_v13 = vpop.f32.mrf.mxu0  ;;  %4771 = vmatpush.msra.mxu1 %v7642_v49  ;;  %4724 = vmatpush.msra.mxu0 %v8500_v12 }
 0x309   : > { %5261 = vst [vmem:[#allocation2 + $0xc8] sm:$0xff] %v5224_v6  ;;  %v3515_v18 = vadd.f32 %v3514_v34, %v3454_v32  ;;  %v3579_v14 = vpop.f32.mrf.mxu2  ;;  %v3628_v38 = vpop.f32.mrf.mxu3  ;;  %v4897_v49 = vsub.f32 %v7782_v26, %v8362_v0  ;;  %4820 = vmatpush.msra.mxu2 %v7799_v40  ;;  %v7810_v8 = vsub.f32 %v397_v39, %v7799_v40 }
 0x30a   : > { %4773 = vmatpush.msra.mxu1 %v7651_v43  ;;  %4728 = vmatpush.msra.mxu0 %v8501_v2  ;;  %v7853_v34 = vsub.f32 %v385_v53, %v7835_v19 }
 0x30b   : > { %v3580_v46 = vadd.f32 %v3579_v14, %v3515_v18  ;;  %4231 = vmatmul.f32.gmra.mxu0 %v7059_v24  ;;  %4285 = vmatmul.f32.gmra.mxu1 %v7031_v27  ;;  %v4898_v43 = vand.u32 4294901760, %v4897_v49  ;;  %v8361_v17 = vand.u32 4294901760, %v7810_v8 }
 0x30c   : > { %4775 = vmatpush.msra.mxu1 %v7672_v50  ;;  %4732 = vmatpush.msra.mxu0 %v4540_v35  ;;  %v391_v35 = vld [vmem:[%s5640_s23 + $0xe8] sm:$0xff]  ;;  %v8359_v14 = vand.u32 4294901760, %v7853_v34 }
 0x30d   : > { %v3629_v45 = vadd.f32 %v3628_v38, %v3580_v46  ;;  %4407 = vmatmul.f32.gmra.mxu3 %v7034_v56  ;;  %4358 = vmatmul.f32.gmra.mxu2 %v7034_v56  ;;  %v7825_v20 = vand.u32 4294901760, %v391_v35  ;;  %v379_v38 = vld [vmem:[%s5640_s23 + $0x88] sm:$0xff] }
 0x30e   : > { %4777 = vmatpush.msra.mxu1 %v7692_v52  ;;  %4899 = vmatpush.msra.mxu3 %v4898_v43  ;;  %v4903_v52 = vsub.f32 %v7810_v8, %v8361_v17  ;;  %v4915_v12 = vsub.f32 %v7853_v34, %v8359_v14  ;;  %v7863_v46 = vand.u32 4294901760, %v379_v38  ;;  %v373_v43 = vld [vmem:[%s5640_s23 + $0x58] sm:$0xff] }
 0x30f   : > { %v5230_v31 = vadd.f32 %v3629_v45, %v357_v44  ;;  %4822 = vmatpush.msra.mxu2 %v7825_v20 }
 0x310   : > { %v7804_v3 = vpop.f32.mrf.mxu0  ;;  %v7806_v41 = vpop.f32.mrf.mxu1  ;;  %4779 = vmatpush.msra.mxu1 %v7709_v60  ;;  %v4904_v7 = vand.u32 4294901760, %v4903_v52  ;;  %v7831_v60 = vsub.f32 %v391_v35, %v7825_v20  ;;  %v4916_v39 = vand.u32 4294901760, %v4915_v12  ;;  %v7883_v52 = vand.u32 4294901760, %v373_v43 }
 0x311   : > { %5267 = vst [vmem:[#allocation2 + $0xf8] sm:$0xff] %v5230_v31  ;;  %v7813_v50 = vpop.f32.mrf.mxu2  ;;  %v7815_v1 = vpop.f32.mrf.mxu3  ;;  %4824 = vmatpush.msra.mxu2 %v7835_v19  ;;  %v7876_v31 = vsub.f32 %v379_v38, %v7863_v46 }
 0x312   : > { %4781 = vmatpush.msra.mxu1 %v7723_v5  ;;  %4905 = vmatpush.msra.mxu3 %v4904_v7  ;;  %v8360_v5 = vand.u32 4294901760, %v7831_v60  ;;  %v367_v7 = vld [vmem:[%s5640_s23 + $0x28] sm:$0xff] }
 0x313   : > { %4236 = vmatmul.f32.gmra.mxu0 %v7092_v42  ;;  %4291 = vmatmul.f32.gmra.mxu1 %v7074_v22  ;;  %v4920_v35 = vand.u32 4294901760, %v7876_v31 }
 0x314   : > { %v4909_v51 = vsub.f32 %v7831_v60, %v8360_v5  ;;  %4826 = vmatpush.msra.mxu2 %v7863_v46 }
 0x315   : > { %4411 = vmatmul.f32.gmra.mxu3 %v7076_v47  ;;  %4362 = vmatmul.f32.gmra.mxu2 %v7076_v47  ;;  %v4921_v53 = vsub.f32 %v7876_v31, %v4920_v35 }
 0x316   : > { %v4910_v18 = vand.u32 4294901760, %v4909_v51  ;;  %4828 = vmatpush.msra.mxu2 %v7883_v52  ;;  %v4925_v51 = vsub.f32 %v373_v43, %v7883_v52 }
 0x317   : > { %v4922_v38 = vand.u32 4294901760, %v4921_v53 }
 0x318   : > { %v7837_v33 = vpop.f32.mrf.mxu0  ;;  %v7839_v4 = vpop.f32.mrf.mxu1  ;;  %4911 = vmatpush.msra.mxu3 %v4910_v18  ;;  %v7891_v18 = vand.u32 4294901760, %v367_v7  ;;  %v4926_v12 = vand.u32 4294901760, %v4925_v51 }
 0x319   : > { %v7842_v32 = vpop.f32.mrf.mxu2  ;;  %v7844_v6 = vpop.f32.mrf.mxu3 }
 0x31a   : > { %4917 = vmatpush.msra.mxu3 %v4916_v39  ;;  %4830 = vmatpush.msra.mxu2 %v7891_v18  ;;  %v4931_v39 = vsub.f32 %v367_v7, %v7891_v18  ;;  %v4927_v53 = vsub.f32 %v4925_v51, %v4926_v12  ;;  %v8502_v7 = vand.u32 4294901760, %v7782_v26 }
 0x31b   : > { %4297 = vmatmul.f32.gmra.mxu1 %v7106_v58  ;;  %4444 = vmatmul.f32.vlgmr.msrb.gmra.mxu0 %v8481_v57 }
 0x31c   : > { %4971 = vmatpush.msrb.mxu0 %v7754_v37  ;;  %4923 = vmatpush.msra.mxu3 %v4922_v38  ;;  %v4932_v0 = vand.u32 4294901760, %v4931_v39  ;;  %v4928_v37 = vand.u32 4294901760, %v4927_v53  ;;  %v8507_v53 = vld [vmem:[#allocation28_spill] sm:$0xff] }
 0x31d   : > { %4659 = vmatmul.f32.vlgmr.msrb.gmra.mxu3 %v8496_v25  ;;  %4603 = vmatmul.f32.vlgmr.msrb.gmra.mxu2 %v8493_v10 }
 0x31e   : > { %4974 = vmatpush.msrb.mxu0 %v7782_v26  ;;  %5096 = vmatpush.msrb.mxu2 %v4890_v15  ;;  %v4933_v15 = vsub.f32 %v4931_v39, %v4932_v0  ;;  %v8504_v26 = vld [vmem:[#allocation20_spill] sm:$0xff] }
 0x31f   : > { %4929 = vmatpush.msra.mxu3 %v4928_v37  ;;  %v8508_v37 = vand.u32 4294901760, %v7853_v34 }
 0x320   : > { %v7866_v44 = vpop.f32.mrf.mxu0  ;;  %v7868_v2 = vpop.f32.mrf.mxu1  ;;  %4977 = vmatpush.msrb.mxu0 %v7810_v8  ;;  %5100 = vmatpush.msrb.mxu2 %v8502_v7  ;;  %v4934_v38 = vand.u32 4294901760, %v4933_v15  ;;  %v8505_v7 = vld [vmem:[#allocation25_spill] sm:$0xff] }
 0x321   : > { %v7870_v45 = vpop.f32.mrf.mxu2  ;;  %v7872_v49 = vpop.f32.mrf.mxu3  ;;  %v1582_v25 = vadd.f32 %v8505_v7, %v8504_v26  ;;  %v328_v7 = vld [vmem:[#allocation2 + $0x10] sm:$0xff] }
 0x322   : > { %4980 = vmatpush.msrb.mxu0 %v7831_v60  ;;  %4935 = vmatpush.msra.mxu3 %v4934_v38 }
 0x323   : > { %4452 = vmatmul.f32.gmra.mxu0 %v8486_v61  ;;  %4545 = vmatmul.f32.vlgmr.msrb.gmra.mxu1 %v6880_v23  ;;  %v1631_v15 = vadd.f32 %v8507_v53, %v1582_v25 }
 0x324   : > { %5033 = vmatpush.msrb.mxu1 %v7746_v54  ;;  %4983 = vmatpush.msrb.mxu0 %v7853_v34 }
 0x325   : > { %4665 = vmatmul.f32.gmra.mxu3 %v8498_v36  ;;  %4608 = vmatmul.f32.gmra.mxu2 %v8495_v28  ;;  %v8503_v36 = vand.u32 4294901760, %v7810_v8  ;;  %v8506_v28 = vand.u32 4294901760, %v7831_v60  ;;  %v8510_v60 = vld [vmem:[#allocation27_spill] sm:$0xff] }
 0x326   : > { %5035 = vmatpush.msrb.mxu1 %v7773_v16  ;;  %4986 = vmatpush.msrb.mxu0 %v7876_v31 }
 0x327   : > { %5104 = vmatpush.msrb.mxu2 %v8503_v36  ;;  %5159 = vmatpush.msrb.mxu3 %v7746_v54  ;;  %v8509_v54 = vld [vmem:[#allocation21_spill] sm:$0xff] }
 0x328   : > { %v7898_v14 = vpop.f32.mrf.mxu0  ;;  %v7900_v5 = vpop.f32.mrf.mxu1  ;;  %5037 = vmatpush.msrb.mxu1 %v7799_v40  ;;  %4989 = vmatpush.msrb.mxu0 %v4925_v51 }
 0x329   : > { %v7905_v43 = vpop.f32.mrf.mxu2  ;;  %v7907_v17 = vpop.f32.mrf.mxu3  ;;  %5108 = vmatpush.msrb.mxu2 %v8506_v28  ;;  %v3662_v28 = vadd.f32 %v7776_v13, %v1631_v15  ;;  %5161 = vmatpush.msrb.mxu3 %v7773_v16  ;;  %v1586_v13 = vadd.f32 %v8510_v60, %v8509_v54  ;;  %v8511_v16 = vld [vmem:[#allocation30_spill] sm:$0xff]  ;;  %v8516_v60 = vld [vmem:[#allocation31_spill] sm:$0xff] }
 0x32a   : > { %5039 = vmatpush.msrb.mxu1 %v7825_v20  ;;  %4992 = vmatpush.msrb.mxu0 %v4931_v39 }
 0x32b   : > { %4460 = vmatmul.f32.gmra.mxu0 %v7028_v62  ;;  %4549 = vmatmul.f32.gmra.mxu1 %v6915_v55  ;;  %v3763_v25 = vadd.f32 %v7806_v41, %v3662_v28 }
 0x32c   : > { %5041 = vmatpush.msrb.mxu1 %v7835_v19  ;;  %5112 = vmatpush.msrb.mxu2 %v8508_v37 }
 0x32d   : > { %4671 = vmatmul.f32.gmra.mxu3 %v6982_v29  ;;  %4613 = vmatmul.f32.gmra.mxu2 %v6962_v9  ;;  %v3821_v41 = vadd.f32 %v7813_v50, %v3763_v25  ;;  %v8513_v50 = vld [vmem:[#allocation29_spill] sm:$0xff] }
 0x32e   : > { %5043 = vmatpush.msrb.mxu1 %v7863_v46  ;;  %5116 = vmatpush.msrb.mxu2 %v4920_v35  ;;  %v1635_v35 = vadd.f32 %v8511_v16, %v1586_v13 }
 0x32f   : > { %5163 = vmatpush.msrb.mxu3 %v7799_v40 }
 0x330   : > { %v7926_v8 = vpop.f32.mrf.mxu0  ;;  %v7928_v36 = vpop.f32.mrf.mxu1  ;;  %5045 = vmatpush.msrb.mxu1 %v7883_v52  ;;  %5120 = vmatpush.msrb.mxu2 %v4926_v12  ;;  %v3670_v40 = vadd.f32 %v7804_v3, %v1635_v35 }
 0x331   : > { %v7931_v31 = vpop.f32.mrf.mxu2  ;;  %v7933_v29 = vpop.f32.mrf.mxu3  ;;  %5165 = vmatpush.msrb.mxu3 %v7825_v20  ;;  %v3877_v20 = vadd.f32 %v7815_v1, %v3821_v41  ;;  %v8517_v41 = vld [vmem:[#allocation34_spill] sm:$0xff] }
 0x332   : > { %5047 = vmatpush.msrb.mxu1 %v7891_v18  ;;  %5124 = vmatpush.msrb.mxu2 %v4932_v0  ;;  %v3767_v12 = vadd.f32 %v7839_v4, %v3670_v40  ;;  %v8512_v0 = vld [vmem:[#allocation22_spill] sm:$0xff] }
 0x333   : > { %4468 = vmatmul.f32.gmra.mxu0 %v7071_v59  ;;  %4553 = vmatmul.f32.gmra.mxu1 %v6944_v11 }
 0x334   : > { %5167 = vmatpush.msrb.mxu3 %v7835_v19  ;;  %v1590_v19 = vadd.f32 %v8513_v50, %v8512_v0  ;;  %v3826_v1 = vadd.f32 %v7842_v32, %v3767_v12  ;;  %v8515_v32 = vld [vmem:[#allocation23_spill] sm:$0xff] }
 0x335   : > { %4677 = vmatmul.f32.gmra.mxu3 %v7031_v27  ;;  %4618 = vmatmul.f32.gmra.mxu2 %v7004_v48  ;;  %v1594_v13 = vadd.f32 %v8516_v60, %v8515_v32  ;;  %v8522_v60 = vld [vmem:[#allocation35_spill] sm:$0xff] }
 0x336   : > { %5169 = vmatpush.msrb.mxu3 %v7863_v46  ;;  %v8514_v46 = vld [vmem:[#allocation32_spill] sm:$0xff]  ;;  %v3883_v54 = vadd.f32 %v7844_v6, %v3826_v1 }
 0x337   : > { %v1639_v15 = vadd.f32 %v8514_v46, %v1590_v19  ;;  %v1643_v40 = vadd.f32 %v8517_v41, %v1594_v13  ;;  %v8520_v1 = vld [vmem:[#allocation36_spill] sm:$0xff] }
 0x338   : > { %v7950_v34 = vpop.f32.mrf.mxu1  ;;  %v3951_v51 = vpop.f32.mrf.mxu0  ;;  %5171 = vmatpush.msrb.mxu3 %v7883_v52 }
 0x339   : > { %v7955_v39 = vpop.f32.mrf.mxu2  ;;  %v7957_v38 = vpop.f32.mrf.mxu3  ;;  %v3952_v3 = vadd.f32 %v3951_v51, %v3877_v20  ;;  %v3678_v52 = vadd.f32 %v7837_v33, %v1639_v15  ;;  %v334_v33 = vld [vmem:[#allocation2 + $0x40] sm:$0xff]  ;;  %v3686_v0 = vadd.f32 %v7866_v44, %v1643_v40  ;;  %v340_v44 = vld [vmem:[#allocation2 + $0x70] sm:$0xff] }
 0x33a   : > { %5173 = vmatpush.msrb.mxu3 %v7891_v18 }
 0x33b   : > { %4476 = vmatmul.f32.gmra.mxu0 %v7103_v21  ;;  %4557 = vmatmul.f32.gmra.mxu1 %v6984_v30  ;;  %v3771_v18 = vadd.f32 %v7868_v2, %v3678_v52 }
 0x33d   : > { %4683 = vmatmul.f32.gmra.mxu3 %v7074_v22  ;;  %4623 = vmatmul.f32.gmra.mxu2 %v7059_v24  ;;  %v3831_v20 = vadd.f32 %v7870_v45, %v3771_v18  ;;  %v8518_v45 = vld [vmem:[#allocation24_spill] sm:$0xff] }
 0x33f   : > { %v3889_v19 = vadd.f32 %v7872_v49, %v3831_v20 }
 0x340   : > { %v3955_v26 = vpop.f32.mrf.mxu0  ;;  %v4000_v53 = vpop.f32.mrf.mxu1 }
 0x341   : > { %v4001_v4 = vadd.f32 %v4000_v53, %v3952_v3  ;;  %v7974_v37 = vpop.f32.mrf.mxu2  ;;  %v7976_v28 = vpop.f32.mrf.mxu3  ;;  %v3956_v51 = vadd.f32 %v3955_v26, %v3883_v54  ;;  %v3775_v3 = vadd.f32 %v7900_v5, %v3686_v0  ;;  %v8519_v26 = vld [vmem:[#allocation33_spill] sm:$0xff] }
 0x343   : > { %v5201_v25 = vadd.f32 %v4001_v4, %v328_v7  ;;  %4484 = vmatmul.f32.gmra.mxu0 %v7124_v63  ;;  %4561 = vmatmul.f32.gmra.mxu1 %v7034_v56  ;;  %v1598_v7 = vadd.f32 %v8519_v26, %v8518_v45  ;;  %v3836_v52 = vadd.f32 %v7905_v43, %v3775_v3  ;;  %v8521_v43 = vld [vmem:[#allocation26_spill] sm:$0xff]  ;;  %v352_v3 = vld [vmem:[#allocation2 + $0xd0] sm:$0xff] }
 0x344   : > { %v1602_v13 = vadd.f32 %v8522_v60, %v8521_v43 }
 0x345   : > { %5237 = vst [vmem:[#allocation2 + $0x10] sm:$0xff] %v5201_v25  ;;  %4689 = vmatmul.f32.gmra.mxu3 %v7106_v58  ;;  %4628 = vmatmul.f32.gmra.mxu2 %v7092_v42  ;;  %v1647_v4 = vadd.f32 %v8520_v1, %v1598_v7 }
 0x347   : > { %v3694_v54 = vadd.f32 %v7898_v14, %v1647_v4  ;;  %v346_v14 = vld [vmem:[#allocation2 + $0xa0] sm:$0xff] }
 0x348   : > { %v3959_v16 = vpop.f32.mrf.mxu0  ;;  %v4004_v35 = vpop.f32.mrf.mxu1 }
 0x349   : > { %v4005_v12 = vadd.f32 %v4004_v35, %v3956_v51  ;;  %v7989_v6 = vpop.f32.mrf.mxu2  ;;  %v7991_v2 = vpop.f32.mrf.mxu3  ;;  %v3960_v53 = vadd.f32 %v3959_v16, %v3889_v19  ;;  %v3779_v32 = vadd.f32 %v7928_v36, %v3694_v54  ;;  %v8523_v35 = vld [vmem:[#allocation37_spill] sm:$0xff] }
 0x34a   : > { %v1651_v41 = vadd.f32 %v8523_v35, %v1602_v13 }
 0x34b   : > { %v5207_v50 = vadd.f32 %v4005_v12, %v334_v33  ;;  %4565 = vmatmul.f32.gmra.mxu1 %v7076_v47  ;;  %4734 = vmatmul.f32.vlgmr.msra.gmra.mxu0 %v6880_v23  ;;  %v3841_v40 = vadd.f32 %v7931_v31, %v3779_v32 }
 0x34c   : > { %v3702_v12 = vadd.f32 %v7926_v8, %v1651_v41  ;;  %v8526_v41 = vld [vmem:[#allocation40_spill] sm:$0xff] }
 0x34d   : > { %5244 = vst [vmem:[#allocation2 + $0x40] sm:$0xff] %v5207_v50  ;;  %4937 = vmatmul.f32.vlgmr.msra.gmra.mxu3 %v6880_v23  ;;  %4836 = vmatmul.f32.vlgmr.msra.gmra.mxu2 %v8481_v57  ;;  %v3895_v57 = vadd.f32 %v7907_v17, %v3836_v52 }
 0x34e   : > { %v3783_v50 = vadd.f32 %v7950_v34, %v3702_v12  ;;  %v358_v34 = vld [vmem:[#allocation2 + $0x100] sm:$0xff] }
 0x350   : > { %v3963_v46 = vpop.f32.mrf.mxu0  ;;  %v4008_v15 = vpop.f32.mrf.mxu1  ;;  %v3846_v8 = vadd.f32 %v7955_v39, %v3783_v50 }
 0x351   : > { %v4009_v25 = vadd.f32 %v4008_v15, %v3960_v53  ;;  %v8004_v49 = vpop.f32.mrf.mxu2  ;;  %v8006_v5 = vpop.f32.mrf.mxu3  ;;  %v3964_v51 = vadd.f32 %v3963_v46, %v3895_v57  ;;  %v8524_v15 = vld [vmem:[#allocation38_spill] sm:$0xff]  ;;  %v8525_v57 = vld [vmem:[#allocation39_spill] sm:$0xff] }
 0x352   : > { %v4054_v1 = vadd.f32 %v7974_v37, %v8524_v15  ;;  %v4062_v32 = vadd.f32 %v7989_v6, %v8525_v57  ;;  %v347_v57 = vld [vmem:[#allocation2 + $0xa8] sm:$0xff] }
 0x353   : > { %v5213_v18 = vadd.f32 %v4009_v25, %v340_v44  ;;  %4738 = vmatmul.f32.gmra.mxu0 %v6915_v55  ;;  %4783 = vmatmul.f32.vlgmr.msra.gmra.mxu1 %v6880_v23 }
 0x355   : > { %5250 = vst [vmem:[#allocation2 + $0x70] sm:$0xff] %v5213_v18  ;;  %4941 = vmatmul.f32.gmra.mxu3 %v6915_v55  ;;  %4844 = vmatmul.f32.gmra.mxu2 %v8486_v61  ;;  %v3901_v61 = vadd.f32 %v7933_v29, %v3841_v40  ;;  %v3907_v29 = vadd.f32 %v7957_v38, %v3846_v8 }
 0x356   : > { %v4155_v38 = vadd.f32 %v7976_v28, %v4054_v1  ;;  %v329_v28 = vld [vmem:[#allocation2 + $0x18] sm:$0xff]  ;;  %v4070_v40 = vadd.f32 %v8004_v49, %v8526_v41 }
 0x358   : > { %v3967_v16 = vpop.f32.mrf.mxu0  ;;  %v4012_v33 = vpop.f32.mrf.mxu1  ;;  %v4163_v50 = vadd.f32 %v8006_v5, %v4070_v40  ;;  %v8529_v5 = vld [vmem:[#allocation45_spill] sm:$0xff] }
 0x359   : > { %v4013_v20 = vadd.f32 %v4012_v33, %v3964_v51  ;;  %v8019_v17 = vpop.f32.mrf.mxu2  ;;  %v8021_v36 = vpop.f32.mrf.mxu3  ;;  %v3968_v31 = vadd.f32 %v3967_v16, %v3901_v61  ;;  %v4159_v16 = vadd.f32 %v7991_v2, %v4062_v32  ;;  %v335_v2 = vld [vmem:[#allocation2 + $0x48] sm:$0xff] }
 0x35b   : > { %v5219_v0 = vadd.f32 %v4013_v20, %v346_v14  ;;  %4742 = vmatmul.f32.gmra.mxu0 %v6944_v11  ;;  %4787 = vmatmul.f32.gmra.mxu1 %v6915_v55 }
 0x35d   : > { %5256 = vst [vmem:[#allocation2 + $0xa0] sm:$0xff] %v5219_v0  ;;  %4945 = vmatmul.f32.gmra.mxu3 %v6944_v11  ;;  %4852 = vmatmul.f32.gmra.mxu2 %v7028_v62 }
 0x360   : > { %v3971_v19 = vpop.f32.mrf.mxu0  ;;  %v4016_v45 = vpop.f32.mrf.mxu1 }
 0x361   : > { %v4017_v26 = vadd.f32 %v4016_v45, %v3968_v31  ;;  %v8031_v7 = vpop.f32.mrf.mxu2  ;;  %v8033_v53 = vpop.f32.mrf.mxu3  ;;  %v3972_v62 = vadd.f32 %v3971_v19, %v3907_v29  ;;  %v8527_v45 = vld [vmem:[#allocation41_spill] sm:$0xff] }
 0x362   : > { %v4078_v8 = vadd.f32 %v8019_v17, %v8527_v45 }
 0x363   : > { %v5225_v46 = vadd.f32 %v4017_v26, %v352_v3  ;;  %4746 = vmatmul.f32.gmra.mxu0 %v6984_v30  ;;  %4791 = vmatmul.f32.gmra.mxu1 %v6944_v11 }
 0x365   : > { %5262 = vst [vmem:[#allocation2 + $0xd0] sm:$0xff] %v5225_v46  ;;  %4949 = vmatmul.f32.gmra.mxu3 %v6984_v30  ;;  %4860 = vmatmul.f32.gmra.mxu2 %v7071_v59 }
 0x368   : > { %v4020_v39 = vpop.f32.mrf.mxu1  ;;  %v4212_v44 = vpop.f32.mrf.mxu0 }
 0x369   : > { %v4021_v4 = vadd.f32 %v4020_v39, %v3972_v62  ;;  %v8042_v52 = vpop.f32.mrf.mxu2  ;;  %v8044_v25 = vpop.f32.mrf.mxu3  ;;  %v4213_v59 = vadd.f32 %v4212_v44, %v4155_v38  ;;  %v8528_v62 = vld [vmem:[#allocation46_spill] sm:$0xff]  ;;  %v4167_v39 = vadd.f32 %v8021_v36, %v4078_v8  ;;  %v8531_v36 = vld [vmem:[#allocation49_spill] sm:$0xff] }
 0x36b   : > { %v5231_v54 = vadd.f32 %v4021_v4, %v358_v34  ;;  %4750 = vmatmul.f32.gmra.mxu0 %v7034_v56  ;;  %4795 = vmatmul.f32.gmra.mxu1 %v6984_v30  ;;  %v341_v34 = vld [vmem:[#allocation2 + $0x78] sm:$0xff] }
 0x36c   : > { %v8530_v4 = vld [vmem:[#allocation42_spill] sm:$0xff] }
 0x36d   : > { %5268 = vst [vmem:[#allocation2 + $0x100] sm:$0xff] %v5231_v54  ;;  %4953 = vmatmul.f32.gmra.mxu3 %v7034_v56  ;;  %4868 = vmatmul.f32.gmra.mxu2 %v7103_v21  ;;  %v4086_v54 = vadd.f32 %v8031_v7, %v8530_v4 }
 0x36f   : > { %v4171_v32 = vadd.f32 %v8033_v53, %v4086_v54  ;;  %v8533_v53 = vld [vmem:[#allocation51_spill] sm:$0xff] }
 0x370   : > { %v4217_v18 = vpop.f32.mrf.mxu0  ;;  %v4268_v37 = vpop.f32.mrf.mxu1 }
 0x371   : > { %v4269_v43 = vadd.f32 %v4268_v37, %v4213_v59  ;;  %v4343_v60 = vpop.f32.mrf.mxu2  ;;  %v4392_v13 = vpop.f32.mrf.mxu3  ;;  %v4218_v21 = vadd.f32 %v4217_v18, %v4159_v16 }
 0x373   : > { %v4344_v51 = vadd.f32 %v4343_v60, %v4269_v43  ;;  %4754 = vmatmul.f32.gmra.mxu0 %v7076_v47  ;;  %4799 = vmatmul.f32.gmra.mxu1 %v7034_v56 }
 0x375   : > { %v4393_v14 = vadd.f32 %v4392_v13, %v4344_v51  ;;  %4957 = vmatmul.f32.gmra.mxu3 %v7076_v47  ;;  %4876 = vmatmul.f32.gmra.mxu2 %v7124_v63  ;;  %v8532_v51 = vld [vmem:[#allocation44_spill] sm:$0xff] }
 0x377   : > { %v5202_v33 = vadd.f32 %v4393_v14, %v329_v28  ;;  %v4094_v28 = vadd.f32 %v8042_v52, %v8532_v51 }
 0x378   : > { %v4222_v35 = vpop.f32.mrf.mxu0  ;;  %v4274_v6 = vpop.f32.mrf.mxu1 }
 0x379   : > { %5238 = vst [vmem:[#allocation2 + $0x18] sm:$0xff] %v5202_v33  ;;  %v4275_v20 = vadd.f32 %v4274_v6, %v4218_v21  ;;  %v4347_v12 = vpop.f32.mrf.mxu2  ;;  %v4396_v0 = vpop.f32.mrf.mxu3  ;;  %v4223_v31 = vadd.f32 %v4222_v35, %v4163_v50  ;;  %v353_v33 = vld [vmem:[#allocation2 + $0xd8] sm:$0xff]  ;;  %v4175_v35 = vadd.f32 %v8044_v25, %v4094_v28 }
 0x37b   : > { %v4348_v61 = vadd.f32 %v4347_v12, %v4275_v20  ;;  %4803 = vmatmul.f32.gmra.mxu1 %v7076_v47  ;;  %4995 = vmatmul.f32.vlgmr.msrb.gmra.mxu0 %v8493_v10 }
 0x37d   : > { %v4397_v63 = vadd.f32 %v4396_v0, %v4348_v61  ;;  %5175 = vmatmul.f32.vlgmr.msrb.gmra.mxu3 %v6880_v23  ;;  %5126 = vmatmul.f32.vlgmr.msrb.gmra.mxu2 %v6880_v23 }
 0x37f   : > { %v5208_v19 = vadd.f32 %v4397_v63, %v335_v2 }
 0x380   : > { %v4227_v49 = vpop.f32.mrf.mxu0  ;;  %v4280_v3 = vpop.f32.mrf.mxu1 }
 0x381   : > { %5245 = vst [vmem:[#allocation2 + $0x48] sm:$0xff] %v5208_v19  ;;  %v4281_v26 = vadd.f32 %v4280_v3, %v4223_v31  ;;  %v4351_v46 = vpop.f32.mrf.mxu2  ;;  %v4400_v29 = vpop.f32.mrf.mxu3  ;;  %v4228_v44 = vadd.f32 %v4227_v49, %v4167_v39 }
 0x383   : > { %v4352_v10 = vadd.f32 %v4351_v46, %v4281_v26  ;;  %5000 = vmatmul.f32.gmra.mxu0 %v8528_v62  ;;  %5051 = vmatmul.f32.vlgmr.msrb.gmra.mxu1 %v8529_v5 }
 0x385   : > { %v4401_v23 = vadd.f32 %v4400_v29, %v4352_v10  ;;  %5179 = vmatmul.f32.gmra.mxu3 %v6915_v55  ;;  %5130 = vmatmul.f32.gmra.mxu2 %v6915_v55  ;;  %v8534_v10 = vld [vmem:[#allocation47_spill] sm:$0xff] }
 0x387   : > { %v5214_v15 = vadd.f32 %v4401_v23, %v341_v34  ;;  %v8536_v34 = vld [vmem:[#allocation59_spill] sm:$0xff] }
 0x388   : > { %v4232_v17 = vpop.f32.mrf.mxu0  ;;  %v4286_v1 = vpop.f32.mrf.mxu1 }
 0x389   : > { %5251 = vst [vmem:[#allocation2 + $0x78] sm:$0xff] %v5214_v15  ;;  %v4287_v38 = vadd.f32 %v4286_v1, %v4228_v44  ;;  %v4355_v59 = vpop.f32.mrf.mxu2  ;;  %v4404_v18 = vpop.f32.mrf.mxu3  ;;  %v4233_v43 = vadd.f32 %v4232_v17, %v4171_v32  ;;  %v8537_v17 = vld [vmem:[#allocation50_spill] sm:$0xff] }
 0x38a   : > { %v8538_v1 = vld [vmem:[#allocation58_spill] sm:$0xff] }
 0x38b   : > { %v4356_v37 = vadd.f32 %v4355_v59, %v4287_v38  ;;  %5005 = vmatmul.f32.gmra.mxu0 %v6962_v9  ;;  %5057 = vmatmul.f32.gmra.mxu1 %v8531_v36  ;;  %v2370_v4 = vadd.f32 %v8538_v1, %v8537_v17  ;;  %v8539_v59 = vld [vmem:[#allocation61_spill] sm:$0xff]  ;;  %v8548_v1 = vld [vmem:[#allocation67_spill] sm:$0xff] }
 0x38d   : > { %v4405_v55 = vadd.f32 %v4404_v18, %v4356_v37  ;;  %5183 = vmatmul.f32.gmra.mxu3 %v6944_v11  ;;  %5134 = vmatmul.f32.gmra.mxu2 %v6944_v11  ;;  %v2419_v18 = vadd.f32 %v8539_v59, %v2370_v4 }
 0x38f   : > { %v5220_v60 = vadd.f32 %v4405_v55, %v347_v57 }
 0x390   : > { %v4237_v7 = vpop.f32.mrf.mxu0  ;;  %v4292_v13 = vpop.f32.mrf.mxu1 }
 0x391   : > { %5257 = vst [vmem:[#allocation2 + $0xa8] sm:$0xff] %v5220_v60  ;;  %v4293_v16 = vadd.f32 %v4292_v13, %v4233_v43  ;;  %v4359_v9 = vpop.f32.mrf.mxu2  ;;  %v4408_v14 = vpop.f32.mrf.mxu3  ;;  %v4238_v6 = vadd.f32 %v4237_v7, %v4175_v35  ;;  %v8540_v60 = vld [vmem:[#allocation53_spill] sm:$0xff]  ;;  %v8541_v7 = vld [vmem:[#allocation60_spill] sm:$0xff] }
 0x392   : > { %v2374_v13 = vadd.f32 %v8541_v7, %v8540_v60 }
 0x393   : > { %v4360_v21 = vadd.f32 %v4359_v9, %v4293_v16  ;;  %5010 = vmatmul.f32.gmra.mxu0 %v7004_v48  ;;  %5063 = vmatmul.f32.gmra.mxu1 %v8533_v53  ;;  %v359_v48 = vld [vmem:[#allocation2 + $0x108] sm:$0xff]  ;;  %v330_v16 = vld [vmem:[#allocation2 + $0x20] sm:$0xff] }
 0x395   : > { %v4409_v11 = vadd.f32 %v4408_v14, %v4360_v21  ;;  %5187 = vmatmul.f32.gmra.mxu3 %v6984_v30  ;;  %5138 = vmatmul.f32.gmra.mxu2 %v6984_v30  ;;  %v8542_v14 = vld [vmem:[#allocation63_spill] sm:$0xff] }
 0x396   : > { %v2423_v21 = vadd.f32 %v8542_v14, %v2374_v13  ;;  %v348_v13 = vld [vmem:[#allocation2 + $0xb0] sm:$0xff] }
 0x397   : > { %v5226_v41 = vadd.f32 %v4409_v11, %v353_v33 }
 0x398   : > { %v4298_v52 = vpop.f32.mrf.mxu1  ;;  %v4445_v40 = vpop.f32.mrf.mxu0 }
 0x399   : > { %5263 = vst [vmem:[#allocation2 + $0xd8] sm:$0xff] %v5226_v41  ;;  %v4299_v20 = vadd.f32 %v4298_v52, %v4238_v6  ;;  %v4363_v12 = vpop.f32.mrf.mxu2  ;;  %v4412_v0 = vpop.f32.mrf.mxu3 }
 0x39b   : > { %v4364_v61 = vadd.f32 %v4363_v12, %v4299_v20  ;;  %5015 = vmatmul.f32.gmra.mxu0 %v7059_v24  ;;  %5069 = vmatmul.f32.gmra.mxu1 %v7031_v27  ;;  %v8543_v20 = vld [vmem:[#allocation54_spill] sm:$0xff] }
 0x39c   : > { %v8544_v12 = vld [vmem:[#allocation62_spill] sm:$0xff] }
 0x39d   : > { %v4413_v25 = vadd.f32 %v4412_v0, %v4364_v61  ;;  %5191 = vmatmul.f32.gmra.mxu3 %v7034_v56  ;;  %5142 = vmatmul.f32.gmra.mxu2 %v7034_v56  ;;  %v2378_v0 = vadd.f32 %v8544_v12, %v8543_v20 }
 0x39f   : > { %v5232_v30 = vadd.f32 %v4413_v25, %v359_v48  ;;  %v336_v25 = vld [vmem:[#allocation2 + $0x50] sm:$0xff] }
 0x3a0   : > { %v4453_v2 = vpop.f32.mrf.mxu0  ;;  %v4546_v50 = vpop.f32.mrf.mxu1 }
 0x3a1   : > { %5269 = vst [vmem:[#allocation2 + $0x108] sm:$0xff] %v5232_v30  ;;  %v4604_v63 = vpop.f32.mrf.mxu2  ;;  %v4660_v31 = vpop.f32.mrf.mxu3  ;;  %v4454_v32 = vadd.f32 %v4453_v2, %v2419_v18  ;;  %v8545_v2 = vld [vmem:[#allocation65_spill] sm:$0xff] }
 0x3a3   : > { %5020 = vmatmul.f32.gmra.mxu0 %v7092_v42  ;;  %5075 = vmatmul.f32.gmra.mxu1 %v7074_v22  ;;  %v8535_v22 = vld [vmem:[#allocation56_spill] sm:$0xff] }
 0x3a4   : > { %v2366_v62 = vadd.f32 %v8535_v22, %v8534_v10 }
 0x3a5   : > { %5195 = vmatmul.f32.gmra.mxu3 %v7076_v47  ;;  %5146 = vmatmul.f32.gmra.mxu2 %v7076_v47 }
 0x3a6   : > { %v2415_v39 = vadd.f32 %v8536_v34, %v2366_v62  ;;  %v8547_v62 = vld [vmem:[#allocation64_spill] sm:$0xff] }
 0x3a8   : > { %v4461_v27 = vpop.f32.mrf.mxu0  ;;  %v4550_v24 = vpop.f32.mrf.mxu1 }
 0x3a9   : > { %v4609_v19 = vpop.f32.mrf.mxu2  ;;  %v4666_v49 = vpop.f32.mrf.mxu3  ;;  %v4551_v43 = vadd.f32 %v4550_v24, %v4454_v32  ;;  %v4462_v6 = vadd.f32 %v4461_v27, %v2423_v21 }
 0x3ab   : > { %5081 = vmatmul.f32.gmra.mxu1 %v7106_v58  ;;  %v4446_v58 = vadd.f32 %v4445_v40, %v2415_v39  ;;  %v4610_v53 = vadd.f32 %v4609_v19, %v4551_v43 }
 0x3ad   : > { %v4547_v15 = vadd.f32 %v4546_v50, %v4446_v58  ;;  %v4667_v52 = vadd.f32 %v4666_v49, %v4610_v53  ;;  %v2427_v50 = vadd.f32 %v8545_v2, %v2378_v0 }
 0x3af   : > { %v4605_v37 = vadd.f32 %v4604_v63, %v4547_v15  ;;  %v342_v15 = vld [vmem:[#allocation2 + $0x80] sm:$0xff] }
 0x3b0   : > { %v4469_v56 = vpop.f32.mrf.mxu0  ;;  %v4554_v3 = vpop.f32.mrf.mxu1 }
 0x3b1   : > { %v4614_v45 = vpop.f32.mrf.mxu2  ;;  %v4672_v8 = vpop.f32.mrf.mxu3  ;;  %v4661_v55 = vadd.f32 %v4660_v31, %v4605_v37  ;;  %v4555_v40 = vadd.f32 %v4554_v3, %v4462_v6  ;;  %v4470_v10 = vadd.f32 %v4469_v56, %v2427_v50  ;;  %v8546_v3 = vld [vmem:[#allocation55_spill] sm:$0xff] }
 0x3b2   : > { %v2382_v34 = vadd.f32 %v8547_v62, %v8546_v3 }
 0x3b3   : > { %v4615_v63 = vadd.f32 %v4614_v45, %v4555_v40 }
 0x3b4   : > { %v2431_v4 = vadd.f32 %v8548_v1, %v2382_v34 }
 0x3b5   : > { %v4673_v22 = vadd.f32 %v4672_v8, %v4615_v63 }
 0x3b8   : > { %v4477_v26 = vpop.f32.mrf.mxu0  ;;  %v4558_v46 = vpop.f32.mrf.mxu1 }
 0x3b9   : > { %v4619_v29 = vpop.f32.mrf.mxu2  ;;  %v4678_v42 = vpop.f32.mrf.mxu3  ;;  %v4559_v49 = vadd.f32 %v4558_v46, %v4470_v10  ;;  %v4478_v37 = vadd.f32 %v4477_v26, %v2431_v4  ;;  %v8549_v46 = vld [vmem:[#allocation57_spill] sm:$0xff] }
 0x3c0   : > { %v8097_v5 = vpop.f32.mrf.mxu0  ;;  %v4562_v47 = vpop.f32.mrf.mxu1 }
 0x3c1   : > { %v8100_v23 = vpop.f32.mrf.mxu2  ;;  %v8102_v44 = vpop.f32.mrf.mxu3  ;;  %v4563_v8 = vadd.f32 %v4562_v47, %v4478_v37 }
 0x3c8   : > { %v8106_v54 = vpop.f32.mrf.mxu1  ;;  %v4735_v38 = vpop.f32.mrf.mxu0 }
 0x3c9   : > { %v8109_v36 = vpop.f32.mrf.mxu2  ;;  %v8111_v57 = vpop.f32.mrf.mxu3  ;;  %v4736_v51 = vadd.f32 %v4735_v38, %v4661_v55  ;;  %v4620_v38 = vadd.f32 %v4619_v29, %v4559_v49  ;;  %v8550_v55 = vld [vmem:[#allocation66_spill] sm:$0xff]  ;;  %v4625_v29 = vadd.f32 %v8100_v23, %v4563_v8 }
 0x3ca   : > { %v2386_v43 = vadd.f32 %v8550_v55, %v8549_v46  ;;  %v337_v8 = vld [vmem:[#allocation2 + $0x58] sm:$0xff] }
 0x3cb   : > { %v4679_v32 = vadd.f32 %v4678_v42, %v4620_v38  ;;  %v4685_v47 = vadd.f32 %v8102_v44, %v4625_v29 }
 0x3d0   : > { %v4739_v28 = vpop.f32.mrf.mxu0  ;;  %v4784_v9 = vpop.f32.mrf.mxu1 }
 0x3d1   : > { %v4785_v33 = vadd.f32 %v4784_v9, %v4736_v51  ;;  %v8116_v35 = vpop.f32.mrf.mxu2  ;;  %v8118_v11 = vpop.f32.mrf.mxu3  ;;  %v4740_v61 = vadd.f32 %v4739_v28, %v4667_v52  ;;  %v8551_v28 = vld [vmem:[#allocation68_spill] sm:$0xff] }
 0x3d3   : > { %v5203_v41 = vadd.f32 %v4785_v33, %v330_v16  ;;  %v2435_v16 = vadd.f32 %v8551_v28, %v2386_v43 }
 0x3d5   : > { %5239 = vst [vmem:[#allocation2 + $0x20] sm:$0xff] %v5203_v41  ;;  %v4486_v26 = vadd.f32 %v8097_v5, %v2435_v16  ;;  %v354_v41 = vld [vmem:[#allocation2 + $0xe0] sm:$0xff] }
 0x3d7   : > { %v4567_v53 = vadd.f32 %v8106_v54, %v4486_v26  ;;  %v8552_v54 = vld [vmem:[#allocation69_spill] sm:$0xff] }
 0x3d8   : > { %v4743_v48 = vpop.f32.mrf.mxu0  ;;  %v4788_v30 = vpop.f32.mrf.mxu1 }
 0x3d9   : > { %v4789_v31 = vadd.f32 %v4788_v30, %v4740_v61  ;;  %v4845_v24 = vpop.f32.mrf.mxu2  ;;  %v8123_v19 = vpop.f32.mrf.mxu3  ;;  %v4744_v39 = vadd.f32 %v4743_v48, %v4673_v22  ;;  %v4630_v40 = vadd.f32 %v8109_v36, %v4567_v53  ;;  %v360_v48 = vld [vmem:[#allocation2 + $0x110] sm:$0xff]  ;;  %v4838_v30 = vadd.f32 %v8116_v35, %v8552_v54 }
 0x3db   : > { %v5209_v27 = vadd.f32 %v4789_v31, %v336_v25  ;;  %v4691_v61 = vadd.f32 %v8111_v57, %v4630_v40  ;;  %v4939_v31 = vadd.f32 %v8118_v11, %v4838_v30  ;;  %v8553_v57 = vld [vmem:[#allocation70_spill] sm:$0xff]  ;;  %v8554_v11 = vld [vmem:[#allocation71_spill] sm:$0xff] }
 0x3dc   : > { %v4846_v49 = vadd.f32 %v4845_v24, %v8553_v57 }
 0x3dd   : > { %5246 = vst [vmem:[#allocation2 + $0x50] sm:$0xff] %v5209_v27 }
 0x3de   : > { %v4943_v35 = vadd.f32 %v8123_v19, %v4846_v49 }
 0x3e0   : > { %v4747_v58 = vpop.f32.mrf.mxu0  ;;  %v4792_v17 = vpop.f32.mrf.mxu1 }
 0x3e1   : > { %v4793_v45 = vadd.f32 %v4792_v17, %v4744_v39  ;;  %v4853_v59 = vpop.f32.mrf.mxu2  ;;  %v8128_v18 = vpop.f32.mrf.mxu3  ;;  %v4748_v60 = vadd.f32 %v4747_v58, %v4679_v32  ;;  %v331_v58 = vld [vmem:[#allocation2 + $0x28] sm:$0xff] }
 0x3e3   : > { %v5215_v56 = vadd.f32 %v4793_v45, %v342_v15  ;;  %v4854_v45 = vadd.f32 %v4853_v59, %v8554_v11 }
 0x3e5   : > { %5252 = vst [vmem:[#allocation2 + $0x80] sm:$0xff] %v5215_v56  ;;  %v4947_v46 = vadd.f32 %v8128_v18, %v4854_v45 }
 0x3e8   : > { %v4751_v7 = vpop.f32.mrf.mxu0  ;;  %v4796_v51 = vpop.f32.mrf.mxu1 }
 0x3e9   : > { %v4797_v9 = vadd.f32 %v4796_v51, %v4748_v60  ;;  %v4861_v14 = vpop.f32.mrf.mxu2  ;;  %v8134_v21 = vpop.f32.mrf.mxu3  ;;  %v4752_v33 = vadd.f32 %v4751_v7, %v4685_v47 }
 0x3eb   : > { %v5221_v42 = vadd.f32 %v4797_v9, %v348_v13  ;;  %v8555_v13 = vld [vmem:[#allocation72_spill] sm:$0xff] }
 0x3ec   : > { %v4862_v51 = vadd.f32 %v4861_v14, %v8555_v13  ;;  %v343_v9 = vld [vmem:[#allocation2 + $0x88] sm:$0xff] }
 0x3ed   : > { %5258 = vst [vmem:[#allocation2 + $0xb0] sm:$0xff] %v5221_v42 }
 0x3ee   : > { %v4951_v26 = vadd.f32 %v8134_v21, %v4862_v51 }
 0x3f0   : > { %v4755_v6 = vpop.f32.mrf.mxu0  ;;  %v4800_v52 = vpop.f32.mrf.mxu1 }
 0x3f1   : > { %v4801_v20 = vadd.f32 %v4800_v52, %v4752_v33  ;;  %v4869_v23 = vpop.f32.mrf.mxu2  ;;  %v8140_v12 = vpop.f32.mrf.mxu3  ;;  %v4756_v5 = vadd.f32 %v4755_v6, %v4691_v61  ;;  %v8556_v33 = vld [vmem:[#allocation73_spill] sm:$0xff] }
 0x3f2   : > { %v4870_v6 = vadd.f32 %v4869_v23, %v8556_v33 }
 0x3f3   : > { %v5227_v0 = vadd.f32 %v4801_v20, %v354_v41 }
 0x3f4   : > { %v4955_v61 = vadd.f32 %v8140_v12, %v4870_v6 }
 0x3f5   : > { %5264 = vst [vmem:[#allocation2 + $0xe0] sm:$0xff] %v5227_v0  ;;  %v349_v0 = vld [vmem:[#allocation2 + $0xb8] sm:$0xff] }
 0x3f8   : > { %v4804_v44 = vpop.f32.mrf.mxu1  ;;  %v4996_v25 = vpop.f32.mrf.mxu0 }
 0x3f9   : > { %v4805_v2 = vadd.f32 %v4804_v44, %v4756_v5  ;;  %v4877_v50 = vpop.f32.mrf.mxu2  ;;  %v8145_v63 = vpop.f32.mrf.mxu3  ;;  %v4997_v10 = vadd.f32 %v4996_v25, %v4939_v31  ;;  %v8557_v25 = vld [vmem:[#allocation74_spill] sm:$0xff] }
 0x3fa   : > { %v4878_v54 = vadd.f32 %v4877_v50, %v8557_v25 }
 0x3fb   : > { %v5233_v36 = vadd.f32 %v4805_v2, %v360_v48 }
 0x3fd   : > { %5270 = vst [vmem:[#allocation2 + $0x110] sm:$0xff] %v5233_v36 }
 0x400   : > { %v5001_v27 = vpop.f32.mrf.mxu0  ;;  %v5052_v22 = vpop.f32.mrf.mxu1 }
 0x401   : > { %v5053_v3 = vadd.f32 %v5052_v22, %v4997_v10  ;;  %v5127_v62 = vpop.f32.mrf.mxu2  ;;  %v5176_v34 = vpop.f32.mrf.mxu3  ;;  %v5002_v17 = vadd.f32 %v5001_v27, %v4943_v35  ;;  %v355_v10 = vld [vmem:[#allocation2 + $0xe8] sm:$0xff]  ;;  %v4959_v27 = vadd.f32 %v8145_v63, %v4878_v54 }
 0x403   : > { %v5128_v39 = vadd.f32 %v5127_v62, %v5053_v3 }
 0x405   : > { %v5177_v15 = vadd.f32 %v5176_v34, %v5128_v39  ;;  %v361_v39 = vld [vmem:[#allocation2 + $0x118] sm:$0xff] }
 0x407   : > { %v5204_v1 = vadd.f32 %v5177_v15, %v331_v58 }
 0x408   : > { %v5006_v4 = vpop.f32.mrf.mxu0  ;;  %v5058_v38 = vpop.f32.mrf.mxu1 }
 0x409   : > { %5241 = vst.msk [vmem:[#allocation2 + $0x28] sm:$0xff] %vm5240_vm2, %v5204_v1  ;;  %v5059_v37 = vadd.f32 %v5058_v38, %v5002_v17  ;;  %v5131_v56 = vpop.f32.mrf.mxu2  ;;  %v5180_v24 = vpop.f32.mrf.mxu3  ;;  %v5007_v43 = vadd.f32 %v5006_v4, %v4947_v46 }
 0x40b   : > { %v5132_v32 = vadd.f32 %v5131_v56, %v5059_v37 }
 0x40d   : > { %v5181_v55 = vadd.f32 %v5180_v24, %v5132_v32 }
 0x40f   : > { %v5210_v19 = vadd.f32 %v5181_v55, %v337_v8 }
 0x410   : > { %v5011_v60 = vpop.f32.mrf.mxu0  ;;  %v5064_v7 = vpop.f32.mrf.mxu1 }
 0x411   : > { %5247 = vst.msk [vmem:[#allocation2 + $0x58] sm:$0xff] %vm5240_vm2, %v5210_v19  ;;  %v5065_v28 = vadd.f32 %v5064_v7, %v5007_v43  ;;  %v5135_v59 = vpop.f32.mrf.mxu2  ;;  %v5184_v16 = vpop.f32.mrf.mxu3  ;;  %v5012_v47 = vadd.f32 %v5011_v60, %v4951_v26 }
 0x413   : > { %v5136_v29 = vadd.f32 %v5135_v59, %v5065_v28 }
 0x415   : > { %v5185_v42 = vadd.f32 %v5184_v16, %v5136_v29 }
 0x417   : > { %v5216_v53 = vadd.f32 %v5185_v42, %v343_v9 }
 0x418   : > { %v5070_v18 = vpop.f32.mrf.mxu1  ;;  %v5016_v40 = vpop.f32.mrf.mxu0 }
 0x419   : > { %5253 = vst.msk [vmem:[#allocation2 + $0x88] sm:$0xff] %vm5240_vm2, %v5216_v53  ;;  %v5071_v41 = vadd.f32 %v5070_v18, %v5012_v47  ;;  %v5139_v52 = vpop.f32.mrf.mxu2  ;;  %v5188_v14 = vpop.f32.mrf.mxu3  ;;  %v5017_v48 = vadd.f32 %v5016_v40, %v4955_v61 }
 0x41b   : > { %v5140_v20 = vadd.f32 %v5139_v52, %v5071_v41 }
 0x41d   : > { %v5189_v5 = vadd.f32 %v5188_v14, %v5140_v20 }
 0x41f   : > { %v5222_v44 = vadd.f32 %v5189_v5, %v349_v0 }
 0x420   : > { %v5076_v21 = vpop.f32.mrf.mxu1  ;;  %v5021_v31 = vpop.f32.mrf.mxu0 }
 0x421   : > { %5259 = vst.msk [vmem:[#allocation2 + $0xb8] sm:$0xff] %vm5240_vm2, %v5222_v44  ;;  %v5077_v30 = vadd.f32 %v5076_v21, %v5017_v48  ;;  %v5143_v23 = vpop.f32.mrf.mxu2  ;;  %v5192_v2 = vpop.f32.mrf.mxu3  ;;  %v5022_v57 = vadd.f32 %v5021_v31, %v4959_v27 }
 0x423   : > { %v5144_v36 = vadd.f32 %v5143_v23, %v5077_v30 }
 0x425   : > { %v5193_v22 = vadd.f32 %v5192_v2, %v5144_v36 }
 0x427   : > { %v5228_v49 = vadd.f32 %v5193_v22, %v355_v10 }
 0x428   : > { %v5082_v12 = vpop.f32.mrf.mxu1 }
 0x429   : > { %5265 = vst.msk [vmem:[#allocation2 + $0xe8] sm:$0xff] %vm5240_vm2, %v5228_v49  ;;  %v5083_v3 = vadd.f32 %v5082_v12, %v5022_v57  ;;  %v5147_v62 = vpop.f32.mrf.mxu2  ;;  %v5196_v34 = vpop.f32.mrf.mxu3 }
 0x42b   : > { %v5148_v50 = vadd.f32 %v5147_v62, %v5083_v3 }
 0x42d   : > { %v5197_v58 = vadd.f32 %v5196_v34, %v5148_v50  ;;  %5275 = sbr.rel (%p5531_p6) target bundleno = 1217 (0x4c1), region = 44 }
 0x42f   : > { %v5234_v35 = vadd.f32 %v5197_v58, %v361_v39 }
 0x431   : > { %5271 = vst.msk [vmem:[#allocation2 + $0x118] sm:$0xff] %vm5240_vm2, %v5234_v35 }
 0x432   : > { %v5314_v63 = vld [vmem:[%s8309_s3 + $0x10] sm:$0xff]  ;;  %v5312_v15 = vld [vmem:[%s8309_s3] sm:$0xff]  ;;  %v5590_v17 = vmov 0   ;;  %v5315_v4 = vld [vmem:[%s8309_s3 + $0x18] sm:$0xff] }
 0x433   : > { %5563 = vset.pattern.permute.xlu1 %v5590_v17  ;;  %5562 = vset.pattern.permute.xlu0 %v5590_v17  ;;  %v5316_v1 = vld [vmem:[%s8309_s3 + $0x20] sm:$0xff]  ;;  %v5313_v38 = vld [vmem:[%s8309_s3 + $0x8] sm:$0xff]  ;;  %v5302_v56 = vld [vmem:[#allocation2 + $0xd0] sm:$0xff] }
 0x434   : > { %5330 = vperm.xlu1 %5563, %v5314_v63   ;;  %5320 = vperm.xlu0 %5562, %v5312_v15   ;;  %v5317_v11 = vld [vmem:[%s8309_s3 + $0x28] sm:$0xff]  ;;  %v5300_v45 = vld [vmem:[#allocation2 + $0xc0] sm:$0xff]  ;;  %v5303_v24 = vld [vmem:[#allocation2 + $0xd8] sm:$0xff] }
 0x435   : > { %5564 = vset.pattern.permute.xlu2 %v5590_v17  ;;  %v5301_v37 = vld [vmem:[#allocation2 + $0xc8] sm:$0xff]  ;;  %v5304_v8 = vld [vmem:[#allocation2 + $0xe0] sm:$0xff]  ;;  %v5306_v51 = vld [vmem:[#allocation2 + $0xf0] sm:$0xff] }
 0x436   : > { %5340 = vperm.xlu2 %5564, %v5316_v1   ;;  %v5305_v46 = vld [vmem:[#allocation2 + $0xe8] sm:$0xff]  ;;  %v5307_v28 = vld [vmem:[#allocation2 + $0xf8] sm:$0xff]  ;;  %v5308_v59 = vld [vmem:[#allocation2 + $0x100] sm:$0xff] }
 0x437   : > { %v5309_v16 = vld [vmem:[#allocation2 + $0x108] sm:$0xff]  ;;  %v5310_v9 = vld [vmem:[#allocation2 + $0x110] sm:$0xff]  ;;  %v5288_v41 = vld [vmem:[#allocation2 + $0x60] sm:$0xff] }
 0x438   : > { %v5311_v26 = vld [vmem:[#allocation2 + $0x118] sm:$0xff]  ;;  %v5289_v52 = vld [vmem:[#allocation2 + $0x68] sm:$0xff]  ;;  %v5290_v14 = vld [vmem:[#allocation2 + $0x70] sm:$0xff] }
 0x439   : > { %v5291_v40 = vld [vmem:[#allocation2 + $0x78] sm:$0xff]  ;;  %v5292_v0 = vld [vmem:[#allocation2 + $0x80] sm:$0xff]  ;;  %v5293_v61 = vld [vmem:[#allocation2 + $0x88] sm:$0xff] }
 0x43a   : > { %v5276_v54 = vld [vmem:[#allocation2] sm:$0xff]  ;;  %v5277_v23 = vld [vmem:[#allocation2 + $0x8] sm:$0xff]  ;;  %v5278_v36 = vld [vmem:[#allocation2 + $0x10] sm:$0xff] }
 0x43b   : > { %v5279_v31 = vld [vmem:[#allocation2 + $0x18] sm:$0xff]  ;;  %v5280_v27 = vld [vmem:[#allocation2 + $0x20] sm:$0xff]  ;;  %v5281_v57 = vld [vmem:[#allocation2 + $0x28] sm:$0xff] }
 0x43c   : > { %5335 = vperm.xlu1 %5563, %v5315_v4   ;;  %5325 = vperm.xlu0 %5562, %v5313_v38   ;;  %v5294_v62 = vld [vmem:[#allocation2 + $0x90] sm:$0xff]  ;;  %v5295_v50 = vld [vmem:[#allocation2 + $0x98] sm:$0xff]  ;;  %v5296_v58 = vld [vmem:[#allocation2 + $0xa0] sm:$0xff] }
 0x43d   : > { %v5297_v35 = vld [vmem:[#allocation2 + $0xa8] sm:$0xff]  ;;  %v5298_v15 = vld [vmem:[#allocation2 + $0xb0] sm:$0xff]  ;;  %v5299_v1 = vld [vmem:[#allocation2 + $0xb8] sm:$0xff] }
 0x43e   : > { %5345 = vperm.xlu2 %5564, %v5317_v11  }
 0x490   : > { %v5341_v32 = vpop.permute.xlu2 %5340 }
 0x491   : > { %v5372_v55 = vadd.f32 %v5341_v32, %v5300_v45  ;;  %v5373_v43 = vadd.f32 %v5341_v32, %v5301_v37  ;;  %v5374_v19 = vadd.f32 %v5341_v32, %v5302_v56  ;;  %v5375_v60 = vadd.f32 %v5341_v32, %v5303_v24  ;;  %v5282_v45 = vld [vmem:[#allocation2 + $0x30] sm:$0xff]  ;;  %v5283_v56 = vld [vmem:[#allocation2 + $0x38] sm:$0xff] }
 0x492   : > { %v5376_v7 = vadd.f32 %v5341_v32, %v5304_v8  ;;  %v5377_v13 = vadd.f32 %v5341_v32, %v5305_v46  ;;  %v5284_v32 = vld [vmem:[#allocation2 + $0x40] sm:$0xff]  ;;  %v5285_v8 = vld [vmem:[#allocation2 + $0x48] sm:$0xff] }
 0x493   : > { %5408 = vst [vmem:[%s8310_s4 + $0xc0] sm:$0xff] %v5372_v55  ;;  %v5286_v55 = vld [vmem:[#allocation2 + $0x50] sm:$0xff] }
 0x494   : > { %5409 = vst [vmem:[%s8310_s4 + $0xc8] sm:$0xff] %v5373_v43 }
 0x495   : > { %5410 = vst [vmem:[%s8310_s4 + $0xd0] sm:$0xff] %v5374_v19  ;;  %v5287_v19 = vld [vmem:[#allocation2 + $0x58] sm:$0xff] }
 0x496   : > { %5411 = vst [vmem:[%s8310_s4 + $0xd8] sm:$0xff] %v5375_v60 }
 0x497   : > { %5412 = vst [vmem:[%s8310_s4 + $0xe0] sm:$0xff] %v5376_v7 }
 0x498   : > { %5413 = vst.msk [vmem:[%s8310_s4 + $0xe8] sm:$0xff] %vm5240_vm2, %v5377_v13  ;;  %v5346_v29 = vpop.permute.xlu2 %5345 }
 0x499   : > { %v5378_v42 = vadd.f32 %v5346_v29, %v5306_v51  ;;  %v5379_v47 = vadd.f32 %v5346_v29, %v5307_v28  ;;  %v5380_v53 = vadd.f32 %v5346_v29, %v5308_v59  ;;  %v5381_v18 = vadd.f32 %v5346_v29, %v5309_v16 }
 0x49a   : > { %v5382_v33 = vadd.f32 %v5346_v29, %v5310_v9  ;;  %v5383_v6 = vadd.f32 %v5346_v29, %v5311_v26 }
 0x49b   : > { %5414 = vst [vmem:[%s8310_s4 + $0xf0] sm:$0xff] %v5378_v42 }
 0x49c   : > { %5415 = vst [vmem:[%s8310_s4 + $0xf8] sm:$0xff] %v5379_v47 }
 0x49d   : > { %5416 = vst [vmem:[%s8310_s4 + $0x100] sm:$0xff] %v5380_v53 }
 0x49e   : > { %5417 = vst [vmem:[%s8310_s4 + $0x108] sm:$0xff] %v5381_v18 }
 0x49f   : > { %5418 = vst [vmem:[%s8310_s4 + $0x110] sm:$0xff] %v5382_v33 }
 0x4a0   : > { %5419 = vst.msk [vmem:[%s8310_s4 + $0x118] sm:$0xff] %vm5240_vm2, %v5383_v6 }
 0x4a6   : > { %v5331_v20 = vpop.permute.xlu1 %5330  ;;  %v5321_v25 = vpop.permute.xlu0 %5320 }
 0x4a7   : > { %v5360_v5 = vadd.f32 %v5331_v20, %v5288_v41  ;;  %v5361_v48 = vadd.f32 %v5331_v20, %v5289_v52  ;;  %v5362_v44 = vadd.f32 %v5331_v20, %v5290_v14  ;;  %v5363_v21 = vadd.f32 %v5331_v20, %v5291_v40 }
 0x4a8   : > { %v5364_v30 = vadd.f32 %v5331_v20, %v5292_v0  ;;  %v5365_v2 = vadd.f32 %v5331_v20, %v5293_v61  ;;  %v5348_v10 = vadd.f32 %v5321_v25, %v5276_v54  ;;  %v5349_v22 = vadd.f32 %v5321_v25, %v5277_v23 }
 0x4a9   : > { %5396 = vst [vmem:[%s8310_s4 + $0x60] sm:$0xff] %v5360_v5  ;;  %v5350_v49 = vadd.f32 %v5321_v25, %v5278_v36  ;;  %v5351_v12 = vadd.f32 %v5321_v25, %v5279_v31  ;;  %v5352_v34 = vadd.f32 %v5321_v25, %v5280_v27  ;;  %v5353_v39 = vadd.f32 %v5321_v25, %v5281_v57 }
 0x4aa   : > { %5397 = vst [vmem:[%s8310_s4 + $0x68] sm:$0xff] %v5361_v48 }
 0x4ab   : > { %5398 = vst [vmem:[%s8310_s4 + $0x70] sm:$0xff] %v5362_v44 }
 0x4ac   : > { %5399 = vst [vmem:[%s8310_s4 + $0x78] sm:$0xff] %v5363_v21 }
 0x4ad   : > { %5400 = vst [vmem:[%s8310_s4 + $0x80] sm:$0xff] %v5364_v30 }
 0x4ae   : > { %5401 = vst.msk [vmem:[%s8310_s4 + $0x88] sm:$0xff] %vm5240_vm2, %v5365_v2  ;;  %v5336_v3 = vpop.permute.xlu1 %5335  ;;  %v5326_v11 = vpop.permute.xlu0 %5325 }
 0x4af   : > { %5384 = vst [vmem:[%s8310_s4] sm:$0xff] %v5348_v10  ;;  %v5366_v63 = vadd.f32 %v5336_v3, %v5294_v62  ;;  %v5367_v17 = vadd.f32 %v5336_v3, %v5295_v50  ;;  %v5368_v4 = vadd.f32 %v5336_v3, %v5296_v58  ;;  %v5369_v38 = vadd.f32 %v5336_v3, %v5297_v35 }
 0x4b0   : > { %5385 = vst [vmem:[%s8310_s4 + $0x8] sm:$0xff] %v5349_v22  ;;  %v5370_v37 = vadd.f32 %v5336_v3, %v5298_v15  ;;  %v5371_v24 = vadd.f32 %v5336_v3, %v5299_v1  ;;  %v5354_v46 = vadd.f32 %v5326_v11, %v5282_v45  ;;  %v5355_v43 = vadd.f32 %v5326_v11, %v5283_v56 }
 0x4b1   : > { %5386 = vst [vmem:[%s8310_s4 + $0x10] sm:$0xff] %v5350_v49  ;;  %v5356_v60 = vadd.f32 %v5326_v11, %v5284_v32  ;;  %v5357_v7 = vadd.f32 %v5326_v11, %v5285_v8  ;;  %v5358_v13 = vadd.f32 %v5326_v11, %v5286_v55  ;;  %v5359_v51 = vadd.f32 %v5326_v11, %v5287_v19 }
 0x4b2   : > { %5387 = vst [vmem:[%s8310_s4 + $0x18] sm:$0xff] %v5351_v12 }
 0x4b3   : > { %5388 = vst [vmem:[%s8310_s4 + $0x20] sm:$0xff] %v5352_v34 }
 0x4b4   : > { %5389 = vst.msk [vmem:[%s8310_s4 + $0x28] sm:$0xff] %vm5240_vm2, %v5353_v39 }
 0x4b5   : > { %5402 = vst [vmem:[%s8310_s4 + $0x90] sm:$0xff] %v5366_v63 }
 0x4b6   : > { %5403 = vst [vmem:[%s8310_s4 + $0x98] sm:$0xff] %v5367_v17 }
 0x4b7   : > { %5404 = vst [vmem:[%s8310_s4 + $0xa0] sm:$0xff] %v5368_v4 }
 0x4b8   : > { %5405 = vst [vmem:[%s8310_s4 + $0xa8] sm:$0xff] %v5369_v38 }
 0x4b9   : > { %5406 = vst [vmem:[%s8310_s4 + $0xb0] sm:$0xff] %v5370_v37 }
 0x4ba   : > { %5407 = vst.msk [vmem:[%s8310_s4 + $0xb8] sm:$0xff] %vm5240_vm2, %v5371_v24 }
 0x4bb   : > { %5390 = vst [vmem:[%s8310_s4 + $0x30] sm:$0xff] %v5354_v46 }
 0x4bc   : > { %5391 = vst [vmem:[%s8310_s4 + $0x38] sm:$0xff] %v5355_v43 }
 0x4bd   : > { %5392 = vst [vmem:[%s8310_s4 + $0x40] sm:$0xff] %v5356_v60 }
 0x4be   : > { %5393 = vst [vmem:[%s8310_s4 + $0x48] sm:$0xff] %v5357_v7 }
 0x4bf   : > { %5394 = vst [vmem:[%s8310_s4 + $0x50] sm:$0xff] %v5358_v13 }
 0x4c0   : > { %5395 = vst.msk [vmem:[%s8310_s4 + $0x58] sm:$0xff] %vm5240_vm2, %v5359_v51 }
 0x4c1 PF: > { %s14_s17 = sadd.s32 1, %s5587_s17   ;;  %s8558_s15 = smov %s5583_s16 }
 0x4c2   : > { %p11_p7 = scmp.ge.s32.totalorder %s14_s17, 5   ;;  %s8559_s16 = smov %s8561_s18 }
 0x4c4   :  { %13 = sbr.rel (!%p11_p7) target bundleno = 2 (0x2), region = 79 }

</bundles_post_ra>
